<compile_context>
chip_gen: v7x
topology: tpu7x:2x2x1
jax: 0.10.0
libtpu: 0.0.40
codegen_flags: <defaults>
</compile_context>

<pallas_src>
import functools

import jax
import jax.numpy as jnp
from jax import lax
from jax.experimental import pallas as pl
from jax.experimental.pallas import tpu as pltpu


_OUT_LANES = 128  # pad the class dim of the output to a full lane register


def _wildcat_kernel(x_ref, w_ref, b_ref, o_ref, mt_t_ref, *,
                    batch_block, num_classes, hw, jc, kmax, kmin, alpha, out_lanes):
    C = num_classes
    n_chunks = hw // jc

    w = w_ref[...]       # (C, Cin)  resident across the whole grid
    bcol = b_ref[...]    # (C, 1)

    # Loop-invariant tie-break index tensors (hoisted; JAX does not CSE broadcasts).
    idx_i = lax.broadcasted_iota(jnp.int32, (1, jc, hw), 2)   # spatial index i (lanes)
    loc_j = lax.broadcasted_iota(jnp.int32, (1, jc, hw), 1)   # local j within a chunk

    def partial_rank(vals_j, vals_i, j0):
        # vals_j: (C, jc, 1) values at positions j0..j0+jc, vals_i: (C, 1, hw).
        # beats[c, j, i] == 1 iff position j outranks position i for class c:
        # strictly larger value, or equal value and earlier index (stable rank).
        tie = (loc_j + j0) < idx_i                                  # (1, jc, hw)
        beats = (vals_j > vals_i) | ((vals_j == vals_i) & tie)      # (C, jc, hw)
        # Reduce over j == the sublane axis: plain vreg adds on the VPU, which is a
        # small fraction of the compare/select work above (no XLU lane reduce needed).
        return jnp.sum(beats.astype(jnp.int32), axis=1, keepdims=True)   # (C, 1, hw)

    def one_image(b, carry):
        # Fused 1x1 conv + modality mean-pool + bias: (C, Cin) @ (Cin, HW) on the MXU.
        mt = jnp.dot(w, x_ref[b], preferred_element_type=jnp.float32) + bcol  # (C, hw)
        vals_i = mt[:, None, :]                                               # (C, 1, hw)

        if n_chunks == 1:
            rank = partial_rank(mt[:, :, None], vals_i, 0)
        else:
            # Chunk the j axis: bounds live temporaries to O(C * jc * hw).
            mt_t_ref[...] = mt.T                                              # (hw, C)

            def chunk_body(k, acc):
                j0 = k * jc
                chunk = mt_t_ref[pl.ds(j0, jc), :]                            # (jc, C)
                vals_j = jnp.transpose(chunk, (1, 0))[:, :, None]             # (C, jc, 1)
                return acc + partial_rank(vals_j, vals_i, j0)

            rank = lax.fori_loop(0, n_chunks, chunk_body,
                                 jnp.zeros((C, 1, hw), jnp.int32))

        # WILDCAT decision: mean of the kmax best (+ alpha * mean of the kmin worst).
        top_sum = jnp.sum(jnp.where(rank < kmax, vals_i, 0.0), axis=2)        # (C, 1)
        score = top_sum * (1.0 / kmax)
        if kmin > 0 and alpha != 0.0:
            bot_sum = jnp.sum(jnp.where(rank >= hw - kmin, vals_i, 0.0), axis=2)
            score = score + (alpha / kmin) * bot_sum                          # (C, 1)

        # Lane-dense output row: (1, C) padded to (1, out_lanes).
        row = jnp.reshape(score, (1, C))
        if out_lanes > C:
            row = jnp.concatenate(
                [row, jnp.zeros((1, out_lanes - C), jnp.float32)], axis=1)
        o_ref[pl.ds(b, 1), :] = row
        return carry

    lax.fori_loop(0, batch_block, one_image, 0)
    # TODO(synk): WildCatPoolDecision's dropout on the top-k scores is not implemented
    # (module default dropout=0.0 makes it a no-op).


def _get_k(k, n):
    if k <= 0:
        return 0
    if k < 1:
        return int(round(k * n))
    if k > n:
        return int(n)
    return int(k)


def _pick_chunk(hw, num_classes, bytes_per_tensor=2 * 1024 * 1024):
    """Largest divisor of hw such that a (C, jc, hw) f32 temporary stays small."""
    max_jc = max(1, bytes_per_tensor // (4 * num_classes * hw))
    if max_jc >= hw:
        return hw
    best = 1
    for d in range(1, hw + 1):
        if hw % d == 0 and d <= max_jc:
            best = d
    return best


def wildcat_classifier_head(x_nchw, v, g, bias, *, num_classes, modalities,
                            kmax=0.5, kmin=None, alpha=0.6, batch_block=None):
    """Forward pass of WildCatClassifierHead. Returns (N, num_classes) scores."""
    N, Cin, H, W = x_nchw.shape
    CM = num_classes * modalities
    hw = H * W

    # weight_norm: w = g * v / ||v||  (norm over all dims except the out-channel).
    v2 = v.reshape(CM, Cin).astype(jnp.float32)
    norm = jnp.sqrt(jnp.sum(v2 * v2, axis=1, keepdims=True))
    w_oc = g.reshape(CM, 1).astype(jnp.float32) * v2 / norm             # (CM, Cin)

    # Fold the class-wise mean pooling over modalities (linear) and the bias into the
    # conv weight: one small matmul replaces conv + pool inside the kernel.
    w_eff = w_oc.reshape(num_classes, modalities, Cin).mean(axis=1)     # (C, Cin)
    b_eff = bias.astype(jnp.float32).reshape(num_classes, modalities).mean(axis=1)
    b_eff = b_eff.reshape(num_classes, 1)                               # (C, 1)

    # Native NCHW layout, just flattened: (N, Cin, H*W).  No transpose needed.
    x_flat = x_nchw.reshape(N, Cin, hw).astype(jnp.float32)

    kmax_i = max(1, _get_k(kmax, hw))
    kmin_i = kmax_i if kmin is None else _get_k(kmin, hw)
    jc = _pick_chunk(hw, num_classes)
    out_lanes = max(_OUT_LANES,
                    ((num_classes + _OUT_LANES - 1) // _OUT_LANES) * _OUT_LANES)

    if batch_block is None:
        batch_block = min(N, 8)
    n_pad = pl.cdiv(N, batch_block) * batch_block
    if n_pad != N:
        x_flat = jnp.concatenate(
            [x_flat, jnp.zeros((n_pad - N, Cin, hw), jnp.float32)], axis=0)

    kernel = functools.partial(
        _wildcat_kernel, batch_block=batch_block, num_classes=num_classes,
        hw=hw, jc=jc, kmax=kmax_i, kmin=kmin_i, alpha=float(alpha),
        out_lanes=out_lanes)

    out = pl.pallas_call(
        kernel,
        out_shape=jax.ShapeDtypeStruct((n_pad, out_lanes), jnp.float32),
        grid_spec=pltpu.PrefetchScalarGridSpec(
            num_scalar_prefetch=0,
            grid=(n_pad // batch_block,),
            in_specs=[
                pl.BlockSpec((batch_block, Cin, hw), lambda i: (i, 0, 0)),
                pl.BlockSpec((num_classes, Cin), lambda i: (0, 0)),
                pl.BlockSpec((num_classes, 1), lambda i: (0, 0)),
            ],
            out_specs=pl.BlockSpec((batch_block, out_lanes), lambda i: (i, 0)),
            scratch_shapes=[pltpu.VMEM((hw, num_classes), jnp.float32)],
        ),
        compiler_params=pltpu.CompilerParams(
            dimension_semantics=("parallel",),
            vmem_limit_bytes=32 * 1024 * 1024),
    )(x_flat, w_eff, b_eff)

    return out[:N, :num_classes]


def ref_forward(x_nchw, v, g, bias, *, num_classes, modalities,
                kmax=0.5, kmin=None, alpha=0.6):
    """Pure-JAX reference matching the PyTorch semantics (sort-based)."""
    N, Cin, H, W = x_nchw.shape
    CM = num_classes * modalities
    n = H * W
    v2 = v.reshape(CM, Cin).astype(jnp.float32)
    norm = jnp.sqrt(jnp.sum(v2 * v2, axis=1, keepdims=True))
    w = g.reshape(CM, 1).astype(jnp.float32) * v2 / norm
    y = jnp.einsum("nchw,oc->nohw", x_nchw.astype(jnp.float32), w)
    y = y + bias.astype(jnp.float32)[None, :, None, None]
    maps = y.reshape(N, num_classes, modalities, H, W).mean(axis=2)
    flat = maps.reshape(N, num_classes, n)
    ki = max(1, _get_k(kmax, n))
    kj = ki if kmin is None else _get_k(kmin, n)
    srt = jnp.sort(flat, axis=-1)[..., ::-1]
    score = srt[..., :ki].sum(-1) / ki
    if kj > 0 and alpha != 0.0:
        score = score + alpha * srt[..., n - kj:].sum(-1) / kj
    return score


if __name__ == "__main__":
    # Small shapes consistent with the module: inplans=32, classes=4, modalities=4.
    N, Cin, H, W = 2, 32, 16, 16
    num_classes, modalities = 4, 4
    CM = num_classes * modalities

    key = jax.random.PRNGKey(0)
    kx, kv, kg, kb = jax.random.split(key, 4)
    x = jax.random.normal(kx, (N, Cin, H, W), dtype=jnp.float32)
    v = jax.random.normal(kv, (CM, Cin, 1, 1), dtype=jnp.float32) * 0.1   # weight_norm "v"
    g = 1.0 + 0.1 * jax.random.normal(kg, (CM,), dtype=jnp.float32)       # weight_norm "g"
    bias = 0.05 * jax.random.normal(kb, (CM,), dtype=jnp.float32)

    out = wildcat_classifier_head(
        x, v, g, bias, num_classes=num_classes, modalities=modalities,
        kmax=0.5, kmin=None, alpha=0.6)
    out = jax.block_until_ready(out)

    ref = ref_forward(
        x, v, g, bias, num_classes=num_classes, modalities=modalities,
        kmax=0.5, kmin=None, alpha=0.6)

    assert out.shape == (N, num_classes)
    assert jnp.allclose(out, ref, atol=1e-4, rtol=1e-4), (out, ref)
    print("KERNEL_OK")
</pallas_src>

<mosaic_0001>
module attributes {stable_mosaic.version = 11 : i64} {
  func.func @_wildcat_kernel(%arg0: i32, %arg1: memref<2x32x256xf32, #tpu.memory_space<vmem>>, %arg2: memref<4x32xf32, #tpu.memory_space<vmem>>, %arg3: memref<4x1xf32, #tpu.memory_space<vmem>>, %arg4: memref<2x128xf32, #tpu.memory_space<vmem>>, %arg5: memref<256x4xf32, #tpu.memory_space<vmem>>) attributes {dimension_semantics = [#tpu.dimension_semantics<parallel>], iteration_bounds = array<i64: 1>, scalar_prefetch = 0 : i64, scratch_operands = 1 : i64, tpu.core_type = #tpu.core_type<tc>, window_params = [{transform_indices = @transform_0, window_bounds = array<i64: 2, 32, 256>}, {pipeline_mode = #tpu.pipeline_mode<synchronous>, transform_indices = @transform_1, window_bounds = array<i64: 4, 32>}, {pipeline_mode = #tpu.pipeline_mode<synchronous>, transform_indices = @transform_2, window_bounds = array<i64: 4, 1>}, {transform_indices = @transform_3, window_bounds = array<i64: 2, 128>}]} {
    %c0 = arith.constant 0 : index
    %c0_0 = arith.constant 0 : index
    %0 = vector.load %arg2[%c0, %c0_0] : memref<4x32xf32, #tpu.memory_space<vmem>>, vector<4x32xf32>
    %c0_1 = arith.constant 0 : index
    %c0_2 = arith.constant 0 : index
    %1 = vector.load %arg3[%c0_1, %c0_2] : memref<4x1xf32, #tpu.memory_space<vmem>>, vector<4x1xf32>
    %2 = tpu.iota {dimensions = array<i32: 2>} : vector<1x256x256xi32>
    %3 = tpu.iota {dimensions = array<i32: 1>} : vector<1x256x256xi32>
    %c0_i32 = arith.constant 0 : i32
    %c2_i32 = arith.constant 2 : i32
    %4 = arith.addi %c0_i32, %c2_i32 : i32
    %c1_i32 = arith.constant 1 : i32
    scf.for %arg6 = %c0_i32 to %4 step %c1_i32  : i32 {
      %5 = arith.index_cast %arg6 : i32 to index
      %c0_4 = arith.constant 0 : index
      %c0_5 = arith.constant 0 : index
      %6 = vector.load %arg1[%5, %c0_4, %c0_5] : memref<2x32x256xf32, #tpu.memory_space<vmem>>, vector<1x32x256xf32>
      %7 = vector.shape_cast %6 : vector<1x32x256xf32> to vector<32x256xf32>
      %cst = arith.constant dense<0.000000e+00> : vector<4x256xf32>
      %8 = tpu.matmul %0, %7, %cst {dimension_numbers = #tpu.dot_dimension_numbers<[1], [0], [0], [1], [0, 0, 1, 1], [], []>} : vector<4x32xf32>, vector<32x256xf32>, vector<4x256xf32> -> vector<4x256xf32>
      %9 = vector.broadcast %1 : vector<4x1xf32> to vector<4x256xf32>
      %10 = arith.addf %8, %9 : vector<4x256xf32>
      %11 = vector.shape_cast %10 : vector<4x256xf32> to vector<4x1x256xf32>
      %12 = vector.shape_cast %10 : vector<4x256xf32> to vector<4x256x1xf32>
      %c0_i32_6 = arith.constant 0 : i32
      %13 = vector.broadcast %c0_i32_6 : i32 to vector<1x256x256xi32>
      %14 = arith.addi %3, %13 : vector<1x256x256xi32>
      %15 = arith.cmpi slt, %14, %2 : vector<1x256x256xi32>
      %16 = vector.broadcast %12 : vector<4x256x1xf32> to vector<4x256x256xf32>
      %17 = vector.broadcast %11 : vector<4x1x256xf32> to vector<4x256x256xf32>
      %18 = arith.cmpf ogt, %16, %17 : vector<4x256x256xf32>
      %19 = vector.broadcast %12 : vector<4x256x1xf32> to vector<4x256x256xf32>
      %20 = vector.broadcast %11 : vector<4x1x256xf32> to vector<4x256x256xf32>
      %21 = arith.cmpf oeq, %19, %20 : vector<4x256x256xf32>
      %22 = vector.broadcast %15 : vector<1x256x256xi1> to vector<4x256x256xi1>
      %23 = arith.andi %21, %22 : vector<4x256x256xi1>
      %24 = arith.ori %18, %23 : vector<4x256x256xi1>
      %25 = arith.extui %24 : vector<4x256x256xi1> to vector<4x256x256xi32>
      %cst_7 = arith.constant dense<0> : vector<4x256xi32>
      %26 = vector.multi_reduction <add>, %25, %cst_7 [1] : vector<4x256x256xi32> to vector<4x256xi32>
      %27 = vector.shape_cast %26 : vector<4x256xi32> to vector<4x1x256xi32>
      %c128_i32 = arith.constant 128 : i32
      %28 = vector.broadcast %c128_i32 : i32 to vector<4x1x256xi32>
      %29 = arith.cmpi slt, %27, %28 : vector<4x1x256xi32>
      %cst_8 = arith.constant 0.000000e+00 : f32
      %30 = vector.broadcast %cst_8 : f32 to vector<4x1x256xf32>
      %31 = arith.select %29, %11, %30 : vector<4x1x256xi1>, vector<4x1x256xf32>
      %cst_9 = arith.constant dense<0.000000e+00> : vector<4x1xf32>
      %32 = vector.multi_reduction <add>, %31, %cst_9 [2] : vector<4x1x256xf32> to vector<4x1xf32>
      %cst_10 = arith.constant 7.812500e-03 : f32
      %33 = vector.broadcast %cst_10 : f32 to vector<4x1xf32>
      %34 = arith.mulf %32, %33 : vector<4x1xf32>
      %c128_i32_11 = arith.constant 128 : i32
      %35 = vector.broadcast %c128_i32_11 : i32 to vector<4x1x256xi32>
      %36 = arith.cmpi sge, %27, %35 : vector<4x1x256xi32>
      %cst_12 = arith.constant 0.000000e+00 : f32
      %37 = vector.broadcast %cst_12 : f32 to vector<4x1x256xf32>
      %38 = arith.select %36, %11, %37 : vector<4x1x256xi1>, vector<4x1x256xf32>
      %cst_13 = arith.constant dense<0.000000e+00> : vector<4x1xf32>
      %39 = vector.multi_reduction <add>, %38, %cst_13 [2] : vector<4x1x256xf32> to vector<4x1xf32>
      %cst_14 = arith.constant 4.687500e-03 : f32
      %40 = vector.broadcast %cst_14 : f32 to vector<4x1xf32>
      %41 = arith.mulf %40, %39 : vector<4x1xf32>
      %42 = arith.addf %34, %41 : vector<4x1xf32>
      %43 = vector.shape_cast %42 : vector<4x1xf32> to vector<1x4xf32>
      %cst_15 = arith.constant 0.000000e+00 : f32
      %44 = vector.broadcast %cst_15 : f32 to vector<1x124xf32>
      %45 = tpu.concatenate %43, %44 in 1 : vector<1x4xf32>, vector<1x124xf32> -> vector<1x128xf32>
      %46 = arith.index_cast %arg6 : i32 to index
      %c0_16 = arith.constant 0 : index
      %47 = vector.load %arg4[%46, %c0_16] : memref<2x128xf32, #tpu.memory_space<vmem>>, vector<1x128xf32>
      tpu.vector_store %arg4[%46, %c0_16], %45 {strides = array<i32>} : memref<2x128xf32, #tpu.memory_space<vmem>>, vector<1x128xf32>,
    }
    %c2_i32_3 = arith.constant 2 : i32
    return
  }
  func.func @transform_0(%arg0: i32) -> (i32, i32, i32) {
    %c0_i32 = arith.constant 0 : i32
    %c0_i32_0 = arith.constant 0 : i32
    %c0_i32_1 = arith.constant 0 : i32
    return %arg0, %c0_i32, %c0_i32_0 : i32, i32, i32
  }
  func.func @transform_1(%arg0: i32) -> (i32, i32) {
    %c0_i32 = arith.constant 0 : i32
    %c0_i32_0 = arith.constant 0 : i32
    %c0_i32_1 = arith.constant 0 : i32
    return %c0_i32, %c0_i32_0 : i32, i32
  }
  func.func @transform_2(%arg0: i32) -> (i32, i32) {
    %c0_i32 = arith.constant 0 : i32
    %c0_i32_0 = arith.constant 0 : i32
    %c0_i32_1 = arith.constant 0 : i32
    return %c0_i32, %c0_i32_0 : i32, i32
  }
  func.func @transform_3(%arg0: i32) -> (i32, i32) {
    %c0_i32 = arith.constant 0 : i32
    %c0_i32_0 = arith.constant 0 : i32
    return %arg0, %c0_i32 : i32, i32
  }
}

</mosaic_0001>

<bundles_post_ra>
// kernel: tpu_custom_call.1
= control target key start
LH: loop header
LB: loop body
LE: loop exit
PB: predicated region body
PF: predicated region fallthrough
CT: control target
= control target key end

     0   :  { %8 = vsyncpa [#allocation4], 0  ;;  %s7370_s0 = inlined_call_operand.hbm [shape: f32[2,32,256], index: 0, kind: input, shape index: {}]   ;;  %s7371_s1 = inlined_call_operand.vmem [shape: f32[4,32], index: 1, kind: input, shape index: {}]   ;;  %s7372_s2 = inlined_call_operand.vmem [shape: f32[4,1], index: 2, kind: input, shape index: {}]   ;;  %s7373_s3 = inlined_call_operand.hbm [shape: f32[2,128], index: 3, kind: output, shape index: {}]  }
   0x1   :  { %9 = vsyncpa [#allocation5], 0  ;;  %s2749_s12 = smov [#allocation3]   ;;  %s2693_s16 = scalar_lea.hbm %s7370_s0, 2048 }
   0x2   :  { %s15_s13 = sshll.u32 %s2749_s12, 4  ;;  %p2694_p0 = scmp.ne.s32.totalorder %s7370_s0, %s2693_s16  ;;  %s16_s13 = int_to_ptr.vmem [resolvable:$true] %s15_s13 }
   0x3   :  { %p2697_p1 = scmp.lt.u32.totalorder %s2693_s16, %s7370_s0 }
   0x5   :  { %p2699_p2 = pnand %p2697_p1, %p2694_p0 }
   0x7   :  { %2702 = shalt.err (!%p2699_p2)
}
   0x8   :  { %s2703_s21 = scalar_lea.vmem %s16_s13, 2048  ;;  %p2708_p4 = scmp.lt.s32.totalorder %s16_s13, %s16_s13 }
   0x9   :  { %p2704_p3 = scmp.ne.s32.totalorder %s16_s13, %s2703_s21  ;;  %p2709_p5 = scmp.lt.s32.totalorder %s2703_s21, %s2703_s21 }
   0xb   :  { %p2710_p6 = por %p2709_p5, %p2708_p4 }
   0xd   :  { %p2711_p7 = pnand %p2710_p6, %p2704_p3 }
   0xf   :  { %2714 = shalt.err (!%p2711_p7)
}
  0x10   :  { %s2750_s22 = smov 256   ;;  %s2751_s23 = smov 16  }
  0x11   :  { %21 = dma.hbm_to_vmem [thread:$0]  %s7370_s0, 2048, %s16_s13, [#allocation4], %s2750_s22, %s2750_s22, %s2751_s23  }
  0x12   :  { %2741 = dma.done.wait [#allocation4], 2048  }
  0x13   :  { %2742 = vsyncadd [#allocation4], 4294965248  ;;  %v31_v0 = vlaneseq  ;;  %v2831_v15 = vld [vmem:[%s7371_s1] sm:$0xf]  ;;  %s2898_s1 = smov 0  }
  0x14   :  { %7533 = vst [vmem:[#allocation23_spill] sm:$0xff] %v2831_v15  ;;  %v2836_v16 = vld [vmem:[%s7372_s2] sm:$0xf] }
  0x15   :  { %v2788_v1 = vand.u32 127, %v31_v0  ;;  %v2790_v2 = vshrl.u32 %v31_v0, 7  ;;  %7534 = vst [vmem:[#allocation24_spill] sm:$0xff] %v2836_v16 }
  0x17   :  { %7519 = vst [vmem:[#allocation9_spill] sm:$0xff] %v2788_v1  ;;  %7520 = vst [vmem:[#allocation10_spill] sm:$0xff] %v2790_v2  ;;  %v2793_v3 = vadd.s32 128, %v2788_v1  ;;  %v2796_v4 = vadd.s32 8, %v2790_v2  ;;  %v2799_v5 = vadd.s32 16, %v2790_v2  ;;  %v2802_v6 = vadd.s32 24, %v2790_v2 }
  0x18   :  { %v2805_v7 = vadd.s32 32, %v2790_v2  ;;  %v2808_v8 = vadd.s32 40, %v2790_v2  ;;  %v2811_v9 = vadd.s32 48, %v2790_v2  ;;  %v2814_v10 = vadd.s32 56, %v2790_v2 }
  0x19   :  { %7521 = vst [vmem:[#allocation11_spill] sm:$0xff] %v2793_v3  ;;  %7522 = vst [vmem:[#allocation12_spill] sm:$0xff] %v2796_v4  ;;  %v2817_v11 = vadd.s32 64, %v2790_v2  ;;  %v2820_v12 = vadd.s32 72, %v2790_v2  ;;  %v2823_v13 = vadd.s32 80, %v2790_v2  ;;  %v2826_v14 = vadd.s32 88, %v2790_v2 }
  0x1a   :  { %7523 = vst [vmem:[#allocation13_spill] sm:$0xff] %v2799_v5  ;;  %7524 = vst [vmem:[#allocation14_spill] sm:$0xff] %v2802_v6  ;;  %v2839_v17 = vadd.s32 96, %v2790_v2  ;;  %v2842_v18 = vadd.s32 104, %v2790_v2  ;;  %v2845_v19 = vadd.s32 112, %v2790_v2  ;;  %v2848_v20 = vadd.s32 120, %v2790_v2 }
  0x1b   :  { %7525 = vst [vmem:[#allocation15_spill] sm:$0xff] %v2805_v7  ;;  %7526 = vst [vmem:[#allocation16_spill] sm:$0xff] %v2808_v8  ;;  %v2851_v21 = vadd.s32 128, %v2790_v2  ;;  %v2854_v22 = vadd.s32 136, %v2790_v2  ;;  %v2857_v23 = vadd.s32 144, %v2790_v2  ;;  %v2860_v24 = vadd.s32 152, %v2790_v2 }
  0x1c   :  { %7527 = vst [vmem:[#allocation17_spill] sm:$0xff] %v2811_v9  ;;  %7528 = vst [vmem:[#allocation18_spill] sm:$0xff] %v2814_v10  ;;  %v2863_v25 = vadd.s32 160, %v2790_v2  ;;  %v2866_v26 = vadd.s32 168, %v2790_v2  ;;  %v2869_v27 = vadd.s32 176, %v2790_v2  ;;  %v2872_v28 = vadd.s32 184, %v2790_v2 }
  0x1d   :  { %7529 = vst [vmem:[#allocation19_spill] sm:$0xff] %v2817_v11  ;;  %7530 = vst [vmem:[#allocation20_spill] sm:$0xff] %v2820_v12  ;;  %v2875_v29 = vadd.s32 192, %v2790_v2  ;;  %v2878_v30 = vadd.s32 200, %v2790_v2  ;;  %v2881_v31 = vadd.s32 208, %v2790_v2  ;;  %v2884_v32 = vadd.s32 216, %v2790_v2 }
  0x1e   :  { %7531 = vst [vmem:[#allocation21_spill] sm:$0xff] %v2823_v13  ;;  %7532 = vst [vmem:[#allocation22_spill] sm:$0xff] %v2826_v14  ;;  %v2887_v33 = vadd.s32 224, %v2790_v2  ;;  %v2890_v34 = vadd.s32 232, %v2790_v2  ;;  %v2893_v35 = vadd.s32 240, %v2790_v2  ;;  %v2896_v36 = vadd.s32 248, %v2790_v2 }
  0x1f   :  { %7535 = vst [vmem:[#allocation25_spill] sm:$0xff] %v2839_v17  ;;  %7536 = vst [vmem:[#allocation26_spill] sm:$0xff] %v2842_v18 }
  0x20   :  { %7537 = vst [vmem:[#allocation27_spill] sm:$0xff] %v2845_v19  ;;  %7538 = vst [vmem:[#allocation28_spill] sm:$0xff] %v2848_v20 }
  0x21   :  { %7539 = vst [vmem:[#allocation29_spill] sm:$0xff] %v2851_v21  ;;  %7540 = vst [vmem:[#allocation30_spill] sm:$0xff] %v2854_v22 }
  0x22   :  { %7541 = vst [vmem:[#allocation31_spill] sm:$0xff] %v2857_v23  ;;  %7542 = vst [vmem:[#allocation32_spill] sm:$0xff] %v2860_v24 }
  0x23   :  { %7543 = vst [vmem:[#allocation33_spill] sm:$0xff] %v2863_v25  ;;  %7544 = vst [vmem:[#allocation34_spill] sm:$0xff] %v2866_v26 }
  0x24   :  { %7545 = vst [vmem:[#allocation35_spill] sm:$0xff] %v2869_v27  ;;  %7546 = vst [vmem:[#allocation36_spill] sm:$0xff] %v2872_v28 }
  0x25   :  { %7547 = vst [vmem:[#allocation37_spill] sm:$0xff] %v2875_v29  ;;  %7548 = vst [vmem:[#allocation38_spill] sm:$0xff] %v2878_v30 }
  0x26   :  { %7549 = vst [vmem:[#allocation39_spill] sm:$0xff] %v2881_v31  ;;  %7550 = vst [vmem:[#allocation40_spill] sm:$0xff] %v2884_v32 }
  0x27   :  { %7551 = vst [vmem:[#allocation41_spill] sm:$0xff] %v2887_v33  ;;  %7552 = vst [vmem:[#allocation42_spill] sm:$0xff] %v2890_v34 }
  0x28   :  { %7553 = vst [vmem:[#allocation43_spill] sm:$0xff] %v2893_v35  ;;  %7554 = vst [vmem:[#allocation44_spill] sm:$0xff] %v2896_v36 }
  0x29 LB: > { %v7555_v1 = vld [vmem:[#allocation9_spill] sm:$0xff]  ;;  %v7556_v11 = vld [vmem:[#allocation19_spill] sm:$0xff]  ;;  %v7557_v10 = vld [vmem:[#allocation18_spill] sm:$0xff]  ;;  %v2752_v37 = vmov 0.0   ;;  %v7374_v38 = vmov 0   ;;  %s2668_s2 = sshll.u32 %s2747_s1, 6  ;;  %s2747_s1 = sphi %s2898_s1, %s72_s1  }
  0x2a   : > { %v7558_v9 = vld [vmem:[#allocation17_spill] sm:$0xff]  ;;  %v7559_v8 = vld [vmem:[#allocation16_spill] sm:$0xff]  ;;  %v7560_v7 = vld [vmem:[#allocation15_spill] sm:$0xff]  ;;  %157 = vmatprep.mubr.f32.mxu0 %v2752_v37  ;;  %2692 = vset.pattern.permute.xlu0 %v7374_v38  ;;  %s75_s29 = scalar_lea.vmem [#allocation3], %s2668_s2  ;;  %vm89_vm0 = vcmask 261120   ;;  %s2640_s30 = scalar_lea.vmem [#allocation6], %s2747_s1 }
  0x2b   : > { %v7561_v6 = vld [vmem:[#allocation14_spill] sm:$0xff]  ;;  %v7562_v5 = vld [vmem:[#allocation13_spill] sm:$0xff]  ;;  %v7563_v4 = vld [vmem:[#allocation12_spill] sm:$0xff]  ;;  %v2754_v51 = vmov 1966171168   ;;  %s72_s1 = sadd.s32 1, %s2747_s1  }
  0x2c   : > { %v7564_v2 = vld [vmem:[#allocation10_spill] sm:$0xff]  ;;  %v7565_v16 = vld [vmem:[#allocation24_spill] sm:$0xff]  ;;  %v7566_v15 = vld [vmem:[#allocation23_spill] sm:$0xff]  ;;  %v168_v52 = vunpack.c.l.s4 %v2754_v51  ;;  %vm7399_vm1 = vcmp.lt.s32.totalorder %v7563_v4, %v7555_v1  ;;  %vm7397_vm12 = vcmp.lt.s32.totalorder %v7562_v5, %v7555_v1  ;;  %p69_p8 = scmp.ge.s32.totalorder %s72_s1, 2  }
  0x2d   : > { %86 = vperm.xlu0 %2692, %v7565_v16   ;;  %v77_v39 = vld [vmem:[%s75_s29 + $0x8] sm:$0xff]  ;;  %v79_v40 = vld [vmem:[%s75_s29 + $0x18] sm:$0xff]  ;;  %v76_v41 = vld [vmem:[%s75_s29] sm:$0xff]  ;;  %v193_v55 = vsub.s32 0, %v7564_v2  ;;  %v327_v57 = vsub.s32 1, %v7564_v2  ;;  %v461_v58 = vsub.s32 2, %v7564_v2  ;;  %vm7396_vm3 = vcmp.lt.s32.totalorder %v7564_v2, %v7555_v1 }
  0x2e   : > { %v2669_v42 = vpack.c.bf16 %v79_v40, %v77_v39  ;;  %v78_v43 = vld [vmem:[%s75_s29 + $0x10] sm:$0xff]  ;;  %v81_v44 = vld [vmem:[%s75_s29 + $0x28] sm:$0xff]  ;;  %v83_v45 = vld [vmem:[%s75_s29 + $0x38] sm:$0xff]  ;;  %v169_v54 = vunpack.c.0.s8 %v168_v52  ;;  %v595_v60 = vsub.s32 3, %v7564_v2  ;;  %s2755_s4 = smov (%p69_p8), [#allocation6]  }
  0x2f   : > { %v2671_v46 = vpack.c.bf16 %v78_v43, %v76_v41  ;;  %v2673_v47 = vpack.c.bf16 %v83_v45, %v81_v44  ;;  %v80_v48 = vld [vmem:[%s75_s29 + $0x20] sm:$0xff]  ;;  %v82_v49 = vld [vmem:[%s75_s29 + $0x30] sm:$0xff]  ;;  %s2648_s5 = sshll.u32 (%p69_p8), %s2755_s4, 4  ;;  %s2649_s5 = int_to_ptr.vmem [resolvable:$true] %s2648_s5 }
  0x30   : > { %2670 = vmatprep.subr.bf16.mxu0 %v2669_v42  ;;  %v2675_v50 = vpack.c.bf16 %v82_v49, %v80_v48  ;;  %v172_v63 = vsub.s32 %v169_v54, %v7564_v2  ;;  %s2715_s6 = scalar_lea.vmem (%p69_p8), %s2649_s5, 32  ;;  %p2720_p10 = scmp.lt.s32.totalorder (%p69_p8), %s2649_s5, %s2649_s5 }
  0x31   : > { %2672 = vmatpush1.bf16.msra.mxu0 %v2671_v46  ;;  %p2716_p9 = scmp.ne.s32.totalorder (%p69_p8), %s2649_s5, %s2715_s6  ;;  %p2721_p11 = scmp.lt.s32.totalorder (%p69_p8), %s2715_s6, %s2715_s6 }
  0x32   : > { %2674 = vmatprep.subr.bf16.mxu0 %v2673_v47 }
  0x33   :  { %p2722_p12 = por (%p69_p8), %p2721_p11, %p2720_p10 }
  0x35   : > { %2676 = vmatpush1.bf16.msra.mxu0 %v2675_v50  ;;  %p2723_p13 = pnand (%p69_p8), %p2722_p12, %p2716_p9 }
  0x38   : > { %2667 = vmatmul.mubr.msk.f32.vlgmr.msra.gmra.mrb[0].mxu0 %vm89_vm0, %v7566_v15 }
  0xac   : > { %v87_v53 = vpop.permute.xlu0 %86 }
 0x10b   : > { %v159_v56 = vpop.f32.mrb[0].mxu0 }
 0x10c   : > { %v160_v59 = vadd.f32 %v159_v56, %v87_v53  ;;  %v161_v61 = vpop.f32.mrb[1].mxu0 }
 0x10d   : > { %v162_v62 = vadd.f32 %v161_v61, %v87_v53 }
 0x10e   : > { %v194_v0 = vrot.slane %v160_v59, %v193_v55 }
 0x10f   : > { %v166_v37 = vcombine.low %v160_v59, %v162_v62  ;;  %v2912_v39 = vrot.slane %v162_v62, %v193_v55  ;;  %v2914_v40 = vrot.slane %v162_v62, %v327_v57  ;;  %v2916_v41 = vrot.slane %v162_v62, %v461_v58 }
 0x110   : > { %v2918_v42 = vrot.slane %v162_v62, %v595_v60  ;;  %200 = vbcast.lane.b32.xlu1 %v194_v0, 264  ;;  %196 = vbcast.lane.b32.xlu0 %v194_v0, 256  ;;  %v328_v62 = vrot.slane %v160_v59, %v327_v57 }
 0x111   : > { %7567 = vst [vmem:[#allocation45_spill] sm:$0xff] %v2912_v39  ;;  %v173_v43 = vrot.slane %v166_v37, %v172_v63 }
 0x113   : > { %v174_v44 = vcombine.high %v173_v43, %v173_v43  ;;  %v181_v45 = vrot.slane %v173_v43, %v172_v63 }
 0x114   : > { %204 = vbcast.lane.b32.xlu1 %v194_v0, 272  ;;  %208 = vbcast.lane.b32.xlu0 %v194_v0, 280 }
 0x115   : > { %v188_v46 = vrot.slane %v174_v44, %v172_v63  ;;  %v189_v47 = vcombine.high %v181_v45, %v181_v45  ;;  %v2920_v48 = vrot.slane %v181_v45, %v193_v55  ;;  %v2922_v49 = vrot.slane %v181_v45, %v327_v57 }
 0x116   : > { %v462_v63 = vrot.slane %v160_v59, %v461_v58 }
 0x117   : > { %7568 = vst [vmem:[#allocation46_spill] sm:$0xff] %v2920_v48  ;;  %7569 = vst [vmem:[#allocation47_spill] sm:$0xff] %v2922_v49  ;;  %v190_v50 = vcombine.high %v188_v46, %v188_v46  ;;  %v2924_v51 = vrot.slane %v188_v46, %v193_v55  ;;  %v2926_v52 = vrot.slane %v188_v46, %v327_v57 }
 0x118   : > { %v2928_v53 = vrot.slane %v189_v47, %v193_v55  ;;  %v2930_v54 = vrot.slane %v189_v47, %v327_v57  ;;  %212 = vbcast.lane.b32.xlu1 %v194_v0, 288  ;;  %216 = vbcast.lane.b32.xlu0 %v194_v0, 296 }
 0x119   : > { %7570 = vst [vmem:[#allocation48_spill] sm:$0xff] %v2924_v51  ;;  %v2932_v56 = vrot.slane %v190_v50, %v193_v55  ;;  %v2934_v61 = vrot.slane %v190_v50, %v327_v57  ;;  %v596_v55 = vrot.slane %v160_v59, %v595_v60 }
 0x11a   : > { %7571 = vst [vmem:[#allocation49_spill] sm:$0xff] %v2928_v53 }
 0x11c   : > { %220 = vbcast.lane.b32.xlu1 %v194_v0, 304  ;;  %224 = vbcast.lane.b32.xlu0 %v194_v0, 312 }
 0x120   : > { %228 = vbcast.lane.b32.xlu1 %v194_v0, 320  ;;  %232 = vbcast.lane.b32.xlu0 %v194_v0, 328 }
 0x124   : > { %236 = vbcast.lane.b32.xlu1 %v194_v0, 336  ;;  %240 = vbcast.lane.b32.xlu0 %v194_v0, 344 }
 0x128   : > { %244 = vbcast.lane.b32.xlu1 %v194_v0, 352  ;;  %248 = vbcast.lane.b32.xlu0 %v194_v0, 360 }
 0x12c   : > { %252 = vbcast.lane.b32.xlu1 %v194_v0, 368  ;;  %256 = vbcast.lane.b32.xlu0 %v194_v0, 376 }
 0x130   : > { %334 = vbcast.lane.b32.xlu1 %v328_v62, 264  ;;  %330 = vbcast.lane.b32.xlu0 %v328_v62, 256 }
 0x134   : > { %468 = vbcast.lane.b32.xlu1 %v462_v63, 264  ;;  %464 = vbcast.lane.b32.xlu0 %v462_v63, 256 }
 0x138   : > { %598 = vbcast.lane.b32.xlu1 %v596_v55, 256  ;;  %338 = vbcast.lane.b32.xlu0 %v328_v62, 272 }
 0x13c   : > { %472 = vbcast.lane.b32.xlu1 %v462_v63, 272  ;;  %602 = vbcast.lane.b32.xlu0 %v596_v55, 264 }
 0x140   : > { %606 = vbcast.lane.b32.xlu1 %v596_v55, 272  ;;  %342 = vbcast.lane.b32.xlu0 %v328_v62, 280 }
 0x144   : > { %346 = vbcast.lane.b32.xlu1 %v328_v62, 288  ;;  %476 = vbcast.lane.b32.xlu0 %v462_v63, 280 }
 0x148   : > { %480 = vbcast.lane.b32.xlu1 %v462_v63, 288  ;;  %610 = vbcast.lane.b32.xlu0 %v596_v55, 280 }
 0x14c   : > { %614 = vbcast.lane.b32.xlu1 %v596_v55, 288  ;;  %350 = vbcast.lane.b32.xlu0 %v328_v62, 296 }
 0x150   : > { %354 = vbcast.lane.b32.xlu1 %v328_v62, 304  ;;  %484 = vbcast.lane.b32.xlu0 %v462_v63, 296 }
 0x154   : > { %488 = vbcast.lane.b32.xlu1 %v462_v63, 304  ;;  %618 = vbcast.lane.b32.xlu0 %v596_v55, 296 }
 0x158   : > { %622 = vbcast.lane.b32.xlu1 %v596_v55, 304  ;;  %358 = vbcast.lane.b32.xlu0 %v328_v62, 312 }
 0x15c   : > { %362 = vbcast.lane.b32.xlu1 %v328_v62, 320  ;;  %492 = vbcast.lane.b32.xlu0 %v462_v63, 312 }
 0x160   : > { %496 = vbcast.lane.b32.xlu1 %v462_v63, 320  ;;  %626 = vbcast.lane.b32.xlu0 %v596_v55, 312 }
 0x164   : > { %630 = vbcast.lane.b32.xlu1 %v596_v55, 320  ;;  %366 = vbcast.lane.b32.xlu0 %v328_v62, 328 }
 0x168   : > { %370 = vbcast.lane.b32.xlu1 %v328_v62, 336  ;;  %500 = vbcast.lane.b32.xlu0 %v462_v63, 328 }
 0x16c   : > { %504 = vbcast.lane.b32.xlu1 %v462_v63, 336  ;;  %634 = vbcast.lane.b32.xlu0 %v596_v55, 328 }
 0x170   : > { %638 = vbcast.lane.b32.xlu1 %v596_v55, 336  ;;  %374 = vbcast.lane.b32.xlu0 %v328_v62, 344 }
 0x174   : > { %378 = vbcast.lane.b32.xlu1 %v328_v62, 352  ;;  %508 = vbcast.lane.b32.xlu0 %v462_v63, 344 }
 0x178   : > { %512 = vbcast.lane.b32.xlu1 %v462_v63, 352  ;;  %642 = vbcast.lane.b32.xlu0 %v596_v55, 344 }
 0x17c   : > { %646 = vbcast.lane.b32.xlu1 %v596_v55, 352  ;;  %382 = vbcast.lane.b32.xlu0 %v328_v62, 360 }
 0x180   : > { %386 = vbcast.lane.b32.xlu1 %v328_v62, 368  ;;  %516 = vbcast.lane.b32.xlu0 %v462_v63, 360 }
 0x182   : > { %v2936_v57 = vpop.permute.xlu1 %200  ;;  %v2938_v58 = vpop.permute.xlu0 %196 }
 0x183   : > { %vm1089_vm2 = vcmp.eq.f32.partialorder %v2936_v57, %v2920_v48  ;;  %vm1087_vm4 = vcmp.eq.f32.partialorder %v2938_v58, %v2920_v48  ;;  %vm833_vm5 = vcmp.gt.f32.partialorder %v2936_v57, %v2920_v48  ;;  %vm834_vm7 = vcmp.gt.f32.partialorder %v2936_v57, %v2922_v49 }
 0x184   : > { %520 = vbcast.lane.b32.xlu1 %v462_v63, 368  ;;  %650 = vbcast.lane.b32.xlu0 %v596_v55, 360  ;;  %vm1473_vm6 = vmand %vm1089_vm2, %vm7399_vm1  ;;  %vm1090_vm8 = vcmp.eq.f32.partialorder %v2936_v57, %v2922_v49  ;;  %vm831_vm9 = vcmp.gt.f32.partialorder %v2938_v58, %v2920_v48  ;;  %vm832_vm15 = vcmp.gt.f32.partialorder %v2938_v58, %v2922_v49  ;;  %v7632_v57 = vmov 0 }
 0x185   : > { %vm1471_vm10 = vmand %vm1087_vm4, %vm7396_vm3  ;;  %vm1088_vm0 = vcmp.eq.f32.partialorder %v2938_v58, %v2922_v49  ;;  %vm7403_vm4 = vcmp.lt.s32.totalorder %v7561_v6, %v7555_v1 }
 0x186   : > { %v2940_v59 = vpop.permute.xlu1 %204  ;;  %v2942_v60 = vpop.permute.xlu0 %208  ;;  %vm3052_vm11 = vmor %vm833_vm5, %vm1473_vm6 }
 0x187   : > { %vm1091_vm13 = vcmp.eq.f32.partialorder %v2940_v59, %v2920_v48  ;;  %vm3060_vm14 = vmor %vm834_vm7, %vm1090_vm8  ;;  %vm1093_vm5 = vcmp.eq.f32.partialorder %v2942_v60, %v2920_v48  ;;  %vm835_vm6 = vcmp.gt.f32.partialorder %v2940_v59, %v2920_v48  ;;  %vm837_vm3 = vcmp.gt.f32.partialorder %v2942_v60, %v2920_v48 }
 0x188   : > { %654 = vbcast.lane.b32.xlu1 %v596_v55, 368  ;;  %390 = vbcast.lane.b32.xlu0 %v328_v62, 376  ;;  %vm3069_vm2 = vmor %vm831_vm9, %vm1471_vm10  ;;  %vm836_vm9 = vcmp.gt.f32.partialorder %v2940_v59, %v2922_v49  ;;  %vm1092_vm10 = vcmp.eq.f32.partialorder %v2940_v59, %v2922_v49 }
 0x189   : > { %vm1475_vm7 = vmand %vm1091_vm13, %vm7397_vm12 }
 0x18a   : > { %v2944_v0 = vpop.permute.xlu1 %212  ;;  %v2946_v37 = vpop.permute.xlu0 %216  ;;  %vm3087_vm8 = vmor %vm832_vm15, %vm1088_vm0  ;;  %vm7408_vm15 = vcmp.lt.s32.totalorder %v7560_v7, %v7555_v1 }
 0x18b   : > { %vm1477_vm13 = vmand %vm1093_vm5, %vm7403_vm4  ;;  %vm1095_vm0 = vcmp.eq.f32.partialorder %v2944_v0, %v2920_v48  ;;  %vm838_vm5 = vcmp.gt.f32.partialorder %v2942_v60, %v2922_v49 }
 0x18c   : > { %263 = vbcast.lane.b32.xlu1 %v2912_v39, 256  ;;  %524 = vbcast.lane.b32.xlu0 %v462_v63, 376  ;;  %vm3101_vm12 = vmor %vm835_vm6, %vm1475_vm7  ;;  %vm1094_vm6 = vcmp.eq.f32.partialorder %v2942_v60, %v2922_v49  ;;  %v7597_v60 = vmov 0  }
 0x18d   : > { %vm3110_vm1 = vmor %vm836_vm9, %vm1092_vm10  ;;  %vm839_vm10 = vcmp.gt.f32.partialorder %v2944_v0, %v2920_v48  ;;  %v1985_v17 = vsel %vm3052_vm11, 1, %v7597_v60  ;;  %v1986_v14 = vsel %vm3060_vm14, 1, %v7597_v60 }
 0x18e   : > { %v2949_v43 = vpop.permute.xlu1 %220  ;;  %v2951_v44 = vpop.permute.xlu0 %224  ;;  %vm3122_vm7 = vmor %vm837_vm3, %vm1477_vm13 }
 0x18f   : > { %7572 = vst [vmem:[#allocation50_spill] sm:$0xff] %v2951_v44  ;;  %vm3133_vm4 = vmand %vm1095_vm0, %vm7408_vm15 }
 0x190   : > { %271 = vbcast.lane.b32.xlu1 %v2912_v39, 272  ;;  %658 = vbcast.lane.b32.xlu0 %v596_v55, 376  ;;  %vm3144_vm3 = vmor %vm838_vm5, %vm1094_vm6  ;;  %vm7603_vm6 = vcmp.lt.s32.totalorder %v7564_v2, %v7555_v1 }
 0x191   : > { %v1990_v18 = vsel %vm3144_vm3, 1, %v7597_v60 }
 0x192   : > { %v2954_v45 = vpop.permute.xlu1 %228  ;;  %v2956_v46 = vpop.permute.xlu0 %232 }
 0x193   : > { %7573 = vst [vmem:[#allocation51_spill] sm:$0xff] %v2954_v45  ;;  %7574 = vst [vmem:[#allocation52_spill] sm:$0xff] %v2956_v46  ;;  %v1984_v46 = vsel %vm3087_vm8, 1, %v7597_v60 }
 0x194   : > { %279 = vbcast.lane.b32.xlu1 %v2912_v39, 288  ;;  %267 = vbcast.lane.b32.xlu0 %v2912_v39, 264 }
 0x196   : > { %v2960_v47 = vpop.permute.xlu1 %236  ;;  %v2962_v50 = vpop.permute.xlu0 %240 }
 0x197   : > { %7575 = vst [vmem:[#allocation53_spill] sm:$0xff] %v2960_v47  ;;  %7576 = vst [vmem:[#allocation54_spill] sm:$0xff] %v2962_v50  ;;  %v1983_v47 = vsel %vm3069_vm2, 1, %v7597_v60  ;;  %vm7600_vm2 = vcmp.lt.s32.totalorder %v7563_v4, %v7555_v1 }
 0x198   : > { %287 = vbcast.lane.b32.xlu1 %v2912_v39, 304  ;;  %275 = vbcast.lane.b32.xlu0 %v2912_v39, 280  ;;  %v2239_v13 = vadd.s32 %v1985_v17, %v1983_v47  ;;  %v1988_v17 = vsel %vm3110_vm1, 1, %v7597_v60  ;;  %vm7614_vm1 = vmmov %vm7603_vm6  ;;  %v7747_v47 = vmov 0 }
 0x19a   : > { %v2966_v62 = vpop.permute.xlu1 %244  ;;  %v2968_v63 = vpop.permute.xlu0 %248 }
 0x19b   : > { %7577 = vst [vmem:[#allocation55_spill] sm:$0xff] %v2966_v62  ;;  %7578 = vst [vmem:[#allocation56_spill] sm:$0xff] %v2968_v63 }
 0x19c   : > { %295 = vbcast.lane.b32.xlu1 %v2912_v39, 320  ;;  %283 = vbcast.lane.b32.xlu0 %v2912_v39, 296 }
 0x19e   : > { %v2972_v55 = vpop.permute.xlu1 %252  ;;  %v2974_v38 = vpop.permute.xlu0 %256 }
 0x19f   : > { %7579 = vst [vmem:[#allocation57_spill] sm:$0xff] %v2972_v55  ;;  %7580 = vst [vmem:[#allocation58_spill] sm:$0xff] %v2974_v38  ;;  %v1987_v55 = vsel %vm3101_vm12, 1, %v7597_v60 }
 0x1a0   : > { %303 = vbcast.lane.b32.xlu1 %v2912_v39, 336  ;;  %291 = vbcast.lane.b32.xlu0 %v2912_v39, 312  ;;  %v2240_v50 = vadd.s32 %v2239_v13, %v1987_v55  ;;  %v1989_v13 = vsel %vm3122_vm7, 1, %v7597_v60  ;;  %vm7640_vm7 = vcmp.lt.s32.totalorder %v7562_v5, %v7555_v1 }
 0x1a2   : > { %v2978_v15 = vpop.permute.xlu1 %334  ;;  %v2980_v16 = vpop.permute.xlu0 %330 }
 0x1a3   : > { %vm1153_vm9 = vcmp.eq.f32.partialorder %v2978_v15, %v2924_v51  ;;  %vm1151_vm13 = vcmp.eq.f32.partialorder %v2980_v16, %v2924_v51  ;;  %vm897_vm0 = vcmp.gt.f32.partialorder %v2978_v15, %v2924_v51  ;;  %vm898_vm15 = vcmp.gt.f32.partialorder %v2978_v15, %v2926_v52 }
 0x1a4   : > { %311 = vbcast.lane.b32.xlu1 %v2912_v39, 352  ;;  %299 = vbcast.lane.b32.xlu0 %v2912_v39, 328  ;;  %vm1154_vm11 = vcmp.eq.f32.partialorder %v2978_v15, %v2926_v52  ;;  %vm1537_vm5 = vmand %vm1153_vm9, %vm7600_vm2  ;;  %vm895_vm14 = vcmp.gt.f32.partialorder %v2980_v16, %v2924_v51  ;;  %vm1152_vm12 = vcmp.eq.f32.partialorder %v2980_v16, %v2926_v52 }
 0x1a5   : > { %vm3177_vm9 = vmor %vm839_vm10, %vm3133_vm4  ;;  %v2276_v15 = vadd.s32 %v1986_v14, %v1984_v46 }
 0x1a6   : > { %v2984_v36 = vpop.permute.xlu1 %468  ;;  %v2986_v35 = vpop.permute.xlu0 %464  ;;  %vm3191_vm8 = vmand %vm1151_vm13, %vm7603_vm6  ;;  %vm7610_vm13 = vcmp.lt.s32.totalorder %v7563_v4, %v7555_v1 }
 0x1a7   : > { %vm1215_vm2 = vcmp.eq.f32.partialorder %v2986_v35, %v2928_v53  ;;  %vm3205_vm4 = vmor %vm897_vm0, %vm1537_vm5  ;;  %vm7611_vm0 = vcmp.eq.f32.partialorder %v2984_v36, %v2928_v53  ;;  %v2277_v44 = vadd.s32 %v2276_v15, %v1988_v17  ;;  %v7629_v17 = vmov 0 }
 0x1a8   : > { %319 = vbcast.lane.b32.xlu1 %v2912_v39, 368  ;;  %307 = vbcast.lane.b32.xlu0 %v2912_v39, 344  ;;  %vm3215_vm10 = vmor %vm898_vm15, %vm1154_vm11  ;;  %vm961_vm15 = vcmp.gt.f32.partialorder %v2984_v36, %v2928_v53  ;;  %vm1218_vm11 = vcmp.eq.f32.partialorder %v2984_v36, %v2930_v54  ;;  %v2049_v59 = vsel %vm3205_vm4, 1, %v7597_v60 }
 0x1a9   : > { %vm3229_vm5 = vmand %vm7611_vm0, %vm7610_vm13  ;;  %v3360_v15 = vadd.s32 %v2277_v44, %v1990_v18  ;;  %v3378_v44 = vsel %vm3177_vm9, 1, %v7597_v60 }
 0x1aa   : > { %v2990_v34 = vpop.permute.xlu1 %598  ;;  %v2992_v32 = vpop.permute.xlu0 %338  ;;  %vm3246_vm13 = vmand %vm1215_vm2, %vm7614_vm1  ;;  %vm1216_vm1 = vcmp.eq.f32.partialorder %v2986_v35, %v2930_v54  ;;  %vm7636_vm2 = vcmp.lt.s32.totalorder %v7564_v2, %v7555_v1  ;;  %7644 = vst [vmem:[#allocation62_spill] sm:$0xff] %v3378_v44 }
 0x1ab   : > { %vm3259_vm0 = vmor %vm895_vm14, %vm3191_vm8  ;;  %vm7620_vm14 = vcmp.gt.f32.partialorder %v2980_v16, %v2926_v52  ;;  %vm7637_vm3 = vcmp.eq.f32.partialorder %v2990_v34, %v2932_v56  ;;  %7639 = vst [vmem:[#allocation61_spill] sm:$0xff] %v3360_v15  ;;  %v2050_v15 = vsel %vm3215_vm10, 1, %v7597_v60 }
 0x1ac   : > { %397 = vbcast.lane.b32.xlu1 %v2914_v40, 256  ;;  %315 = vbcast.lane.b32.xlu0 %v2912_v39, 360  ;;  %vm3277_vm8 = vmor %vm7620_vm14, %vm1152_vm12  ;;  %vm7625_vm12 = vcmp.gt.f32.partialorder %v2986_v35, %v2928_v53  ;;  %v3358_v39 = vadd.s32 %v2240_v50, %v1989_v13  ;;  %v7646_v50 = vmov 0 }
 0x1ad   : > { %vm3292_vm6 = vmor %vm961_vm15, %vm3229_vm5  ;;  %vm7628_vm5 = vcmp.gt.f32.partialorder %v2984_v36, %v2930_v54  ;;  %v2048_v44 = vsel %vm3277_vm8, 1, %v7597_v60 }
 0x1ae   : > { %v2996_v30 = vpop.permute.xlu1 %472  ;;  %v2998_v33 = vpop.permute.xlu0 %602  ;;  %vm3301_vm14 = vmor %vm7625_vm12, %vm3246_vm13  ;;  %vm7631_vm13 = vcmp.gt.f32.partialorder %v2986_v35, %v2930_v54  ;;  %7638 = vst [vmem:[#allocation60_spill] sm:$0xff] %v3358_v39  ;;  %v2047_v39 = vsel %vm3259_vm0, 1, %v7597_v60  ;;  %vm7675_vm0 = vcmp.lt.s32.totalorder %v7562_v5, %v7555_v1 }
 0x1af   : > { %vm3317_vm15 = vmor %vm7628_vm5, %vm1218_vm11  ;;  %vm7634_vm11 = vcmp.lt.s32.totalorder %v7562_v5, %v7555_v1  ;;  %vm7635_vm5 = vcmp.eq.f32.partialorder %v2992_v32, %v2924_v51  ;;  %vm7672_vm4 = vcmp.gt.f32.partialorder %v2998_v33, %v2932_v56  ;;  %v2350_v5 = vadd.s32 %v2050_v15, %v2048_v44 }
 0x1b0   : > { %531 = vbcast.lane.b32.xlu1 %v2916_v41, 256  ;;  %401 = vbcast.lane.b32.xlu0 %v2914_v40, 264  ;;  %v7630_v17 = vsel %vm3317_vm15, 4294967295, %v7629_v17  ;;  %vm3324_vm12 = vmor %vm7631_vm13, %vm1216_vm1  ;;  %vm7641_vm1 = vcmp.eq.f32.partialorder %v2996_v30, %v2928_v53  ;;  %v2111_v15 = vsel %vm3301_vm14, 1, %v7597_v60 }
 0x1b1   : > { %v7633_v57 = vsel %vm3324_vm12, 4294967295, %v7632_v57  ;;  %vm1539_vm15 = vmand %vm7635_vm5, %vm7634_vm11 }
 0x1b2   : > { %v3002_v28 = vpop.permute.xlu1 %606  ;;  %v3004_v31 = vpop.permute.xlu0 %342  ;;  %vm1663_vm11 = vmand %vm7637_vm3, %vm7636_vm2  ;;  %vm7645_vm2 = vcmp.gt.f32.partialorder %v2992_v32, %v2924_v51  ;;  %vm7692_vm14 = vnez %v7633_v57 }
 0x1b3   : > { %vm3370_vm12 = vmand %vm7641_vm1, %vm7640_vm7  ;;  %vm7648_vm7 = vcmp.eq.f32.partialorder %v2992_v32, %v2926_v52  ;;  %vm7649_vm1 = vcmp.gt.f32.partialorder %v2992_v32, %v2926_v52  ;;  %v7653_v32 = vmov 0  ;;  %vm7676_vm8 = vcmp.eq.f32.partialorder %v3002_v28, %v2932_v56 }
 0x1b4   : > { %665 = vbcast.lane.b32.xlu1 %v2918_v42, 256  ;;  %535 = vbcast.lane.b32.xlu0 %v2916_v41, 264  ;;  %vm3383_vm3 = vmor %vm7645_vm2, %vm1539_vm15  ;;  %vm7652_vm2 = vcmp.gt.f32.partialorder %v2990_v34, %v2932_v56  ;;  %vm7665_vm15 = vcmp.gt.f32.partialorder %v2996_v30, %v2928_v53  ;;  %v2112_v55 = vsel %vm7692_vm14, 1, %v7597_v60  ;;  %vm7697_vm14 = vcmp.gt.f32.partialorder %v3004_v31, %v2924_v51 }
 0x1b5   : > { %v7647_v50 = vsel %vm3383_vm3, 4294967295, %v7646_v50  ;;  %vm3393_vm13 = vmor %vm7649_vm1, %vm7648_vm7  ;;  %vm7655_vm7 = vcmp.eq.f32.partialorder %v2990_v34, %v2934_v61  ;;  %vm7656_vm1 = vcmp.gt.f32.partialorder %v2990_v34, %v2934_v61 }
 0x1b6   : > { %v3008_v26 = vpop.permute.xlu1 %346  ;;  %v3010_v29 = vpop.permute.xlu0 %476  ;;  %vm3407_vm3 = vmor %vm7652_vm2, %vm1663_vm11  ;;  %vm7659_vm11 = vcmp.lt.s32.totalorder %v7563_v4, %v7555_v1  ;;  %vm7660_vm2 = vcmp.eq.f32.partialorder %v2998_v33, %v2932_v56 }
 0x1b7   : > { %v7654_v32 = vsel %vm3407_vm3, 4294967295, %v7653_v32  ;;  %vm3417_vm9 = vmor %vm7656_vm1, %vm7655_vm7  ;;  %vm1157_vm1 = vcmp.eq.f32.partialorder %v3004_v31, %v2924_v51 }
 0x1b8   : > { %405 = vbcast.lane.b32.xlu1 %v2914_v40, 272  ;;  %669 = vbcast.lane.b32.xlu0 %v2918_v42, 264  ;;  %vm3431_vm3 = vmand %vm7660_vm2, %vm7659_vm11  ;;  %v2176_v13 = vsel %vm3417_vm9, 1, %v7597_v60 }
 0x1b9   : > { %vm3448_vm5 = vmor %vm7665_vm15, %vm3370_vm12  ;;  %vm7668_vm12 = vcmp.eq.f32.partialorder %v2996_v30, %v2930_v54  ;;  %vm7669_vm15 = vcmp.gt.f32.partialorder %v2996_v30, %v2930_v54 }
 0x1ba   : > { %v3014_v24 = vpop.permute.xlu1 %480  ;;  %v3016_v27 = vpop.permute.xlu0 %610  ;;  %vm3478_vm7 = vmor %vm7669_vm15, %vm7668_vm12  ;;  %vm7680_vm15 = vcmp.gt.f32.partialorder %v2998_v33, %v2934_v61  ;;  %v2115_v45 = vsel %vm3448_vm5, 1, %v7597_v60  ;;  %vm7733_vm5 = vcmp.lt.s32.totalorder %v7560_v7, %v7555_v1 }
 0x1bb   : > { %vm3488_vm10 = vmor %vm7672_vm4, %vm3431_vm3  ;;  %vm1159_vm3 = vcmp.eq.f32.partialorder %v3008_v26, %v2924_v51 }
 0x1bc   : > { %539 = vbcast.lane.b32.xlu1 %v2916_v41, 272  ;;  %409 = vbcast.lane.b32.xlu0 %v2914_v40, 280  ;;  %vm3498_vm12 = vmand %vm7676_vm8, %vm7675_vm0  ;;  %vm7679_vm8 = vcmp.eq.f32.partialorder %v2998_v33, %v2934_v61  ;;  %v2313_v33 = vadd.s32 %v2049_v59, %v2047_v39  ;;  %v2113_v39 = vsel %vm3292_vm6, 1, %v7597_v60  ;;  %vm7691_vm6 = vnez %v7630_v17 }
 0x1bd   : > { %vm3519_vm2 = vmor %vm7680_vm15, %vm7679_vm8  ;;  %vm7685_vm15 = vcmp.lt.s32.totalorder %v7561_v6, %v7555_v1  ;;  %v2114_v16 = vsel %vm7691_vm6, 1, %v7597_v60  ;;  %v7698_v17 = vmov 0  ;;  %v2387_v30 = vadd.s32 %v2113_v39, %v2111_v15 }
 0x1be   : > { %v3024_v22 = vpop.permute.xlu1 %614  ;;  %v3026_v25 = vpop.permute.xlu0 %350  ;;  %vm3541_vm8 = vmand %vm1157_vm1, %vm7685_vm15  ;;  %vm7688_vm1 = vcmp.gt.f32.partialorder %v3002_v28, %v2932_v56  ;;  %v2424_v39 = vadd.s32 %v2114_v16, %v2112_v55  ;;  %v7720_v16 = vmov 0  ;;  %v7776_v59 = vmov 0 }
 0x1bf   : > { %vm3562_vm15 = vmor %vm7688_vm1, %vm3498_vm12  ;;  %vm7693_vm12 = vcmp.eq.f32.partialorder %v3002_v28, %v2934_v61  ;;  %vm7694_vm1 = vcmp.gt.f32.partialorder %v3002_v28, %v2934_v61  ;;  %v7731_v28 = vmov 0  ;;  %v3808_v12 = vadd.s32 %v2387_v30, %v2115_v45 }
 0x1c0   : > { %673 = vbcast.lane.b32.xlu1 %v2918_v42, 272  ;;  %543 = vbcast.lane.b32.xlu0 %v2916_v41, 280  ;;  %vm3583_vm4 = vmor %vm7694_vm1, %vm7693_vm12  ;;  %vm7700_vm12 = vcmp.lt.s32.totalorder %v7560_v7, %v7555_v1  ;;  %v2179_v45 = vsel %vm3562_vm15, 1, %v7597_v60 }
 0x1c1   : > { %vm3597_vm11 = vmor %vm7697_vm14, %vm3541_vm8  ;;  %vm7714_vm14 = vcmp.lt.s32.totalorder %v7560_v7, %v7555_v1 }
 0x1c2   : > { %v3048_v23 = vpop.permute.xlu1 %354  ;;  %v3050_v21 = vpop.permute.xlu0 %484  ;;  %v7699_v17 = vsel %vm3597_vm11, 4294967295, %v7698_v17  ;;  %vm3607_vm1 = vmand %vm1159_vm3, %vm7700_vm12  ;;  %vm7705_vm3 = vcmp.lt.s32.totalorder %v7561_v6, %v7555_v1  ;;  %vm7706_vm12 = vcmp.eq.f32.partialorder %v3010_v29, %v2928_v53  ;;  %vm7709_vm11 = vnez %v7647_v50 }
 0x1c3   : > { %vm3629_vm6 = vmand %vm7706_vm12, %vm7705_vm3  ;;  %v2051_v15 = vsel %vm7709_vm11, 1, %v7597_v60  ;;  %vm7710_vm3 = vcmp.eq.f32.partialorder %v3004_v31, %v2926_v52  ;;  %vm7711_vm12 = vcmp.gt.f32.partialorder %v3004_v31, %v2926_v52  ;;  %vm7715_vm11 = vcmp.eq.f32.partialorder %v3014_v24, %v2928_v53 }
 0x1c4   : > { %413 = vbcast.lane.b32.xlu1 %v2914_v40, 288  ;;  %677 = vbcast.lane.b32.xlu0 %v2918_v42, 280  ;;  %vm3651_vm0 = vmor %vm7711_vm12, %vm7710_vm3  ;;  %vm7718_vm3 = vnez %v7654_v32 }
 0x1c5   : > { %vm3661_vm8 = vmand %vm7715_vm11, %vm7714_vm14  ;;  %v2175_v31 = vsel %vm7718_vm3, 1, %v7597_v60  ;;  %vm7719_vm14 = vcmp.gt.f32.partialorder %v3008_v26, %v2924_v51  ;;  %vm7722_vm11 = vcmp.lt.s32.totalorder %v7561_v6, %v7555_v1  ;;  %v3746_v6 = vadd.s32 %v2313_v33, %v2051_v15 }
 0x1c6   : > { %v3083_v58 = vpop.permute.xlu1 %488  ;;  %v3085_v20 = vpop.permute.xlu0 %618  ;;  %vm3679_vm12 = vmor %vm7719_vm14, %vm3607_vm1  ;;  %vm7726_vm1 = vcmp.eq.f32.partialorder %v3008_v26, %v2926_v52 }
 0x1c7   : > { %v7721_v16 = vsel %vm3679_vm12, 4294967295, %v7720_v16  ;;  %vm7772_vm15 = vcmp.eq.f32.partialorder %v3083_v58, %v2928_v53 }
 0x1c8   : > { %547 = vbcast.lane.b32.xlu1 %v2916_v41, 288  ;;  %417 = vbcast.lane.b32.xlu0 %v2914_v40, 296 }
 0x1ca   : > { %v3118_v19 = vpop.permute.xlu1 %622  ;;  %v3120_v62 = vpop.permute.xlu0 %358 }
 0x1cc   : > { %681 = vbcast.lane.b32.xlu1 %v2918_v42, 288  ;;  %551 = vbcast.lane.b32.xlu0 %v2916_v41, 296 }
 0x1ce   : > { %v3162_v3 = vpop.permute.xlu1 %362  ;;  %v3164_v38 = vpop.permute.xlu0 %492 }
 0x1d0   : > { %421 = vbcast.lane.b32.xlu1 %v2914_v40, 304  ;;  %685 = vbcast.lane.b32.xlu0 %v2918_v42, 296 }
 0x1d2   : > { %v3250_v14 = vpop.permute.xlu1 %496  ;;  %v3252_v46 = vpop.permute.xlu0 %626 }
 0x1d3   : > { %7617 = vst [vmem:[#allocation59_spill] sm:$0xff] %v3252_v46 }
 0x1d4   : > { %555 = vbcast.lane.b32.xlu1 %v2916_v41, 304  ;;  %425 = vbcast.lane.b32.xlu0 %v2914_v40, 312 }
 0x1d6   : > { %v3340_v35 = vpop.permute.xlu1 %630  ;;  %v3342_v36 = vpop.permute.xlu0 %366 }
 0x1d8   : > { %689 = vbcast.lane.b32.xlu1 %v2918_v42, 304  ;;  %559 = vbcast.lane.b32.xlu0 %v2916_v41, 312 }
 0x1da   : > { %v3439_v34 = vpop.permute.xlu1 %370  ;;  %v3441_v2 = vpop.permute.xlu0 %500  ;;  %v7839_v15 = vld [vmem:[#allocation59_spill] sm:$0xff] }
 0x1db   : > { %7663 = vst [vmem:[#allocation63_spill] sm:$0xff] %v3439_v34  ;;  %7664 = vst [vmem:[#allocation64_spill] sm:$0xff] %v3441_v2 }
 0x1dc   : > { %429 = vbcast.lane.b32.xlu1 %v2914_v40, 320  ;;  %693 = vbcast.lane.b32.xlu0 %v2918_v42, 312 }
 0x1de   : > { %v3531_v46 = vpop.permute.xlu1 %504  ;;  %v3533_v18 = vpop.permute.xlu0 %634 }
 0x1df   : > { %7683 = vst [vmem:[#allocation65_spill] sm:$0xff] %v3531_v46  ;;  %7684 = vst [vmem:[#allocation66_spill] sm:$0xff] %v3533_v18  ;;  %v2116_v46 = vsel %vm3478_vm7, 1, %v7597_v60  ;;  %vm7743_vm7 = vcmp.eq.f32.partialorder %v3050_v21, %v2928_v53 }
 0x1e0   : > { %563 = vbcast.lane.b32.xlu1 %v2916_v41, 320  ;;  %433 = vbcast.lane.b32.xlu0 %v2914_v40, 328 }
 0x1e2   : > { %v3619_v2 = vpop.permute.xlu1 %638  ;;  %v3621_v57 = vpop.permute.xlu0 %374 }
 0x1e3   : > { %7703 = vst [vmem:[#allocation67_spill] sm:$0xff] %v3619_v2  ;;  %7704 = vst [vmem:[#allocation68_spill] sm:$0xff] %v3621_v57  ;;  %v2052_v57 = vsel %vm3393_vm13, 1, %v7597_v60  ;;  %v7712_v2 = vmov 0  ;;  %vm7723_vm13 = vcmp.eq.f32.partialorder %v3016_v27, %v2932_v56 }
 0x1e4   : > { %v7713_v2 = vsel %vm3651_vm0, 4294967295, %v7712_v2  ;;  %697 = vbcast.lane.b32.xlu1 %v2918_v42, 320  ;;  %vm3689_vm3 = vmand %vm7723_vm13, %vm7722_vm11  ;;  %567 = vbcast.lane.b32.xlu0 %v2916_v41, 328  ;;  %vm7727_vm13 = vcmp.gt.f32.partialorder %v3008_v26, %v2926_v52  ;;  %vm7730_vm11 = vcmp.gt.f32.partialorder %v3010_v29, %v2928_v53  ;;  %vm7734_vm0 = vcmp.eq.f32.partialorder %v3024_v22, %v2932_v56 }
 0x1e5   : > { %vm3707_vm14 = vmor %vm7727_vm13, %vm7726_vm1  ;;  %v3748_v7 = vadd.s32 %v2350_v5, %v2052_v57  ;;  %vm7739_vm13 = vcmp.gt.f32.partialorder %v3010_v29, %v2930_v54  ;;  %v2178_v57 = vsel %vm3519_vm2, 1, %v7597_v60  ;;  %vm7758_vm2 = vcmp.eq.f32.partialorder %v3048_v23, %v2924_v51 }
 0x1e6   : > { %vm3716_vm9 = vmor %vm7730_vm11, %vm3629_vm6  ;;  %v3742_v26 = vpop.permute.xlu1 %378  ;;  %v3744_v18 = vpop.permute.xlu0 %508  ;;  %v2180_v5 = vsel %vm3583_vm4, 1, %v7597_v60 }
 0x1e7   : > { %v7732_v28 = vsel %vm3716_vm9, 4294967295, %v7731_v28  ;;  %vm3726_vm12 = vmand %vm7734_vm0, %vm7733_vm5  ;;  %7737 = vst [vmem:[#allocation69_spill] sm:$0xff] %v3744_v18  ;;  %vm7738_vm5 = vcmp.eq.f32.partialorder %v3010_v29, %v2930_v54  ;;  %vm7742_vm9 = vcmp.lt.s32.totalorder %v7559_v8, %v7555_v1  ;;  %v2177_v29 = vsel %vm3488_vm10, 1, %v7597_v60 }
 0x1e8   : > { %vm3759_vm6 = vmor %vm7739_vm13, %vm7738_vm5  ;;  %vm7746_vm13 = vcmp.gt.f32.partialorder %v3014_v24, %v2928_v53  ;;  %437 = vbcast.lane.b32.xlu1 %v2914_v40, 336  ;;  %701 = vbcast.lane.b32.xlu0 %v2918_v42, 328  ;;  %vm7761_vm10 = vcmp.gt.f32.partialorder %v3016_v27, %v2932_v56  ;;  %v2461_v32 = vadd.s32 %v2177_v29, %v2175_v31  ;;  %v7769_v18 = vmov 0  ;;  %v7860_v29 = vld [vmem:[#allocation50_spill] sm:$0xff] }
 0x1e9   : > { %vm3773_vm11 = vmand %vm7743_vm7, %vm7742_vm9  ;;  %v7780_v31 = vmov 0 }
 0x1ea   : > { %vm3785_vm5 = vmor %vm7746_vm13, %vm3661_vm8  ;;  %vm7757_vm8 = vcmp.lt.s32.totalorder %v7558_v9, %v7555_v1 }
 0x1eb   : > { %v7748_v47 = vsel %vm3785_vm5, 4294967295, %v7747_v47  ;;  %vm7749_vm1 = vmmov %vm7742_vm9  ;;  %vm7750_vm9 = vcmp.eq.f32.partialorder %v3026_v25, %v2924_v51 }
 0x1ec   : > { %vm3795_vm7 = vmand %vm7750_vm9, %vm7749_vm1  ;;  %vm7753_vm1 = vcmp.eq.f32.partialorder %v3014_v24, %v2930_v54  ;;  %vm7754_vm9 = vcmp.gt.f32.partialorder %v3014_v24, %v2930_v54  ;;  %v3842_v24 = vadd.s32 %v2424_v39, %v2116_v46  ;;  %v3868_v46 = vpop.permute.xlu1 %512  ;;  %v3870_v39 = vpop.permute.xlu0 %642  ;;  %571 = vbcast.lane.b32.xlu1 %v2916_v41, 336  ;;  %441 = vbcast.lane.b32.xlu0 %v2914_v40, 344 }
 0x1ed   : > { %vm3819_vm0 = vmor %vm7754_vm9, %vm7753_vm1  ;;  %vm7771_vm9 = vcmp.lt.s32.totalorder %v7558_v9, %v7555_v1  ;;  %vm7784_vm1 = vcmp.gt.f32.partialorder %v3024_v22, %v2934_v61 }
 0x1ee   : > { %vm3833_vm5 = vmand %vm7758_vm2, %vm7757_vm8  ;;  %vm7764_vm8 = vcmp.gt.f32.partialorder %v3050_v21, %v2928_v53 }
 0x1ef   : > { %vm3849_vm13 = vmor %vm7761_vm10, %vm3689_vm3  ;;  %vm7768_vm10 = vcmp.gt.f32.partialorder %v3016_v27, %v2934_v61 }
 0x1f0   : > { %vm3858_vm2 = vmor %vm7764_vm8, %vm3773_vm11  ;;  %vm7767_vm11 = vcmp.eq.f32.partialorder %v3016_v27, %v2934_v61  ;;  %v2498_v27 = vadd.s32 %v2178_v57, %v2176_v13  ;;  %v7785_v13 = vmov 0  ;;  %v3977_v57 = vpop.permute.xlu1 %646  ;;  %705 = vbcast.lane.b32.xlu1 %v2918_v42, 336  ;;  %575 = vbcast.lane.b32.xlu0 %v2916_v41, 344 }
 0x1f1   : > { %vm3884_vm8 = vmor %vm7768_vm10, %vm7767_vm11  ;;  %vm7775_vm11 = vcmp.gt.f32.partialorder %v3024_v22, %v2932_v56 }
 0x1f2   : > { %v7770_v18 = vsel %vm3884_vm8, 4294967295, %v7769_v18  ;;  %vm3894_vm3 = vmand %vm7772_vm15, %vm7771_vm9  ;;  %vm7778_vm9 = vcmp.eq.f32.partialorder %v3050_v21, %v2930_v54  ;;  %vm7779_vm15 = vcmp.gt.f32.partialorder %v3050_v21, %v2930_v54 }
 0x1f3   : > { %vm3907_vm10 = vmor %vm7775_vm11, %vm3726_vm12  ;;  %vm7787_vm12 = vcmp.lt.s32.totalorder %v7559_v8, %v7555_v1  ;;  %vm7788_vm11 = vcmp.eq.f32.partialorder %v3085_v20, %v2932_v56 }
 0x1f4   : > { %v7777_v59 = vsel %vm3907_vm10, 4294967295, %v7776_v59  ;;  %vm3917_vm4 = vmor %vm7779_vm15, %vm7778_vm9  ;;  %vm7782_vm9 = vnez %v7699_v17  ;;  %vm7783_vm15 = vcmp.eq.f32.partialorder %v3024_v22, %v2934_v61  ;;  %v3960_v22 = vadd.s32 %v2461_v32, %v2179_v45  ;;  %v3979_v32 = vpop.permute.xlu0 %382  ;;  %v4101_v34 = vpop.permute.xlu1 %386  ;;  %445 = vbcast.lane.b32.xlu1 %v2914_v40, 352  ;;  %709 = vbcast.lane.b32.xlu0 %v2918_v42, 344 }
 0x1f5   : > { %v7781_v31 = vsel %vm3917_vm4, 4294967295, %v7780_v31  ;;  %v2053_v21 = vsel %vm7782_vm9, 1, %v7597_v60  ;;  %vm3939_vm10 = vmor %vm7784_vm1, %vm7783_vm15  ;;  %v3962_v17 = vadd.s32 %v2498_v27, %v2180_v5  ;;  %7794 = vst [vmem:[#allocation70_spill] sm:$0xff] %v3979_v32  ;;  %vm7795_vm9 = vnez %v7713_v2  ;;  %v7887_v32 = vld [vmem:[#allocation21_spill] sm:$0xff] }
 0x1f6   : > { %v7786_v13 = vsel %vm3939_vm10, 4294967295, %v7785_v13  ;;  %vm3949_vm8 = vmand %vm7788_vm11, %vm7787_vm12  ;;  %vm7791_vm12 = vcmp.gt.f32.partialorder %v3083_v58, %v2928_v53  ;;  %v2054_v45 = vsel %vm7795_vm9, 1, %v7597_v60  ;;  %v7798_v5 = vmov 0 }
 0x1f7   : > { %vm3969_vm11 = vmor %vm7791_vm12, %vm3894_vm3  ;;  %vm7796_vm3 = vcmp.eq.f32.partialorder %v3083_v58, %v2930_v54  ;;  %vm7797_vm12 = vcmp.gt.f32.partialorder %v3083_v58, %v2930_v54  ;;  %v2315_v2 = vadd.s32 %v3746_v6, %v2053_v21  ;;  %vm7800_vm9 = vnez %v7721_v16 }
 0x1f8   : > { %vm3990_vm1 = vmor %vm7797_vm12, %vm7796_vm3  ;;  %v2055_v44 = vsel %vm7800_vm9, 1, %v7597_v60  ;;  %vm7801_vm3 = vcmp.gt.f32.partialorder %v3085_v20, %v2932_v56  ;;  %vm7804_vm4 = vcmp.lt.s32.totalorder %v7558_v9, %v7555_v1  ;;  %vm7805_vm10 = vcmp.eq.f32.partialorder %v3118_v19, %v2932_v56  ;;  %v4103_v63 = vpop.permute.xlu0 %516  ;;  %579 = vbcast.lane.b32.xlu1 %v2916_v41, 352  ;;  %449 = vbcast.lane.b32.xlu0 %v2914_v40, 360 }
 0x1f9   : > { %v7799_v5 = vsel %vm3990_vm1, 4294967295, %v7798_v5  ;;  %vm4009_vm12 = vmor %vm7801_vm3, %vm3949_vm8  ;;  %v2056_v16 = vsel %vm3707_vm14, 1, %v7597_v60  ;;  %vm7808_vm8 = vnez %v7732_v28  ;;  %v7810_v21 = vmov 0 }
 0x1fa   : > { %vm4019_vm15 = vmand %vm7805_vm10, %vm7804_vm4  ;;  %v2117_v27 = vsel %vm7808_vm8, 1, %v7597_v60  ;;  %vm7809_vm4 = vcmp.gt.f32.partialorder %v3026_v25, %v2924_v51  ;;  %vm7812_vm3 = vcmp.eq.f32.partialorder %v3026_v25, %v2926_v52  ;;  %vm7813_vm1 = vcmp.gt.f32.partialorder %v3026_v25, %v2926_v52 }
 0x1fb   : > { %vm4039_vm10 = vmor %vm7809_vm4, %vm3795_vm7  ;;  %vm7816_vm8 = vcmp.eq.f32.partialorder %v3085_v20, %v2934_v61  ;;  %vm7817_vm9 = vcmp.gt.f32.partialorder %v3085_v20, %v2934_v61  ;;  %v2352_v20 = vadd.s32 %v3748_v7, %v2054_v45  ;;  %v2118_v25 = vsel %vm3759_vm6, 1, %v7597_v60 }
 0x1fc   : > { %v7811_v21 = vsel %vm4039_vm10, 4294967295, %v7810_v21  ;;  %vm4049_vm14 = vmor %vm7813_vm1, %vm7812_vm3  ;;  %vm7823_vm1 = vcmp.lt.s32.totalorder %v7557_v10, %v7555_v1  ;;  %v4105_v4 = vadd.s32 %v2315_v2, %v2055_v44  ;;  %v2120_v44 = vsel %vm3819_vm0, 1, %v7597_v60  ;;  %713 = vbcast.lane.b32.xlu1 %v2918_v42, 352  ;;  %583 = vbcast.lane.b32.xlu0 %v2916_v41, 360 }
 0x1fd   : > { %vm4059_vm7 = vmor %vm7817_vm9, %vm7816_vm8  ;;  %vm7820_vm8 = vcmp.gt.f32.partialorder %v3048_v23, %v2924_v51  ;;  %vm7824_vm9 = vcmp.eq.f32.partialorder %v3120_v62, %v2924_v51  ;;  %v4123_v2 = vadd.s32 %v2352_v20, %v2056_v16  ;;  %vm7835_vm4 = vcmp.eq.f32.partialorder %v3118_v19, %v2934_v61 }
 0x1fe   : > { %vm4083_vm10 = vmor %vm7820_vm8, %vm3833_vm5  ;;  %vm7827_vm5 = vnez %v7748_v47  ;;  %v2389_v47 = vadd.s32 %v3808_v12, %v2117_v27  ;;  %vm7836_vm6 = vcmp.gt.f32.partialorder %v3118_v19, %v2934_v61  ;;  %v2181_v16 = vsel %vm3849_vm13, 1, %v7597_v60 }
 0x1ff   : > { %vm4093_vm3 = vmand %vm7824_vm9, %vm7823_vm1  ;;  %v2119_v45 = vsel %vm7827_vm5, 1, %v7597_v60  ;;  %vm7828_vm1 = vcmp.gt.f32.partialorder %v3118_v19, %v2932_v56  ;;  %vm7832_vm5 = vcmp.gt.f32.partialorder %v3048_v23, %v2926_v52  ;;  %v2121_v27 = vsel %vm3858_vm2, 1, %v7597_v60 }
 0x200   : > { %vm4115_vm9 = vmor %vm7828_vm1, %vm4019_vm15  ;;  %vm7831_vm15 = vcmp.eq.f32.partialorder %v3048_v23, %v2926_v52  ;;  %v2426_v23 = vadd.s32 %v3842_v24, %v2118_v25  ;;  %v2390_v24 = vadd.s32 %v2389_v47, %v2119_v45  ;;  %v7849_v20 = vmov 0  ;;  %v4197_v25 = vpop.permute.xlu1 %520  ;;  %v4214_v45 = vpop.permute.xlu0 %650  ;;  %453 = vbcast.lane.b32.xlu1 %v2914_v40, 368  ;;  %717 = vbcast.lane.b32.xlu0 %v2918_v42, 360 }
 0x201   : > { %vm4135_vm1 = vmor %vm7832_vm5, %vm7831_vm15  ;;  %vm7843_vm15 = vcmp.lt.s32.totalorder %v7556_v11, %v7555_v1  ;;  %vm7844_vm5 = vcmp.eq.f32.partialorder %v3162_v3, %v2924_v51  ;;  %v2123_v7 = vsel %vm3969_vm11, 1, %v7597_v60  ;;  %7855 = vst [vmem:[#allocation59_spill] sm:$0xff] %v4214_v45  ;;  %vm7857_vm11 = vcmp.eq.f32.partialorder %v2946_v37, %v2920_v48 }
 0x202   : > { %vm4145_vm8 = vmor %vm7836_vm6, %vm7835_vm4  ;;  %vm7840_vm4 = vcmp.gt.f32.partialorder %v3120_v62, %v2924_v51  ;;  %v2463_v47 = vadd.s32 %v3960_v22, %v2181_v16  ;;  %vm7862_vm2 = vnez %v7799_v5  ;;  %v7865_v45 = vmov 0 }
 0x203   : > { %vm4164_vm6 = vmor %vm7840_vm4, %vm4093_vm3  ;;  %vm7845_vm3 = vnez %v7770_v18  ;;  %vm7846_vm4 = vnez %v7781_v31  ;;  %v2427_v18 = vadd.s32 %v2426_v23, %v2120_v44  ;;  %v2391_v23 = vadd.s32 %v2390_v24, %v2121_v27  ;;  %v7872_v27 = vld [vmem:[#allocation20_spill] sm:$0xff] }
 0x204   : > { %vm1551_vm13 = vmand %vm7844_vm5, %vm7843_vm15  ;;  %v2182_v30 = vsel %vm7845_vm3, 1, %v7597_v60  ;;  %v2122_v50 = vsel %vm7846_vm4, 1, %v7597_v60  ;;  %vm7847_vm15 = vcmp.eq.f32.partialorder %v3120_v62, %v2926_v52  ;;  %vm7848_vm5 = vcmp.gt.f32.partialorder %v3120_v62, %v2926_v52  ;;  %v4280_v16 = vpop.permute.xlu1 %654  ;;  %587 = vbcast.lane.b32.xlu1 %v2916_v41, 368  ;;  %457 = vbcast.lane.b32.xlu0 %v2914_v40, 376 }
 0x205   : > { %vm4191_vm0 = vmor %vm7848_vm5, %vm7847_vm15  ;;  %vm7851_vm3 = vnez %v7777_v59  ;;  %vm7852_vm4 = vcmp.gt.f32.partialorder %v3162_v3, %v2924_v51  ;;  %v7853_v62 = vmov 0  ;;  %v7858_v59 = vmov 0 }
 0x206   : > { %v7850_v20 = vsel %vm4191_vm0, 4294967295, %v7849_v20  ;;  %v2183_v31 = vsel %vm7851_vm3, 1, %v7597_v60  ;;  %vm4208_vm15 = vmor %vm7852_vm4, %vm1551_vm13  ;;  %vm7856_vm3 = vcmp.lt.s32.totalorder %v7559_v8, %v7555_v1  ;;  %vm7861_vm4 = vnez %v7786_v13 }
 0x207   : > { %v7854_v62 = vsel %vm4208_vm15, 4294967295, %v7853_v62  ;;  %vm4224_vm0 = vmand %vm7857_vm11, %vm7856_vm3  ;;  %v2184_v44 = vsel %vm7861_vm4, 1, %v7597_v60  ;;  %v2124_v8 = vsel %vm7862_vm2, 1, %v7597_v60  ;;  %vm7863_vm3 = vcmp.eq.f32.partialorder %v3162_v3, %v2926_v52 }
 0x208   : > { %v7859_v59 = vsel %vm4224_vm0, 4294967295, %v7858_v59  ;;  %vm7864_vm11 = vcmp.gt.f32.partialorder %v3162_v3, %v2926_v52  ;;  %vm7867_vm13 = vcmp.lt.s32.totalorder %v7557_v10, %v7555_v1  ;;  %vm7868_vm4 = vcmp.eq.f32.partialorder %v3164_v38, %v2928_v53  ;;  %721 = vbcast.lane.b32.xlu1 %v2918_v42, 368  ;;  %591 = vbcast.lane.b32.xlu0 %v2916_v41, 376  ;;  %v7931_v41 = vld [vmem:[#allocation52_spill] sm:$0xff] }
 0x209   : > { %vm4243_vm5 = vmor %vm7864_vm11, %vm7863_vm3  ;;  %v2500_v13 = vadd.s32 %v3962_v17, %v2182_v30  ;;  %v2428_v22 = vadd.s32 %v2427_v18, %v2122_v50  ;;  %vm7869_vm3 = vcmp.gt.f32.partialorder %v3164_v38, %v2928_v53  ;;  %v2464_v3 = vadd.s32 %v2463_v47, %v2183_v31  ;;  %v4296_v18 = vpop.permute.xlu0 %390 }
 0x20a   : > { %v7866_v45 = vsel %vm4243_vm5, 4294967295, %v7865_v45  ;;  %vm1613_vm0 = vmand %vm7868_vm4, %vm7867_vm13  ;;  %vm1295_vm5 = vcmp.eq.f32.partialorder %v3340_v35, %v2932_v56  ;;  %vm7870_vm2 = vcmp.eq.f32.partialorder %v3164_v38, %v2930_v54  ;;  %v2392_v5 = vadd.s32 %v2391_v23, %v2123_v7 }
 0x20b   : > { %vm1869_vm11 = vmor %vm7869_vm3, %vm1613_vm0  ;;  %vm7871_vm0 = vcmp.gt.f32.partialorder %v3164_v38, %v2930_v54  ;;  %vm7432_vm4 = vcmp.lt.s32.totalorder %v7872_v27, %v7555_v1  ;;  %v2501_v24 = vadd.s32 %v2500_v13, %v2184_v44  ;;  %v2185_v38 = vsel %vm4009_vm12, 1, %v7597_v60 }
 0x20c   : > { %vm1870_vm3 = vmor %vm7871_vm0, %vm7870_vm2  ;;  %v2125_v17 = vsel %vm1869_vm11, 1, %v7597_v60  ;;  %v2429_v50 = vadd.s32 %v2428_v22, %v2124_v8  ;;  %vm7873_vm2 = vcmp.lt.s32.totalorder %v7556_v11, %v7555_v1  ;;  %vm7874_vm11 = vcmp.eq.f32.partialorder %v3250_v14, %v2928_v53  ;;  %v4365_v22 = vpop.permute.xlu1 %263  ;;  %725 = vbcast.lane.b32.xlu0 %v2918_v42, 376 }
 0x20d   : > { %v2126_v30 = vsel %vm1870_vm3, 1, %v7597_v60  ;;  %vm1615_vm0 = vmand %vm7874_vm11, %vm7873_vm2  ;;  %vm914_vm15 = vcmp.gt.f32.partialorder %v3342_v36, %v2926_v52  ;;  %vm7875_vm13 = vnez %v7811_v21  ;;  %v2058_v8 = vsel %vm4049_vm14, 1, %v7597_v60 }
 0x20e   : > { %v2057_v58 = vsel %vm7875_vm13, 1, %v7597_v60  ;;  %v2186_v31 = vsel %vm4059_vm7, 1, %v7597_v60  ;;  %v2393_v7 = vadd.s32 %v2392_v5, %v2125_v17  ;;  %vm7876_vm12 = vcmp.gt.f32.partialorder %v3250_v14, %v2928_v53 }
 0x20f   : > { %vm1871_vm3 = vmor %vm7876_vm12, %vm1615_vm0  ;;  %vm7877_vm2 = vcmp.eq.f32.partialorder %v2944_v0, %v2922_v49  ;;  %vm7878_vm13 = vcmp.gt.f32.partialorder %v2944_v0, %v2922_v49  ;;  %vm7881_vm7 = vcmp.lt.s32.totalorder %v7558_v9, %v7555_v1  ;;  %vm7882_vm0 = vcmp.eq.f32.partialorder %v2949_v43, %v2920_v48 }
 0x210   : > { %vm4317_vm11 = vmor %vm7878_vm13, %vm7877_vm2  ;;  %v2059_v0 = vsel %vm4083_vm10, 1, %v7597_v60  ;;  %v2187_v28 = vsel %vm4115_vm9, 1, %v7597_v60  ;;  %v2430_v47 = vadd.s32 %v2429_v50, %v2126_v30  ;;  %vm7885_vm2 = vcmp.eq.f32.partialorder %v3250_v14, %v2930_v54 }
 0x211   : > { %vm4329_vm12 = vmand %vm7882_vm0, %vm7881_vm7  ;;  %vm7886_vm13 = vcmp.gt.f32.partialorder %v3250_v14, %v2930_v54  ;;  %v2127_v44 = vsel %vm1871_vm3, 1, %v7597_v60  ;;  %vm7433_vm9 = vcmp.lt.s32.totalorder %v7887_v32, %v7555_v1  ;;  %v2465_v33 = vadd.s32 %v2464_v3, %v2185_v38  ;;  %v4376_v38 = vpop.permute.xlu0 %524 }
 0x212   : > { %vm1872_vm14 = vmor %vm7886_vm13, %vm7885_vm2  ;;  %v2188_v23 = vsel %vm4145_vm8, 1, %v7597_v60  ;;  %v4357_v13 = vadd.s32 %v2393_v7, %v2127_v44  ;;  %vm7888_vm3 = vcmp.lt.s32.totalorder %v7557_v10, %v7555_v1  ;;  %vm7889_vm0 = vcmp.eq.f32.partialorder %v7839_v15, %v2932_v56  ;;  %v7943_v7 = vld [vmem:[#allocation53_spill] sm:$0xff] }
 0x213   : > { %v2128_v14 = vsel %vm1872_vm14, 1, %v7597_v60  ;;  %vm1677_vm2 = vmand %vm7889_vm0, %vm7888_vm3  ;;  %v2317_v17 = vadd.s32 %v4105_v4, %v2057_v58  ;;  %v2060_v12 = vsel %vm4135_vm1, 1, %v7597_v60  ;;  %v2502_v3 = vadd.s32 %v2501_v24, %v2186_v31 }
 0x214   : > { %v4371_v5 = vadd.s32 %v2430_v47, %v2128_v14  ;;  %vm7890_vm8 = vcmp.gt.f32.partialorder %v7839_v15, %v2932_v56  ;;  %v2354_v30 = vadd.s32 %v4123_v2, %v2058_v8  ;;  %v2061_v50 = vsel %vm4164_vm6, 1, %v7597_v60 }
 0x215   : > { %vm1933_vm14 = vmor %vm7890_vm8, %vm1677_vm2  ;;  %vm7891_vm13 = vcmp.eq.f32.partialorder %v7839_v15, %v2934_v61  ;;  %vm7892_vm1 = vcmp.gt.f32.partialorder %v7839_v15, %v2934_v61  ;;  %v2466_v6 = vadd.s32 %v2465_v33, %v2187_v28  ;;  %v2318_v24 = vadd.s32 %v2317_v17, %v2059_v0  ;;  %v4442_v44 = vpop.permute.xlu0 %658  ;;  %v7914_v17 = vld [vmem:[#allocation51_spill] sm:$0xff] }
 0x216   : > { %vm1934_vm3 = vmor %vm7892_vm1, %vm7891_vm13  ;;  %v2189_v4 = vsel %vm1933_vm14, 1, %v7597_v60  ;;  %vm7893_vm0 = vnez %v7850_v20  ;;  %v2503_v58 = vadd.s32 %v2502_v3, %v2188_v23  ;;  %vm7894_vm6 = vcmp.lt.s32.totalorder %v7556_v11, %v7555_v1  ;;  %v4409_v20 = vpop.permute.xlu1 %271 }
 0x217   : > { %v2062_v2 = vsel %vm7893_vm0, 1, %v7597_v60  ;;  %v2190_v19 = vsel %vm1934_vm3, 1, %v7597_v60  ;;  %vm1679_vm2 = vmand %vm1295_vm5, %vm7894_vm6  ;;  %v2355_v15 = vadd.s32 %v2354_v30, %v2060_v12  ;;  %vm7895_vm8 = vnez %v7854_v62 }
 0x218   : > { %v2063_v8 = vsel %vm7895_vm8, 1, %v7597_v60  ;;  %v2467_v31 = vadd.s32 %v2466_v6, %v2189_v4  ;;  %vm7896_vm14 = vcmp.gt.f32.partialorder %v3340_v35, %v2932_v56  ;;  %vm1170_vm1 = vcmp.eq.f32.partialorder %v3342_v36, %v2926_v52 }
 0x219   : > { %vm1935_vm13 = vmor %vm7896_vm14, %vm1679_vm2  ;;  %vm7897_vm3 = vnez %v7859_v59  ;;  %vm7898_vm5 = vcmp.gt.f32.partialorder %v2946_v37, %v2920_v48  ;;  %vm7901_vm2 = vcmp.lt.s32.totalorder %v7557_v10, %v7555_v1  ;;  %vm7902_vm8 = vcmp.eq.f32.partialorder %v7860_v29, %v2920_v48  ;;  %v4500_v6 = vpop.permute.xlu0 %267 }
 0x21a   : > { %vm4416_vm0 = vmor %vm7898_vm5, %vm7897_vm3  ;;  %vm7905_vm7 = vnez %v7866_v45  ;;  %v2319_v0 = vadd.s32 %v2318_v24, %v2061_v50  ;;  %v2504_v28 = vadd.s32 %v2503_v58, %v2190_v19  ;;  %vm7906_vm3 = vcmp.eq.f32.partialorder %v3340_v35, %v2934_v61  ;;  %v7909_v45 = vld [vmem:[#allocation63_spill] sm:$0xff]  ;;  %v4487_v50 = vpop.permute.xlu1 %279  ;;  %v7923_v19 = vld [vmem:[#allocation62_spill] sm:$0xff] }
 0x21b   : > { %vm4428_vm14 = vmand %vm7902_vm8, %vm7901_vm2  ;;  %v2064_v59 = vsel %vm7905_vm7, 1, %v7597_v60  ;;  %vm7907_vm5 = vcmp.gt.f32.partialorder %v3340_v35, %v2934_v61  ;;  %v2191_v47 = vsel %vm1935_vm13, 1, %v7597_v60  ;;  %v2356_v33 = vadd.s32 %v2355_v15, %v2062_v2  ;;  %v7924_v58 = vld [vmem:[#allocation60_spill] sm:$0xff] }
 0x21c   : > { %vm1936_vm6 = vmor %vm7907_vm5, %vm7906_vm3  ;;  %v4445_v14 = vadd.s32 %v2467_v31, %v2191_v47  ;;  %vm7908_vm7 = vcmp.eq.f32.partialorder %v3342_v36, %v2924_v51  ;;  %vm1171_vm8 = vcmp.eq.f32.partialorder %v7909_v45, %v2924_v51  ;;  %vm7910_vm13 = vcmp.eq.f32.partialorder %v2946_v37, %v2922_v49  ;;  %v7961_v2 = vld [vmem:[#allocation68_spill] sm:$0xff] }
 0x21d   : > { %v2192_v23 = vsel %vm1936_vm6, 1, %v7597_v60  ;;  %vm1553_vm2 = vmand %vm7908_vm7, %vm7432_vm4  ;;  %vm7911_vm6 = vcmp.gt.f32.partialorder %v2946_v37, %v2922_v49  ;;  %vm1103_vm5 = vcmp.eq.f32.partialorder %v7914_v17, %v2920_v48  ;;  %v2320_v12 = vadd.s32 %v2319_v0, %v2063_v8  ;;  %v7930_v0 = vld [vmem:[#allocation65_spill] sm:$0xff] }
 0x21e   : > { %vm4462_vm3 = vmor %vm7911_vm6, %vm7910_vm13  ;;  %v4468_v3 = vadd.s32 %v2504_v28, %v2192_v23  ;;  %vm7915_vm7 = vcmp.gt.f32.partialorder %v3342_v36, %v2924_v51  ;;  %vm915_vm10 = vcmp.gt.f32.partialorder %v7909_v45, %v2924_v51  ;;  %v2357_v37 = vadd.s32 %v2356_v33, %v2064_v59  ;;  %v7916_v36 = vld [vmem:[#allocation64_spill] sm:$0xff]  ;;  %v4569_v28 = vpop.permute.xlu1 %287  ;;  %v4582_v33 = vpop.permute.xlu0 %275  ;;  %v7932_v23 = vld [vmem:[#allocation61_spill] sm:$0xff] }
 0x21f   : > { %vm1809_vm4 = vmor %vm7915_vm7, %vm1553_vm2  ;;  %vm916_vm6 = vcmp.gt.f32.partialorder %v7909_v45, %v2926_v52  ;;  %vm1172_vm2 = vcmp.eq.f32.partialorder %v7909_v45, %v2926_v52  ;;  %v1992_v24 = vsel %vm4317_vm11, 1, %v7597_v60  ;;  %vm7920_vm7 = vcmp.lt.s32.totalorder %v7556_v11, %v7555_v1 }
 0x220   : > { %vm1810_vm13 = vmor %vm914_vm15, %vm1170_vm1  ;;  %v2065_v30 = vsel %vm1809_vm4, 1, %v7597_v60  ;;  %vm1233_vm4 = vcmp.eq.f32.partialorder %v7916_v36, %v2928_v53  ;;  %vm7917_vm1 = vcmp.gt.f32.partialorder %v2949_v43, %v2920_v48  ;;  %v2242_v15 = vadd.s32 %v7924_v58, %v7923_v19 }
 0x221   : > { %v2066_v40 = vsel %vm1810_vm13, 1, %v7597_v60  ;;  %v2321_v4 = vadd.s32 %v2320_v12, %v2065_v30  ;;  %vm1555_vm15 = vmand %vm1171_vm8, %vm7433_vm9  ;;  %vm1234_vm8 = vcmp.eq.f32.partialorder %v7916_v36, %v2930_v54  ;;  %v2279_v45 = vadd.s32 %v7932_v23, %v1992_v24  ;;  %v7933_v12 = vld [vmem:[#allocation22_spill] sm:$0xff]  ;;  %v7934_v30 = vld [vmem:[#allocation45_spill] sm:$0xff] }
 0x222   : > { %vm4510_vm13 = vmor %vm7917_vm1, %vm4329_vm12  ;;  %v2358_v55 = vadd.s32 %v2357_v37, %v2066_v40  ;;  %vm977_vm12 = vcmp.gt.f32.partialorder %v7916_v36, %v2928_v53  ;;  %vm7925_vm1 = vcmp.eq.f32.partialorder %v2949_v43, %v2922_v49  ;;  %323 = vbcast.lane.b32.xlu1 %v7934_v30, 376  ;;  %v1993_v24 = vsel %vm4416_vm0, 1, %v7597_v60  ;;  %v7951_v23 = vld [vmem:[#allocation67_spill] sm:$0xff] }
 0x223   : > { %vm4522_vm9 = vmand %vm1103_vm5, %vm7920_vm7  ;;  %vm7926_vm5 = vcmp.gt.f32.partialorder %v2949_v43, %v2922_v49  ;;  %v1994_v58 = vsel %vm4462_vm3, 1, %v7597_v60  ;;  %vm7952_vm3 = vcmp.lt.s32.totalorder %v7887_v32, %v7555_v1 }
 0x224   : > { %vm1811_vm11 = vmor %vm915_vm10, %vm1555_vm15  ;;  %vm978_vm15 = vcmp.gt.f32.partialorder %v7916_v36, %v2930_v54  ;;  %v7936_v36 = vld [vmem:[#allocation66_spill] sm:$0xff]  ;;  %v2280_v35 = vadd.s32 %v2279_v45, %v1994_v58 }
 0x225   : > { %vm4540_vm7 = vmor %vm7926_vm5, %vm7925_vm1  ;;  %v2067_v31 = vsel %vm1811_vm11, 1, %v7597_v60  ;;  %vm1235_vm11 = vcmp.eq.f32.partialorder %v7930_v0, %v2928_v53  ;;  %v7966_v58 = vld [vmem:[#allocation54_spill] sm:$0xff] }
 0x226   : > { %vm1812_vm10 = vmor %vm916_vm6, %vm1172_vm2  ;;  %v4559_v59 = vadd.s32 %v2321_v4, %v2067_v31  ;;  %vm7929_vm6 = vcmp.lt.s32.totalorder %v7872_v27, %v7555_v1  ;;  %v7948_v31 = vld [vmem:[#allocation25_spill] sm:$0xff] }
 0x227   : > { %v2068_v43 = vsel %vm1812_vm10, 1, %v7597_v60  ;;  %vm1617_vm2 = vmand %vm1233_vm4, %vm7929_vm6  ;;  %vm1105_vm10 = vcmp.eq.f32.partialorder %v7931_v41, %v2920_v48  ;;  %vm979_vm4 = vcmp.gt.f32.partialorder %v7930_v0, %v2928_v53 }
 0x228   : > { %v4575_v47 = vadd.s32 %v2358_v55, %v2068_v43  ;;  %vm1873_vm1 = vmor %vm977_vm12, %vm1617_vm2  ;;  %vm980_vm12 = vcmp.gt.f32.partialorder %v7930_v0, %v2930_v54  ;;  %vm1236_vm2 = vcmp.eq.f32.partialorder %v7930_v0, %v2930_v54  ;;  %v4644_v55 = vpop.permute.xlu1 %295 }
 0x229   : > { %vm1874_vm5 = vmor %vm978_vm15, %vm1234_vm8  ;;  %v2129_v37 = vsel %vm1873_vm1, 1, %v7597_v60  ;;  %vm7935_vm8 = vcmp.lt.s32.totalorder %v7887_v32, %v7555_v1 }
 0x22a   : > { %v2130_v40 = vsel %vm1874_vm5, 1, %v7597_v60  ;;  %v2395_v4 = vadd.s32 %v4357_v13, %v2129_v37  ;;  %vm1619_vm15 = vmand %vm1235_vm11, %vm7935_vm8  ;;  %vm7937_vm5 = vcmp.gt.f32.partialorder %v7860_v29, %v2920_v48  ;;  %vm7940_vm8 = vcmp.lt.s32.totalorder %v7872_v27, %v7555_v1  ;;  %v7981_v13 = vld [vmem:[#allocation69_spill] sm:$0xff] }
 0x22b   : > { %vm4620_vm6 = vmor %vm7937_vm5, %vm4428_vm14  ;;  %v2432_v62 = vadd.s32 %v4371_v5, %v2130_v40  ;;  %vm1041_vm5 = vcmp.gt.f32.partialorder %v7936_v36, %v2932_v56  ;;  %v2243_v37 = vadd.s32 %v2242_v15, %v1993_v24 }
 0x22c   : > { %vm4632_vm1 = vmand %vm1105_vm10, %vm7940_vm8  ;;  %vm7944_vm10 = vcmp.eq.f32.partialorder %v7860_v29, %v2922_v49  ;;  %vm7945_vm8 = vcmp.gt.f32.partialorder %v7860_v29, %v2922_v49  ;;  %v4671_v29 = vpop.permute.xlu0 %283  ;;  %v4719_v45 = vpop.permute.xlu1 %303 }
 0x22d   : > { %vm1875_vm14 = vmor %vm979_vm4, %vm1619_vm15  ;;  %vm917_vm4 = vcmp.gt.f32.partialorder %v7961_v2, %v2924_v51 }
 0x22e   : > { %vm4652_vm11 = vmor %vm7945_vm8, %vm7944_vm10  ;;  %v2131_v5 = vsel %vm1875_vm14, 1, %v7597_v60  ;;  %vm1042_vm10 = vcmp.gt.f32.partialorder %v7936_v36, %v2934_v61  ;;  %vm1298_vm8 = vcmp.eq.f32.partialorder %v7936_v36, %v2934_v61 }
 0x22f   : > { %vm1876_vm15 = vmor %vm980_vm12, %vm1236_vm2  ;;  %v4679_v0 = vadd.s32 %v2395_v4, %v2131_v5  ;;  %vm7949_vm12 = vcmp.lt.s32.totalorder %v7872_v27, %v7555_v1  ;;  %vm7950_vm2 = vcmp.eq.f32.partialorder %v7936_v36, %v2932_v56  ;;  %v1995_v4 = vsel %vm4510_vm13, 1, %v7597_v60 }
 0x230   : > { %v2132_v43 = vsel %vm1876_vm15, 1, %v7597_v60  ;;  %vm1681_vm14 = vmand %vm7950_vm2, %vm7949_vm12  ;;  %vm7953_vm15 = vcmp.eq.f32.partialorder %v7943_v7, %v2920_v48  ;;  %vm1043_vm2 = vcmp.gt.f32.partialorder %v7951_v23, %v2932_v56  ;;  %v4743_v21 = vpop.permute.xlu0 %291  ;;  %v1996_v5 = vsel %vm4540_vm7, 1, %v7597_v60 }
 0x231   : > { %vm4695_vm0 = vmand %vm7953_vm15, %vm7952_vm3  ;;  %v4699_v40 = vadd.s32 %v2432_v62, %v2132_v43  ;;  %vm1044_vm15 = vcmp.gt.f32.partialorder %v7951_v23, %v2934_v61  ;;  %v7967_v43 = vld [vmem:[#allocation26_spill] sm:$0xff]  ;;  %v2281_v9 = vadd.s32 %v2280_v35, %v1996_v5  ;;  %v7973_v35 = vld [vmem:[#allocation55_spill] sm:$0xff]  ;;  %v1998_v42 = vsel %vm4652_vm11, 1, %v7597_v60 }
 0x232   : > { %vm1937_vm12 = vmor %vm1041_vm5, %vm1681_vm14  ;;  %vm1300_vm5 = vcmp.eq.f32.partialorder %v7951_v23, %v2934_v61  ;;  %vm7956_vm14 = vcmp.gt.f32.partialorder %v7914_v17, %v2920_v48  ;;  %vm981_vm11 = vcmp.gt.f32.partialorder %v7981_v13, %v2928_v53 }
 0x233   : > { %vm1938_vm3 = vmor %vm1042_vm10, %vm1298_vm8  ;;  %v2193_v15 = vsel %vm1937_vm12, 1, %v7597_v60  ;;  %vm7959_vm8 = vcmp.lt.s32.totalorder %v7887_v32, %v7555_v1  ;;  %vm7960_vm12 = vcmp.eq.f32.partialorder %v7951_v23, %v2932_v56  ;;  %v4794_v23 = vpop.permute.xlu1 %311  ;;  %v2282_v30 = vadd.s32 %v2281_v9, %v1998_v42 }
 0x234   : > { %vm4729_vm10 = vmor %vm7956_vm14, %vm4522_vm9  ;;  %v2194_v24 = vsel %vm1938_vm3, 1, %v7597_v60  ;;  %v2469_v62 = vadd.s32 %v4445_v14, %v2193_v15  ;;  %vm7962_vm9 = vcmp.eq.f32.partialorder %v7914_v17, %v2922_v49  ;;  %vm7963_vm3 = vcmp.gt.f32.partialorder %v7914_v17, %v2922_v49 }
 0x235   : > { %vm1683_vm13 = vmand %vm7960_vm12, %vm7959_vm8  ;;  %vm1109_vm8 = vcmp.eq.f32.partialorder %v7966_v58, %v2920_v48  ;;  %v2506_v15 = vadd.s32 %v4468_v3, %v2194_v24  ;;  %v2244_v24 = vadd.s32 %v2243_v37, %v1995_v4  ;;  %v4815_v37 = vpop.permute.xlu0 %299  ;;  %v7974_v4 = vld [vmem:[#allocation27_spill] sm:$0xff]  ;;  %v1999_v9 = vsel %vm4729_vm10, 1, %v7597_v60 }
 0x236   : > { %vm4754_vm14 = vmor %vm7963_vm3, %vm7962_vm9  ;;  %vm7968_vm9 = vcmp.lt.s32.totalorder %v7933_v12, %v7555_v1 }
 0x237   : > { %vm1939_vm7 = vmor %vm1043_vm2, %vm1683_vm13  ;;  %vm1174_vm2 = vcmp.eq.f32.partialorder %v7961_v2, %v2926_v52  ;;  %vm920_vm13 = vcmp.gt.f32.partialorder %v3742_v26, %v2926_v52  ;;  %v4879_v19 = vpop.permute.xlu1 %319  ;;  %v2000_v36 = vsel %vm4754_vm14, 1, %v7597_v60  ;;  %vm8007_vm14 = vcmp.lt.s32.totalorder %v7948_v31, %v7555_v1 }
 0x238   : > { %vm1940_vm3 = vmor %vm1044_vm15, %vm1300_vm5  ;;  %v2195_v17 = vsel %vm1939_vm7, 1, %v7597_v60  ;;  %vm7969_vm15 = vcmp.eq.f32.partialorder %v7961_v2, %v2924_v51  ;;  %vm7976_vm7 = vcmp.gt.f32.partialorder %v7931_v41, %v2920_v48 }
 0x239   : > { %v2196_v3 = vsel %vm1940_vm3, 1, %v7597_v60  ;;  %v4784_v8 = vadd.s32 %v2469_v62, %v2195_v17  ;;  %vm1557_vm5 = vmand %vm7969_vm15, %vm7968_vm9  ;;  %vm919_vm15 = vcmp.gt.f32.partialorder %v3742_v26, %v2924_v51 }
 0x23a   : > { %vm7970_vm3 = vmmov %vm7968_vm9  ;;  %v4808_v17 = vadd.s32 %v2506_v15, %v2196_v3  ;;  %v1997_v15 = vsel %vm4620_vm6, 1, %v7597_v60 }
 0x23b   : > { %vm4804_vm12 = vmand %vm1109_vm8, %vm7970_vm3  ;;  %vm1176_vm8 = vcmp.eq.f32.partialorder %v3742_v26, %v2926_v52  ;;  %v2245_v11 = vadd.s32 %v2244_v24, %v1997_v15  ;;  %v4904_v24 = vpop.permute.xlu0 %307  ;;  %v4961_v42 = vpop.permute.xlu1 %397 }
 0x23c   : > { %vm1813_vm9 = vmor %vm917_vm4, %vm1557_vm5  ;;  %vm7975_vm4 = vcmp.gt.f32.partialorder %v7961_v2, %v2926_v52  ;;  %8002 = vst [vmem:[#allocation50_spill] sm:$0xff] %v4961_v42 }
 0x23d   : > { %vm1814_vm5 = vmor %vm7975_vm4, %vm1174_vm2  ;;  %v2069_v5 = vsel %vm1813_vm9, 1, %v7597_v60  ;;  %vm7979_vm2 = vcmp.lt.s32.totalorder %v7948_v31, %v7555_v1  ;;  %vm7980_vm9 = vcmp.eq.f32.partialorder %v3742_v26, %v2924_v51  ;;  %v7993_v26 = vld [vmem:[#allocation56_spill] sm:$0xff]  ;;  %v2246_v32 = vadd.s32 %v2245_v11, %v1999_v9 }
 0x23e   : > { %vm4844_vm3 = vmor %vm7976_vm7, %vm4632_vm1  ;;  %v2070_v3 = vsel %vm1814_vm5, 1, %v7597_v60  ;;  %v2323_v10 = vadd.s32 %v4559_v59, %v2069_v5  ;;  %vm7982_vm1 = vcmp.eq.f32.partialorder %v7931_v41, %v2922_v49  ;;  %vm7983_vm7 = vcmp.gt.f32.partialorder %v7931_v41, %v2922_v49  ;;  %v8035_v59 = vld [vmem:[#allocation70_spill] sm:$0xff] }
 0x23f   : > { %vm1559_vm6 = vmand %vm7980_vm9, %vm7979_vm2  ;;  %v2360_v5 = vadd.s32 %v4575_v47, %v2070_v3  ;;  %v4988_v14 = vpop.permute.xlu0 %315  ;;  %v5033_v62 = vpop.permute.xlu1 %531 }
 0x240   : > { %vm4867_vm5 = vmor %vm7983_vm7, %vm7982_vm1  ;;  %8016 = vst [vmem:[#allocation63_spill] sm:$0xff] %v5033_v62 }
 0x241   : > { %vm1815_vm9 = vmor %vm919_vm15, %vm1559_vm6  ;;  %v2002_v2 = vsel %vm4867_vm5, 1, %v7597_v60  ;;  %vm8034_vm5 = vcmp.eq.f32.partialorder %v3977_v57, %v2932_v56 }
 0x242   : > { %vm7986_vm7 = vmmov %vm7979_vm2  ;;  %vm7987_vm2 = vcmp.eq.f32.partialorder %v7973_v35, %v2920_v48  ;;  %v2071_v47 = vsel %vm1815_vm9, 1, %v7597_v60  ;;  %vm7995_vm9 = vcmp.eq.f32.partialorder %v7981_v13, %v2928_v53 }
 0x243   : > { %vm4889_vm4 = vmand %vm7987_vm2, %vm7986_vm7  ;;  %vm7990_vm2 = vcmp.gt.f32.partialorder %v7943_v7, %v2920_v48  ;;  %v4918_v27 = vadd.s32 %v2323_v10, %v2071_v47  ;;  %v8042_v10 = vld [vmem:[#allocation58_spill] sm:$0xff] }
 0x244   : > { %vm1816_vm15 = vmor %vm920_vm13, %vm1176_vm8  ;;  %vm7994_vm8 = vcmp.lt.s32.totalorder %v7933_v12, %v7555_v1  ;;  %vm7997_vm13 = vcmp.gt.f32.partialorder %v7943_v7, %v2922_v49 }
 0x245   : > { %vm4911_vm7 = vmor %vm7990_vm2, %vm4695_vm0  ;;  %v2072_v3 = vsel %vm1816_vm15, 1, %v7597_v60  ;;  %vm7996_vm2 = vcmp.eq.f32.partialorder %v7943_v7, %v2922_v49  ;;  %vm8030_vm0 = vcmp.gt.f32.partialorder %v7973_v35, %v2922_v49 }
 0x246   : > { %vm1621_vm6 = vmand %vm7995_vm9, %vm7994_vm8  ;;  %v4940_v47 = vadd.s32 %v2360_v5, %v2072_v3  ;;  %vm983_vm9 = vcmp.gt.f32.partialorder %v3868_v46, %v2928_v53  ;;  %v2003_v41 = vsel %vm4911_vm7, 1, %v7597_v60  ;;  %vm923_vm7 = vcmp.gt.f32.partialorder %v4101_v34, %v2924_v51 }
 0x247   : > { %vm4934_vm15 = vmor %vm7997_vm13, %vm7996_vm2  ;;  %vm8000_vm13 = vcmp.eq.f32.partialorder %v7981_v13, %v2930_v54  ;;  %vm8001_vm2 = vcmp.gt.f32.partialorder %v7981_v13, %v2930_v54 }
 0x248   : > { %vm1877_vm8 = vmor %vm981_vm11, %vm1621_vm6  ;;  %vm1240_vm11 = vcmp.eq.f32.partialorder %v3868_v46, %v2930_v54  ;;  %vm8003_vm6 = vcmp.lt.s32.totalorder %v7967_v43, %v7555_v1  ;;  %v2004_v15 = vsel %vm4934_vm15, 1, %v7597_v60 }
 0x249   : > { %vm1878_vm1 = vmor %vm8001_vm2, %vm8000_vm13  ;;  %v2133_v7 = vsel %vm1877_vm8, 1, %v7597_v60  ;;  %vm8004_vm8 = vcmp.eq.f32.partialorder %v7993_v26, %v2920_v48  ;;  %vm8008_vm2 = vcmp.eq.f32.partialorder %v3868_v46, %v2928_v53 }
 0x24a   : > { %vm4974_vm13 = vmand %vm8004_vm8, %vm8003_vm6  ;;  %v2134_v5 = vsel %vm1878_vm1, 1, %v7597_v60  ;;  %v2397_v3 = vadd.s32 %v4679_v0, %v2133_v7  ;;  %v8009_v0 = vld [vmem:[#allocation57_spill] sm:$0xff]  ;;  %vm8010_vm6 = vcmp.gt.f32.partialorder %v3868_v46, %v2930_v54 }
 0x24b   : > { %vm1623_vm10 = vmand %vm8008_vm2, %vm8007_vm14  ;;  %v2434_v7 = vadd.s32 %v4699_v40, %v2134_v5  ;;  %v2283_v40 = vadd.s32 %v2282_v30, %v2000_v36  ;;  %vm8022_vm8 = vcmp.eq.f32.partialorder %v8009_v0, %v2920_v48  ;;  %v5066_v36 = vpop.permute.xlu0 %401  ;;  %v2001_v5 = vsel %vm4844_vm3, 1, %v7597_v60 }
 0x24c   : > { %vm1879_vm14 = vmor %vm983_vm9, %vm1623_vm10  ;;  %vm8011_vm9 = vcmp.gt.f32.partialorder %v7966_v58, %v2920_v48  ;;  %8026 = vst [vmem:[#allocation51_spill] sm:$0xff] %v5066_v36  ;;  %vm8029_vm3 = vcmp.eq.f32.partialorder %v7973_v35, %v2922_v49 }
 0x24d   : > { %vm1880_vm1 = vmor %vm8010_vm6, %vm1240_vm11  ;;  %v2135_v42 = vsel %vm1879_vm14, 1, %v7597_v60  ;;  %vm8014_vm11 = vcmp.lt.s32.totalorder %v7933_v12, %v7555_v1  ;;  %vm8015_vm6 = vcmp.eq.f32.partialorder %v3870_v39, %v2932_v56  ;;  %v2247_v12 = vadd.s32 %v2246_v32, %v2001_v5  ;;  %v5120_v32 = vpop.permute.xlu1 %665 }
 0x24e   : > { %vm5018_vm10 = vmor %vm8011_vm9, %vm4804_vm12  ;;  %v2136_v46 = vsel %vm1880_vm1, 1, %v7597_v60  ;;  %v5023_v9 = vadd.s32 %v2397_v3, %v2135_v42  ;;  %vm8017_vm12 = vcmp.eq.f32.partialorder %v7966_v58, %v2922_v49  ;;  %vm8018_vm1 = vcmp.gt.f32.partialorder %v7966_v58, %v2922_v49 }
 0x24f   : > { %vm1685_vm14 = vmand %vm8015_vm6, %vm8014_vm11  ;;  %vm8021_vm6 = vcmp.lt.s32.totalorder %v7974_v4, %v7555_v1  ;;  %v8023_v42 = vmov 0  ;;  %v5059_v58 = vadd.s32 %v2434_v7, %v2136_v46  ;;  %v2284_v36 = vadd.s32 %v2283_v40, %v2002_v2  ;;  %v8040_v40 = vld [vmem:[#allocation28_spill] sm:$0xff] }
 0x250   : > { %vm5041_vm9 = vmor %vm8018_vm1, %vm8017_vm12  ;;  %vm8025_vm12 = vcmp.gt.f32.partialorder %v3870_v39, %v2932_v56  ;;  %v2248_v2 = vadd.s32 %v2247_v12, %v2003_v41 }
 0x251   : > { %vm5055_vm2 = vmand %vm8022_vm8, %vm8021_vm6  ;;  %vm8027_vm8 = vcmp.eq.f32.partialorder %v3870_v39, %v2934_v61  ;;  %vm8028_vm6 = vcmp.gt.f32.partialorder %v3870_v39, %v2934_v61  ;;  %v5185_v12 = vpop.permute.xlu1 %405  ;;  %v2285_v13 = vadd.s32 %v2284_v36, %v2004_v15  ;;  %v2006_v11 = vsel %vm5041_vm9, 1, %v7597_v60 }
 0x252   : > { %v8024_v42 = vsel %vm5055_vm2, 4294967295, %v8023_v42  ;;  %vm1941_vm1 = vmor %vm8025_vm12, %vm1685_vm14  ;;  %vm1048_vm14 = vcmp.gt.f32.partialorder %v3977_v57, %v2934_v61  ;;  %vm1304_vm12 = vcmp.eq.f32.partialorder %v3977_v57, %v2934_v61 }
 0x253   : > { %vm1942_vm11 = vmor %vm8028_vm6, %vm8027_vm8  ;;  %v2197_v3 = vsel %vm1941_vm1, 1, %v7597_v60  ;;  %vm8033_vm1 = vcmp.lt.s32.totalorder %v7948_v31, %v7555_v1  ;;  %vm1177_vm6 = vcmp.eq.f32.partialorder %v8035_v59, %v2924_v51 }
 0x254   : > { %vm5091_vm2 = vmor %vm8030_vm0, %vm8029_vm3  ;;  %v2198_v7 = vsel %vm1942_vm11, 1, %v7597_v60  ;;  %v2471_v46 = vadd.s32 %v4784_v8, %v2197_v3  ;;  %vm8036_vm0 = vcmp.gt.f32.partialorder %v7973_v35, %v2920_v48  ;;  %vm8039_vm3 = vcmp.gt.f32.partialorder %v3977_v57, %v2932_v56  ;;  %v5136_v35 = vpop.permute.xlu0 %535 }
 0x255   : > { %vm1687_vm8 = vmand %vm8034_vm5, %vm8033_vm1  ;;  %v2508_v8 = vadd.s32 %v4808_v17, %v2198_v7  ;;  %vm921_vm5 = vcmp.gt.f32.partialorder %v8035_v59, %v2924_v51  ;;  %v5266_v30 = vpop.permute.xlu1 %539 }
 0x256   : > { %vm5110_vm11 = vmor %vm8036_vm0, %vm4889_vm4  ;;  %vm1178_vm0 = vcmp.eq.f32.partialorder %v8035_v59, %v2926_v52 }
 0x257   : > { %vm1943_vm1 = vmor %vm8039_vm3, %vm1687_vm8  ;;  %vm922_vm8 = vcmp.gt.f32.partialorder %v8035_v59, %v2926_v52  ;;  %vm1179_vm3 = vcmp.eq.f32.partialorder %v4101_v34, %v2924_v51  ;;  %v2007_v39 = vsel %vm5110_vm11, 1, %v7597_v60 }
 0x258   : > { %vm1944_vm4 = vmor %vm1048_vm14, %vm1304_vm12  ;;  %v2199_v17 = vsel %vm1943_vm1, 1, %v7597_v60  ;;  %vm8041_vm14 = vcmp.lt.s32.totalorder %v7967_v43, %v7555_v1  ;;  %vm1180_vm1 = vcmp.eq.f32.partialorder %v4101_v34, %v2926_v52  ;;  %v5207_v36 = vpop.permute.xlu0 %669 }
 0x259   : > { %v2200_v57 = vsel %vm1944_vm4, 1, %v7597_v60  ;;  %v5144_v5 = vadd.s32 %v2471_v46, %v2199_v17  ;;  %vm1561_vm12 = vmand %vm1177_vm6, %vm8041_vm14  ;;  %vm8043_vm6 = vcmp.gt.f32.partialorder %v7993_v26, %v2920_v48  ;;  %v5307_v62 = vpop.permute.xlu1 %673 }
 0x25a   : > { %v5158_v3 = vadd.s32 %v2508_v8, %v2200_v57  ;;  %vm1817_vm4 = vmor %vm921_vm5, %vm1561_vm12  ;;  %vm924_vm12 = vcmp.gt.f32.partialorder %v4101_v34, %v2926_v52 }
 0x25b   : > { %vm5170_vm14 = vmor %vm8043_vm6, %vm4974_vm13  ;;  %v2073_v46 = vsel %vm1817_vm4, 1, %v7597_v60  ;;  %vm8046_vm13 = vcmp.eq.f32.partialorder %v7993_v26, %v2922_v49  ;;  %vm8047_vm6 = vcmp.gt.f32.partialorder %v7993_v26, %v2922_v49  ;;  %vm1241_vm4 = vcmp.eq.f32.partialorder %v4103_v63, %v2928_v53 }
 0x25c   : > { %vm1818_vm5 = vmor %vm922_vm8, %vm1178_vm0  ;;  %v2325_v41 = vadd.s32 %v4918_v27, %v2073_v46  ;;  %vm8050_vm8 = vcmp.lt.s32.totalorder %v7974_v4, %v7555_v1  ;;  %v2005_v26 = vsel %vm5018_vm10, 1, %v7597_v60  ;;  %vm986_vm10 = vcmp.gt.f32.partialorder %v4103_v63, %v2930_v54 }
 0x25d   : > { %vm5193_vm15 = vmor %vm8047_vm6, %vm8046_vm13  ;;  %v2074_v8 = vsel %vm1818_vm5, 1, %v7597_v60  ;;  %vm8052_vm13 = vcmp.gt.f32.partialorder %v8009_v0, %v2922_v49  ;;  %v5365_v7 = vpop.permute.xlu1 %413 }
 0x25e   : > { %vm1563_vm0 = vmand %vm1179_vm3, %vm8050_vm8  ;;  %v2362_v27 = vadd.s32 %v4940_v47, %v2074_v8  ;;  %vm8051_vm8 = vcmp.eq.f32.partialorder %v8009_v0, %v2922_v49  ;;  %v5275_v8 = vpop.permute.xlu0 %409 }
 0x25f   : > { %vm1819_vm6 = vmor %vm923_vm7, %vm1563_vm0  ;;  %vm1242_vm0 = vcmp.eq.f32.partialorder %v4103_v63, %v2930_v54 }
 0x260   : > { %vm5228_vm5 = vmor %vm8052_vm13, %vm8051_vm8  ;;  %v2075_v47 = vsel %vm1819_vm6, 1, %v7597_v60  ;;  %vm8055_vm13 = vnez %v8024_v42  ;;  %vm8056_vm8 = vcmp.gt.f32.partialorder %v8009_v0, %v2920_v48  ;;  %v2249_v0 = vadd.s32 %v2248_v2, %v2005_v26 }
 0x261   : > { %vm1820_vm7 = vmor %vm924_vm12, %vm1180_vm1  ;;  %v5256_v57 = vadd.s32 %v2325_v41, %v2075_v47  ;;  %vm8059_vm1 = vcmp.lt.s32.totalorder %v7967_v43, %v7555_v1  ;;  %vm1243_vm12 = vcmp.eq.f32.partialorder %v4197_v25, %v2928_v53  ;;  %v2286_v42 = vadd.s32 %v2285_v13, %v2006_v11 }
 0x262   : > { %vm5251_vm3 = vmor %vm8056_vm8, %vm8055_vm13  ;;  %v2076_v15 = vsel %vm1820_vm7, 1, %v7597_v60  ;;  %vm8060_vm6 = vcmp.gt.f32.partialorder %v4103_v63, %v2928_v53  ;;  %vm987_vm13 = vcmp.gt.f32.partialorder %v4197_v25, %v2928_v53  ;;  %v2008_v41 = vsel %vm5091_vm2, 1, %v7597_v60  ;;  %v8062_v63 = vld [vmem:[#allocation59_spill] sm:$0xff]  ;;  %v5334_v11 = vpop.permute.xlu0 %543 }
 0x263   : > { %vm1625_vm9 = vmand %vm1241_vm4, %vm8059_vm1  ;;  %v5268_v46 = vadd.s32 %v2362_v27, %v2076_v15  ;;  %vm988_vm8 = vcmp.gt.f32.partialorder %v4197_v25, %v2930_v54  ;;  %vm1244_vm1 = vcmp.eq.f32.partialorder %v4197_v25, %v2930_v54  ;;  %vm8061_vm2 = vcmp.lt.s32.totalorder %v7974_v4, %v7555_v1 }
 0x264   : > { %vm1881_vm7 = vmor %vm8060_vm6, %vm1625_vm9  ;;  %v2287_v47 = vadd.s32 %v2286_v42, %v2008_v41  ;;  %vm8063_vm6 = vcmp.lt.s32.totalorder %v8040_v40, %v7555_v1  ;;  %vm1050_vm11 = vcmp.gt.f32.partialorder %v8062_v63, %v2934_v61  ;;  %v2250_v15 = vadd.s32 %v2249_v0, %v2007_v39 }
 0x265   : > { %vm1882_vm4 = vmor %vm986_vm10, %vm1242_vm0  ;;  %v2137_v2 = vsel %vm1881_vm7, 1, %v7597_v60  ;;  %vm1305_vm0 = vcmp.eq.f32.partialorder %v8062_v63, %v2932_v56  ;;  %vm8064_vm7 = vcmp.eq.f32.partialorder %v8042_v10, %v2920_v48  ;;  %v2010_v0 = vsel %vm5193_vm15, 1, %v7597_v60 }
 0x266   : > { %v2138_v13 = vsel %vm1882_vm4, 1, %v7597_v60  ;;  %v2399_v27 = vadd.s32 %v5023_v9, %v2137_v2  ;;  %vm1627_vm10 = vmand %vm1243_vm12, %vm8061_vm2  ;;  %vm8067_vm12 = vcmp.eq.f32.partialorder %v8042_v10, %v2922_v49  ;;  %v2009_v2 = vsel %vm5170_vm14, 1, %v7597_v60  ;;  %v5374_v59 = vpop.permute.xlu0 %677 }
 0x267   : > { %v2436_v26 = vadd.s32 %v5059_v58, %v2138_v13  ;;  %vm1883_vm9 = vmor %vm987_vm13, %vm1627_vm10  ;;  %vm8068_vm13 = vcmp.gt.f32.partialorder %v8042_v10, %v2922_v49  ;;  %vm1308_vm14 = vcmp.eq.f32.partialorder %v4280_v16, %v2934_v61  ;;  %8074 = vst [vmem:[#allocation64_spill] sm:$0xff] %v5374_v59 }
 0x268   : > { %vm5315_vm4 = vmand %vm8064_vm7, %vm8063_vm6  ;;  %v2139_v58 = vsel %vm1883_vm9, 1, %v7597_v60  ;;  %vm1306_vm6 = vcmp.eq.f32.partialorder %v8062_v63, %v2934_v61  ;;  %vm8071_vm7 = vcmp.lt.s32.totalorder %v7967_v43, %v7555_v1  ;;  %vm8072_vm9 = vcmp.gt.f32.partialorder %v8062_v63, %v2932_v56  ;;  %v8100_v43 = vld [vmem:[#allocation34_spill] sm:$0xff] }
 0x269   : > { %vm5325_vm2 = vmor %vm8068_vm13, %vm8067_vm12  ;;  %v5337_v41 = vadd.s32 %v2399_v27, %v2139_v58  ;;  %vm1051_vm13 = vcmp.gt.f32.partialorder %v4280_v16, %v2932_v56  ;;  %v2288_v27 = vadd.s32 %v2287_v47, %v2010_v0  ;;  %v2012_v58 = vsel %vm5228_vm5, 1, %v7597_v60  ;;  %v8077_v0 = vld [vmem:[#allocation29_spill] sm:$0xff] }
 0x26a   : > { %vm1884_vm10 = vmor %vm988_vm8, %vm1244_vm1  ;;  %vm1307_vm1 = vcmp.eq.f32.partialorder %v4280_v16, %v2932_v56  ;;  %vm8075_vm5 = vcmp.lt.s32.totalorder %v8040_v40, %v7555_v1 }
 0x26b   : > { %v2140_v42 = vsel %vm1884_vm10, 1, %v7597_v60  ;;  %vm1689_vm8 = vmand %vm1305_vm0, %vm8071_vm7  ;;  %vm1052_vm10 = vcmp.gt.f32.partialorder %v4280_v16, %v2934_v61  ;;  %vm8073_vm7 = vcmp.lt.s32.totalorder %v7974_v4, %v7555_v1  ;;  %v2289_v34 = vadd.s32 %v2288_v27, %v2012_v58 }
 0x26c   : > { %v5350_v13 = vadd.s32 %v2436_v26, %v2140_v42  ;;  %vm1945_vm12 = vmor %vm8072_vm9, %vm1689_vm8  ;;  %vm925_vm8 = vcmp.gt.f32.partialorder %v4296_v18, %v2924_v51  ;;  %vm926_vm9 = vcmp.gt.f32.partialorder %v4296_v18, %v2926_v52  ;;  %v2014_v27 = vsel %vm5325_vm2, 1, %v7597_v60 }
 0x26d   : > { %vm1946_vm0 = vmor %vm1050_vm11, %vm1306_vm6  ;;  %v2201_v39 = vsel %vm1945_vm12, 1, %v7597_v60  ;;  %vm1181_vm11 = vcmp.eq.f32.partialorder %v4296_v18, %v2924_v51  ;;  %vm1182_vm12 = vcmp.eq.f32.partialorder %v4296_v18, %v2926_v52  ;;  %v8076_v18 = vld [vmem:[#allocation11_spill] sm:$0xff]  ;;  %vm1246_vm2 = vcmp.eq.f32.partialorder %v4376_v38, %v2930_v54 }
 0x26e   : > { %v2202_v63 = vsel %vm1946_vm0, 1, %v7597_v60  ;;  %v2473_v26 = vadd.s32 %v5144_v5, %v2201_v39  ;;  %vm1691_vm15 = vmand %vm1307_vm1, %vm8073_vm7  ;;  %v2251_v5 = vadd.s32 %v2250_v15, %v2009_v2  ;;  %v5399_v15 = vpop.permute.xlu1 %547  ;;  %vm861_vm0 = vcmp.gt.f32.partialorder %v8042_v10, %v2920_v48  ;;  %v5407_v39 = vpop.permute.xlu0 %417 }
 0x26f   : > { %v2510_v42 = vadd.s32 %v5158_v3, %v2202_v63  ;;  %vm1947_vm6 = vmor %vm1051_vm13, %vm1691_vm15  ;;  %v2011_v3 = vsel %vm5251_vm3, 1, %v7597_v60  ;;  %vm863_vm7 = vcmp.gt.f32.partialorder %v4365_v22, %v2920_v48  ;;  %vm1120_vm15 = vcmp.eq.f32.partialorder %v4365_v22, %v2922_v49 }
 0x270   : > { %vm1948_vm1 = vmor %vm1052_vm10, %vm1308_vm14  ;;  %v2203_v47 = vsel %vm1947_vm6, 1, %v7597_v60  ;;  %vm7444_vm14 = vcmp.lt.s32.totalorder %v8077_v0, %v8076_v18  ;;  %v2015_v9 = vsel %vm863_vm7, 1, %v7597_v60  ;;  %vm1124_vm7 = vcmp.eq.f32.partialorder %v4409_v20, %v2922_v49 }
 0x271   : > { %v2204_v16 = vsel %vm1948_vm1, 1, %v7597_v60  ;;  %v5394_v17 = vadd.s32 %v2473_v26, %v2203_v47  ;;  %vm1565_vm13 = vmand %vm1181_vm11, %vm8075_vm5  ;;  %v2252_v26 = vadd.s32 %v2251_v5, %v2011_v3  ;;  %vm1245_vm11 = vcmp.eq.f32.partialorder %v4376_v38, %v2928_v53  ;;  %v8080_v3 = vld [vmem:[#allocation31_spill] sm:$0xff] }
 0x272   : > { %v5403_v2 = vadd.s32 %v2510_v42, %v2204_v16  ;;  %vm1821_vm10 = vmor %vm925_vm8, %vm1565_vm13  ;;  %vm989_vm8 = vcmp.gt.f32.partialorder %v4376_v38, %v2928_v53  ;;  %vm865_vm1 = vcmp.gt.f32.partialorder %v4500_v6, %v2920_v48  ;;  %v2290_v5 = vadd.s32 %v2289_v34, %v2014_v27  ;;  %v5453_v47 = vpop.permute.xlu1 %681  ;;  %v5465_v34 = vpop.permute.xlu0 %551  ;;  %v8083_v27 = vld [vmem:[#allocation33_spill] sm:$0xff] }
 0x273   : > { %vm1822_vm3 = vmor %vm926_vm9, %vm1182_vm12  ;;  %v2077_v63 = vsel %vm1821_vm10, 1, %v7597_v60  ;;  %vm864_vm12 = vcmp.gt.f32.partialorder %v4365_v22, %v2922_v49  ;;  %vm7443_vm10 = vcmp.lt.s32.totalorder %v8080_v3, %v8076_v18  ;;  %v2017_v16 = vsel %vm865_vm1, 1, %v7597_v60 }
 0x274   : > { %v2078_v10 = vsel %vm1822_vm3, 1, %v7597_v60  ;;  %v5418_v42 = vadd.s32 %v5256_v57, %v2077_v63  ;;  %vm1757_vm6 = vmor %vm861_vm0, %vm5315_vm4  ;;  %vm990_vm4 = vcmp.gt.f32.partialorder %v4376_v38, %v2930_v54  ;;  %vm867_vm3 = vcmp.gt.f32.partialorder %v4409_v20, %v2920_v48 }
 0x275   : > { %v5430_v58 = vadd.s32 %v5268_v46, %v2078_v10  ;;  %vm5435_vm9 = vmand %vm1120_vm15, %vm7444_vm14  ;;  %v2013_v25 = vsel %vm1757_vm6, 1, %v7597_v60  ;;  %vm869_vm6 = vcmp.gt.f32.partialorder %v4582_v33, %v2920_v48  ;;  %vm1053_vm1 = vcmp.gt.f32.partialorder %v4442_v44, %v2932_v56 }
 0x276   : > { %v2253_v46 = vadd.s32 %v2252_v26, %v2013_v25  ;;  %vm1629_vm13 = vmand %vm1245_vm11, %vm8075_vm5  ;;  %vm1309_vm11 = vcmp.eq.f32.partialorder %v4442_v44, %v2932_v56  ;;  %vm868_vm5 = vcmp.gt.f32.partialorder %v4409_v20, %v2922_v49  ;;  %vm1128_vm14 = vcmp.eq.f32.partialorder %v4487_v50, %v2922_v49 }
 0x277   : > { %vm1885_vm0 = vmor %vm989_vm8, %vm1629_vm13  ;;  %vm8087_vm13 = vcmp.lt.s32.totalorder %v8040_v40, %v7555_v1 }
 0x278   : > { %v2254_v38 = vadd.s32 %v2253_v46, %v2015_v9  ;;  %vm1886_vm15 = vmor %vm990_vm4, %vm1246_vm2  ;;  %v2141_v63 = vsel %vm1885_vm0, 1, %v7597_v60  ;;  %vm7450_vm4 = vcmp.lt.s32.totalorder %v8083_v27, %v8076_v18  ;;  %v8088_v46 = vld [vmem:[#allocation30_spill] sm:$0xff] }
 0x279   : > { %vm5477_vm8 = vmor %vm864_vm12, %vm5435_vm9  ;;  %v2142_v10 = vsel %vm1886_vm15, 1, %v7597_v60  ;;  %v5487_v25 = vadd.s32 %v5337_v41, %v2141_v63  ;;  %vm1054_vm9 = vcmp.gt.f32.partialorder %v4442_v44, %v2934_v61  ;;  %vm1310_vm12 = vcmp.eq.f32.partialorder %v4442_v44, %v2934_v61  ;;  %v8101_v44 = vld [vmem:[#allocation39_spill] sm:$0xff] }
 0x27a   : > { %vm5492_vm2 = vmand %vm1124_vm7, %vm7443_vm10  ;;  %v2255_v57 = vadd.s32 %v2254_v38, %v2017_v16  ;;  %v5501_v9 = vadd.s32 %v5350_v13, %v2142_v10  ;;  %v2019_v41 = vsel %vm867_vm3, 1, %v7597_v60  ;;  %vm762_vm7 = vcmp.lt.s32.totalorder %v8088_v46, %v8076_v18  ;;  %v5521_v38 = vpop.permute.xlu1 %421  ;;  %v8089_v10 = vld [vmem:[#allocation35_spill] sm:$0xff] }
 0x27b   : > { %vm1693_vm0 = vmand %vm1309_vm11, %vm8087_vm13  ;;  %v2021_v16 = vsel %vm869_vm6, 1, %v7597_v60  ;;  %vm871_vm10 = vcmp.gt.f32.partialorder %v4487_v50, %v2920_v48  ;;  %vm873_vm3 = vcmp.gt.f32.partialorder %v4671_v29, %v2920_v48  ;;  %vm866_vm6 = vcmp.gt.f32.partialorder %v4500_v6, %v2922_v49 }
 0x27c   : > { %8086 = vst [vmem:[#allocation62_spill] sm:$0xff] %v5501_v9  ;;  %vm1949_vm15 = vmor %vm1053_vm1, %vm1693_vm0  ;;  %v2256_v13 = vadd.s32 %v2255_v57, %v2019_v41  ;;  %vm1122_vm1 = vcmp.eq.f32.partialorder %v4500_v6, %v2922_v49  ;;  %vm7449_vm13 = vcmp.lt.s32.totalorder %v8089_v10, %v8076_v18  ;;  %v5533_v57 = vpop.permute.xlu0 %685  ;;  %v2016_v41 = vsel %vm5477_vm8, 1, %v7597_v60 }
 0x27d   : > { %vm1950_vm11 = vmor %vm1054_vm9, %vm1310_vm12  ;;  %v2205_v63 = vsel %vm1949_vm15, 1, %v7597_v60  ;;  %8090 = vst [vmem:[#allocation60_spill] sm:$0xff] %v5533_v57  ;;  %vm872_vm12 = vcmp.gt.f32.partialorder %v4487_v50, %v2922_v49  ;;  %v2023_v20 = vsel %vm871_vm10, 1, %v7597_v60  ;;  %vm877_vm10 = vcmp.gt.f32.partialorder %v4743_v21, %v2920_v48 }
 0x27e   : > { %vm5543_vm9 = vmor %vm868_vm5, %vm5492_vm2  ;;  %v2206_v4 = vsel %vm1950_vm11, 1, %v7597_v60  ;;  %v2257_v31 = vadd.s32 %v2256_v13, %v2021_v16  ;;  %v5549_v40 = vadd.s32 %v5394_v17, %v2205_v63  ;;  %v2025_v17 = vsel %vm873_vm3, 1, %v7597_v60  ;;  %v5600_v13 = vpop.permute.xlu1 %555 }
 0x27f   : > { %vm1512_vm8 = vmand %vm1128_vm14, %vm7450_vm4  ;;  %v5568_v26 = vadd.s32 %v5403_v2, %v2206_v4  ;;  %vm875_vm14 = vcmp.gt.f32.partialorder %v4569_v28, %v2920_v48  ;;  %vm1132_vm5 = vcmp.eq.f32.partialorder %v4569_v28, %v2922_v49  ;;  %v2291_v16 = vadd.s32 %v2290_v5, %v2016_v41  ;;  %v8094_v4 = vld [vmem:[#allocation32_spill] sm:$0xff]  ;;  %v8095_v2 = vld [vmem:[#allocation37_spill] sm:$0xff] }
 0x280   : > { %vm1506_vm2 = vmand %vm1122_vm1, %vm762_vm7  ;;  %v2258_v22 = vadd.s32 %v2257_v31, %v2023_v20  ;;  %vm7451_vm15 = vcmp.lt.s32.totalorder %v8094_v4, %v8076_v18  ;;  %vm1126_vm3 = vcmp.eq.f32.partialorder %v4582_v33, %v2922_v49  ;;  %vm7454_vm11 = vcmp.lt.s32.totalorder %v8095_v2, %v8076_v18  ;;  %v8107_v31 = vld [vmem:[#allocation41_spill] sm:$0xff] }
 0x281   : > { %8093 = vst [vmem:[#allocation65_spill] sm:$0xff] %v5568_v26  ;;  %vm1762_vm0 = vmor %vm866_vm6, %vm1506_vm2  ;;  %vm876_vm6 = vcmp.gt.f32.partialorder %v4569_v28, %v2922_v49  ;;  %vm870_vm2 = vcmp.gt.f32.partialorder %v4582_v33, %v2922_v49  ;;  %v2027_v41 = vsel %vm875_vm14, 1, %v7597_v60  ;;  %v2029_v20 = vsel %vm877_vm10, 1, %v7597_v60 }
 0x282   : > { %vm5591_vm1 = vmor %vm872_vm12, %vm1512_vm8  ;;  %v2018_v5 = vsel %vm1762_vm0, 1, %v7597_v60  ;;  %v2259_v6 = vadd.s32 %v2258_v22, %v2025_v17  ;;  %vm879_vm8 = vcmp.gt.f32.partialorder %v4644_v55, %v2920_v48  ;;  %v5622_v17 = vpop.permute.xlu0 %425  ;;  %v2020_v22 = vsel %vm5543_vm9, 1, %v7597_v60 }
 0x283   : > { %v2292_v63 = vadd.s32 %v2291_v16, %v2018_v5  ;;  %vm5608_vm12 = vmand %vm1132_vm5, %vm7449_vm13  ;;  %vm1136_vm5 = vcmp.eq.f32.partialorder %v4644_v55, %v2922_v49  ;;  %vm881_vm10 = vcmp.gt.f32.partialorder %v4815_v37, %v2920_v48  ;;  %vm7456_vm13 = vcmp.lt.s32.totalorder %v8100_v43, %v8076_v18 }
 0x284   : > { %vm1510_vm14 = vmand %vm1126_vm3, %vm7451_vm15  ;;  %v2260_v16 = vadd.s32 %v2259_v6, %v2027_v41  ;;  %vm1130_vm9 = vcmp.eq.f32.partialorder %v4671_v29, %v2922_v49  ;;  %vm7455_vm4 = vcmp.lt.s32.totalorder %v8101_v44, %v8076_v18  ;;  %v2031_v28 = vsel %vm879_vm8, 1, %v7597_v60 }
 0x285   : > { %vm1766_vm0 = vmor %vm870_vm2, %vm1510_vm14  ;;  %v2293_v5 = vadd.s32 %v2292_v63, %v2020_v22  ;;  %vm880_vm2 = vcmp.gt.f32.partialorder %v4644_v55, %v2922_v49  ;;  %vm874_vm14 = vcmp.gt.f32.partialorder %v4671_v29, %v2922_v49  ;;  %v2033_v22 = vsel %vm881_vm10, 1, %v7597_v60 }
 0x286   : > { %vm5648_vm3 = vmor %vm876_vm6, %vm5608_vm12  ;;  %v2022_v6 = vsel %vm1766_vm0, 1, %v7597_v60  ;;  %v2261_v63 = vadd.s32 %v2260_v16, %v2029_v20  ;;  %vm883_vm6 = vcmp.gt.f32.partialorder %v4719_v45, %v2920_v48  ;;  %v2024_v29 = vsel %vm5591_vm1, 1, %v7597_v60  ;;  %v5681_v16 = vpop.permute.xlu1 %689  ;;  %v5689_v1 = vpop.permute.xlu0 %559 }
 0x287   : > { %v2294_v41 = vadd.s32 %v2293_v5, %v2022_v6  ;;  %vm5660_vm15 = vmand %vm1136_vm5, %vm7454_vm11  ;;  %vm1140_vm5 = vcmp.eq.f32.partialorder %v4719_v45, %v2922_v49  ;;  %vm885_vm8 = vcmp.gt.f32.partialorder %v4904_v24, %v2920_v48  ;;  %v8106_v6 = vld [vmem:[#allocation36_spill] sm:$0xff]  ;;  %vm1134_vm1 = vcmp.eq.f32.partialorder %v4743_v21, %v2922_v49 }
 0x288   : > { %vm1514_vm12 = vmand %vm1130_vm9, %vm7456_vm13  ;;  %v2262_v20 = vadd.s32 %v2261_v63, %v2031_v28  ;;  %vm7475_vm10 = vcmp.lt.s32.totalorder %v8106_v6, %v8076_v18  ;;  %vm7466_vm9 = vcmp.lt.s32.totalorder %v8107_v31, %v8076_v18  ;;  %v2035_v55 = vsel %vm883_vm6, 1, %v7597_v60 }
 0x289   : > { %vm1770_vm0 = vmor %vm874_vm14, %vm1514_vm12  ;;  %v2295_v5 = vadd.s32 %v2294_v41, %v2024_v29  ;;  %vm884_vm14 = vcmp.gt.f32.partialorder %v4719_v45, %v2922_v49  ;;  %vm878_vm12 = vcmp.gt.f32.partialorder %v4743_v21, %v2922_v49  ;;  %v2037_v21 = vsel %vm885_vm8, 1, %v7597_v60 }
 0x28a   : > { %vm5696_vm11 = vmor %vm880_vm2, %vm5660_vm15  ;;  %v2026_v41 = vsel %vm1770_vm0, 1, %v7597_v60  ;;  %v2263_v28 = vadd.s32 %v2262_v20, %v2033_v22  ;;  %vm887_vm2 = vcmp.gt.f32.partialorder %v4794_v23, %v2920_v48  ;;  %v2028_v50 = vsel %vm5648_vm3, 1, %v7597_v60  ;;  %v5759_v2 = vpop.permute.xlu0 %693 }
 0x28b   : > { %v2296_v29 = vadd.s32 %v2295_v5, %v2026_v41  ;;  %vm1524_vm15 = vmand %vm1140_vm5, %vm7455_vm4  ;;  %vm1144_vm0 = vcmp.eq.f32.partialorder %v4794_v23, %v2922_v49  ;;  %vm889_vm6 = vcmp.gt.f32.partialorder %v4988_v14, %v2920_v48  ;;  %v8110_v5 = vld [vmem:[#allocation38_spill] sm:$0xff]  ;;  %vm1138_vm13 = vcmp.eq.f32.partialorder %v4815_v37, %v2922_v49 }
 0x28c   : > { %vm1518_vm5 = vmand %vm1134_vm1, %vm7475_vm10  ;;  %v2264_v22 = vadd.s32 %v2263_v28, %v2035_v55  ;;  %vm7474_vm8 = vcmp.lt.s32.totalorder %v8110_v5, %v8076_v18  ;;  %vm882_vm1 = vcmp.gt.f32.partialorder %v4815_v37, %v2922_v49  ;;  %v2039_v45 = vsel %vm887_vm2, 1, %v7597_v60 }
 0x28d   : > { %vm1774_vm4 = vmor %vm878_vm12, %vm1518_vm5  ;;  %v2297_v20 = vadd.s32 %v2296_v29, %v2028_v50  ;;  %v5745_v29 = vpop.permute.xlu1 %429  ;;  %v2041_v44 = vsel %vm889_vm6, 1, %v7597_v60  ;;  %v2032_v37 = vsel %vm5696_vm11, 1, %v7597_v60  ;;  %vm1142_vm5 = vcmp.eq.f32.partialorder %v4904_v24, %v2922_v49 }
 0x28e   : > { %vm5738_vm3 = vmor %vm884_vm14, %vm1524_vm15  ;;  %v2030_v41 = vsel %vm1774_vm4, 1, %v7597_v60  ;;  %v2265_v28 = vadd.s32 %v2264_v22, %v2037_v21  ;;  %vm888_vm4 = vcmp.gt.f32.partialorder %v4794_v23, %v2922_v49  ;;  %vm886_vm11 = vcmp.gt.f32.partialorder %v4904_v24, %v2922_v49  ;;  %v5790_v24 = vpop.permute.xlu0 %433 }
 0x28f   : > { %v2298_v55 = vadd.s32 %v2297_v20, %v2030_v41  ;;  %vm5750_vm12 = vmand %vm1144_vm0, %vm7466_vm9  ;;  %v8115_v20 = vld [vmem:[#allocation40_spill] sm:$0xff]  ;;  %vm997_vm10 = vcmp.gt.f32.partialorder %v5334_v11, %v2928_v53 }
 0x290   : > { %vm1522_vm14 = vmand %vm1138_vm13, %vm7474_vm8  ;;  %v2266_v21 = vadd.s32 %v2265_v28, %v2039_v45  ;;  %vm7472_vm2 = vcmp.lt.s32.totalorder %v8115_v20, %v8076_v18  ;;  %v2036_v28 = vsel %vm5738_vm3, 1, %v7597_v60  ;;  %vm890_vm3 = vcmp.gt.f32.partialorder %v4988_v14, %v2922_v49 }
 0x291   : > { %vm1778_vm15 = vmor %vm882_vm1, %vm1522_vm14  ;;  %v2299_v22 = vadd.s32 %v2298_v55, %v2032_v37  ;;  %v5784_v55 = vpop.permute.xlu1 %563  ;;  %v8116_v37 = vld [vmem:[#allocation42_spill] sm:$0xff]  ;;  %vm1146_vm14 = vcmp.eq.f32.partialorder %v4988_v14, %v2922_v49  ;;  %vm1059_vm8 = vcmp.gt.f32.partialorder %v5307_v62, %v2932_v56 }
 0x292   : > { %v2034_v41 = vsel %vm1778_vm15, 1, %v7597_v60  ;;  %v2267_v63 = vadd.s32 %v2266_v21, %v2041_v44  ;;  %vm1784_vm0 = vmor %vm888_vm4, %vm5750_vm12  ;;  %vm7463_vm1 = vcmp.lt.s32.totalorder %v8116_v37, %v8076_v18 }
 0x293   : > { %v2300_v23 = vadd.s32 %v2299_v22, %v2034_v41  ;;  %vm1526_vm13 = vmand %vm1142_vm5, %vm7472_vm2  ;;  %v2040_v50 = vsel %vm1784_vm0, 1, %v7597_v60  ;;  %vm1148_vm5 = vcmp.eq.f32.partialorder %v4879_v19, %v2922_v49  ;;  %vm891_vm0 = vcmp.gt.f32.partialorder %v4879_v19, %v2920_v48 }
 0x294   : > { %vm1782_vm6 = vmor %vm886_vm11, %vm1526_vm13  ;;  %v2043_v26 = vsel %vm891_vm0, 1, %v7597_v60  ;;  %vm933_vm2 = vcmp.gt.f32.partialorder %v5275_v8, %v2924_v51 }
 0x295   : > { %v2301_v45 = vadd.s32 %v2300_v23, %v2036_v28  ;;  %v2038_v44 = vsel %vm1782_vm6, 1, %v7597_v60  ;;  %vm1530_vm12 = vmand %vm1146_vm14, %vm7463_vm1  ;;  %v5800_v41 = vpop.permute.xlu1 %697  ;;  %v5802_v28 = vpop.permute.xlu0 %567  ;;  %vm892_vm14 = vcmp.gt.f32.partialorder %v4879_v19, %v2922_v49  ;;  %vm931_vm1 = vcmp.gt.f32.partialorder %v5185_v12, %v2924_v51 }
 0x296   : > { %vm1786_vm4 = vmor %vm890_vm3, %vm1530_vm12  ;;  %vm1055_vm12 = vcmp.gt.f32.partialorder %v5120_v32, %v2932_v56  ;;  %v5858_v9 = vadd.s32 %v2267_v63, %v2043_v26 }
 0x297   : > { %v2302_v33 = vadd.s32 %v2301_v45, %v2038_v44  ;;  %v2042_v22 = vsel %vm1786_vm4, 1, %v7597_v60  ;;  %vm993_vm4 = vcmp.gt.f32.partialorder %v5136_v35, %v2928_v53 }
 0x298   : > { %8124 = vst [vmem:[#allocation66_spill] sm:$0xff] %v5858_v9  ;;  %v2085_v9 = vsel %vm933_vm2, 1, %v7597_v60  ;;  %vm941_vm2 = vcmp.gt.f32.partialorder %v5622_v17, %v2924_v51 }
 0x299   : > { %v2303_v21 = vadd.s32 %v2302_v33, %v2040_v50  ;;  %v5804_v31 = vpop.permute.xlu1 %437  ;;  %v5806_v20 = vpop.permute.xlu0 %701  ;;  %v8118_v33 = vld [vmem:[#allocation43_spill] sm:$0xff]  ;;  %v8119_v50 = vld [vmem:[#allocation50_spill] sm:$0xff] }
 0x29a   : > { %8117 = vst [vmem:[#allocation52_spill] sm:$0xff] %v5804_v31  ;;  %vm7471_vm15 = vcmp.lt.s32.totalorder %v8118_v33, %v8076_v18  ;;  %vm927_vm11 = vcmp.gt.f32.partialorder %v8119_v50, %v2924_v51  ;;  %vm1184_vm9 = vcmp.eq.f32.partialorder %v8119_v50, %v2926_v52  ;;  %vm928_vm0 = vcmp.gt.f32.partialorder %v8119_v50, %v2926_v52 }
 0x29b   : > { %v2304_v23 = vadd.s32 %v2303_v21, %v2042_v22  ;;  %v8120_v21 = vld [vmem:[#allocation63_spill] sm:$0xff]  ;;  %vm1532_vm3 = vmand %vm1148_vm5, %vm7471_vm15  ;;  %v2079_v5 = vsel %vm927_vm11, 1, %v7597_v60 }
 0x29c   : > { %vm991_vm13 = vcmp.gt.f32.partialorder %v8120_v21, %v2928_v53  ;;  %v8121_v22 = vld [vmem:[#allocation51_spill] sm:$0xff]  ;;  %vm1248_vm5 = vcmp.eq.f32.partialorder %v8120_v21, %v2930_v54  ;;  %vm1788_vm11 = vmor %vm892_vm14, %vm1532_vm3  ;;  %v2328_v6 = vadd.s32 %v5418_v42, %v2079_v5  ;;  %v2145_v42 = vsel %vm993_vm4, 1, %v7597_v60 }
 0x29d   : > { %v5808_v14 = vpop.permute.xlu1 %571  ;;  %v5810_v45 = vpop.permute.xlu0 %441  ;;  %vm929_vm6 = vcmp.gt.f32.partialorder %v8121_v22, %v2924_v51  ;;  %v2143_v19 = vsel %vm991_vm13, 1, %v7597_v60  ;;  %vm1186_vm15 = vcmp.eq.f32.partialorder %v8121_v22, %v2926_v52  ;;  %vm1312_vm13 = vcmp.eq.f32.partialorder %v5120_v32, %v2934_v61 }
 0x29e   : > { %v2081_v49 = vsel %vm929_vm6, 1, %v7597_v60  ;;  %v2083_v5 = vsel %vm931_vm1, 1, %v7597_v60  ;;  %vm1057_vm14 = vcmp.gt.f32.partialorder %v5207_v36, %v2932_v56  ;;  %vm995_vm3 = vcmp.gt.f32.partialorder %v5266_v30, %v2928_v53 }
 0x29f   : > { %v2329_v26 = vadd.s32 %v2328_v6, %v2081_v49  ;;  %v2044_v63 = vsel %vm1788_vm11, 1, %v7597_v60  ;;  %vm930_vm4 = vcmp.gt.f32.partialorder %v8121_v22, %v2926_v52  ;;  %v2402_v49 = vadd.s32 %v5487_v25, %v2143_v19 }
 0x2a0   : > { %vm937_vm1 = vcmp.gt.f32.partialorder %v5407_v39, %v2924_v51  ;;  %v5901_v10 = vadd.s32 %v2304_v23, %v2044_v63  ;;  %v2209_v25 = vsel %vm1057_vm14, 1, %v7597_v60  ;;  %v2147_v19 = vsel %vm995_vm3, 1, %v7597_v60 }
 0x2a1   : > { %v5812_v44 = vpop.permute.xlu1 %705  ;;  %v5814_v37 = vpop.permute.xlu0 %575  ;;  %v2330_v6 = vadd.s32 %v2329_v26, %v2083_v5  ;;  %vm999_vm11 = vcmp.gt.f32.partialorder %v5399_v15, %v2928_v53  ;;  %v2403_v26 = vadd.s32 %v2402_v49, %v2145_v42  ;;  %vm939_vm14 = vcmp.gt.f32.partialorder %v5521_v38, %v2924_v51 }
 0x2a2   : > { %8126 = vst [vmem:[#allocation67_spill] sm:$0xff] %v5901_v10  ;;  %v2211_v10 = vsel %vm1059_vm8, 1, %v7597_v60  ;;  %v2149_v42 = vsel %vm997_vm10, 1, %v7597_v60  ;;  %vm8128_vm8 = vcmp.lt.s32.totalorder %v8077_v0, %v8076_v18  ;;  %vm1003_vm6 = vcmp.gt.f32.partialorder %v5600_v13, %v2928_v53 }
 0x2a3   : > { %v2331_v63 = vadd.s32 %v2330_v6, %v2085_v9  ;;  %v2089_v9 = vsel %vm937_vm1, 1, %v7597_v60  ;;  %vm5948_vm3 = vmand %vm1184_vm9, %vm8128_vm8  ;;  %v2151_v6 = vsel %vm999_vm11, 1, %v7597_v60  ;;  %vm1001_vm1 = vcmp.gt.f32.partialorder %v5465_v34, %v2928_v53 }
 0x2a4   : > { %vm1063_vm8 = vcmp.gt.f32.partialorder %v5453_v47, %v2932_v56  ;;  %vm8131_vm11 = vcmp.lt.s32.totalorder %v8077_v0, %v8076_v18  ;;  %v2153_v50 = vsel %vm1001_vm1, 1, %v7597_v60  ;;  %vm8163_vm9 = vcmp.eq.f32.partialorder %v5266_v30, %v2930_v54 }
 0x2a5   : > { %v5841_v48 = vpop.permute.xlu1 %445  ;;  %v5849_v33 = vpop.permute.xlu0 %709  ;;  %vm5978_vm10 = vmand %vm1248_vm5, %vm8131_vm11 }
 0x2a6   : > { %8122 = vst [vmem:[#allocation61_spill] sm:$0xff] %v5841_v48  ;;  %8123 = vst [vmem:[#allocation45_spill] sm:$0xff] %v5849_v33  ;;  %v2207_v33 = vsel %vm1055_vm12, 1, %v7597_v60  ;;  %vm935_vm12 = vcmp.gt.f32.partialorder %v5365_v7, %v2924_v51 }
 0x2a7   : > { %v2087_v5 = vsel %vm935_vm12, 1, %v7597_v60  ;;  %vm1061_vm12 = vcmp.gt.f32.partialorder %v5374_v59, %v2932_v56  ;;  %vm5999_vm5 = vmor %vm928_vm0, %vm5948_vm3  ;;  %vm1065_vm3 = vcmp.gt.f32.partialorder %v5533_v57, %v2932_v56  ;;  %vm8155_vm0 = vcmp.eq.f32.partialorder %v5185_v12, %v2926_v52 }
 0x2a8   : > { %v2332_v49 = vadd.s32 %v2331_v63, %v2087_v5  ;;  %v2213_v5 = vsel %vm1061_vm12, 1, %v7597_v60  ;;  %vm6009_vm12 = vmand %vm1186_vm15, %vm762_vm7 }
 0x2a9   : > { %v5899_v48 = vpop.permute.xlu1 %579  ;;  %v5919_v23 = vpop.permute.xlu0 %449  ;;  %vm8140_vm15 = vmmov %vm8131_vm11 }
 0x2aa   : > { %8125 = vst [vmem:[#allocation53_spill] sm:$0xff] %v5899_v48  ;;  %8127 = vst [vmem:[#allocation68_spill] sm:$0xff] %v5919_v23  ;;  %v2476_v48 = vadd.s32 %v5549_v40, %v2207_v33  ;;  %v2404_v33 = vadd.s32 %v2403_v26, %v2147_v19  ;;  %v2091_v19 = vsel %vm939_vm14, 1, %v7597_v60  ;;  %v2333_v26 = vadd.s32 %v2332_v49, %v2089_v9 }
 0x2ab   : > { %vm6031_vm11 = vmand %vm1312_vm13, %vm8140_vm15  ;;  %v2215_v49 = vsel %vm1063_vm8, 1, %v7597_v60  ;;  %vm8143_vm13 = vcmp.gt.f32.partialorder %v8120_v21, %v2930_v54  ;;  %v8232_v21 = vld [vmem:[#allocation35_spill] sm:$0xff] }
 0x2ac   : > { %v2477_v23 = vadd.s32 %v2476_v48, %v2209_v25  ;;  %v2405_v25 = vadd.s32 %v2404_v33, %v2149_v42  ;;  %v2334_v0 = vadd.s32 %v2333_v26, %v2091_v19  ;;  %vm6052_vm15 = vmor %vm8143_vm13, %vm5978_vm10  ;;  %v2155_v19 = vsel %vm1003_vm6, 1, %v7597_v60 }
 0x2ad   : > { %v5992_v63 = vpop.permute.xlu1 %713  ;;  %v6023_v40 = vpop.permute.xlu0 %583  ;;  %vm1005_vm10 = vcmp.gt.f32.partialorder %v5689_v1, %v2928_v53  ;;  %vm6073_vm13 = vmor %vm930_vm4, %vm6009_vm12  ;;  %vm8148_vm6 = vcmp.eq.f32.partialorder %v5136_v35, %v2930_v54  ;;  %vm943_vm12 = vcmp.gt.f32.partialorder %v5745_v29, %v2924_v51  ;;  %vm8154_vm4 = vcmp.lt.s32.totalorder %v8080_v3, %v8076_v18 }
 0x2ae   : > { %8134 = vst [vmem:[#allocation54_spill] sm:$0xff] %v5992_v63  ;;  %v2478_v33 = vadd.s32 %v2477_v23, %v2211_v10  ;;  %8139 = vst [vmem:[#allocation55_spill] sm:$0xff] %v6023_v40  ;;  %v2406_v23 = vadd.s32 %v2405_v25, %v2151_v6  ;;  %v2093_v63 = vsel %vm941_vm2, 1, %v7597_v60  ;;  %vm1067_vm2 = vcmp.gt.f32.partialorder %v5681_v16, %v2932_v56 }
 0x2af   : > { %vm6083_vm8 = vmand %vm8148_vm6, %vm762_vm7  ;;  %vm8151_vm6 = vcmp.gt.f32.partialorder %v5120_v32, %v2934_v61  ;;  %v2157_v10 = vsel %vm1005_vm10, 1, %v7597_v60 }
 0x2b0   : > { %v2479_v25 = vadd.s32 %v2478_v33, %v2213_v5  ;;  %v2407_v22 = vadd.s32 %v2406_v23, %v2153_v50  ;;  %v2217_v5 = vsel %vm1065_vm3, 1, %v7597_v60  ;;  %vm6104_vm1 = vmor %vm8151_vm6, %vm6031_vm11  ;;  %v2335_v50 = vadd.s32 %v2334_v0, %v2093_v63 }
 0x2b1   : > { %vm6114_vm14 = vmand %vm8155_vm0, %vm8154_vm4  ;;  %vm1069_vm11 = vcmp.gt.f32.partialorder %v5759_v2, %v2932_v56  ;;  %vm8158_vm0 = vcmp.eq.f32.partialorder %v5207_v36, %v2934_v61  ;;  %v2219_v63 = vsel %vm1067_vm2, 1, %v7597_v60  ;;  %v6148_v23 = vpop.permute.xlu1 %453  ;;  %vm8176_vm6 = vcmp.eq.f32.partialorder %v5307_v62, %v2934_v61 }
 0x2b2   : > { %v2480_v33 = vadd.s32 %v2479_v25, %v2215_v49  ;;  %vm6130_vm4 = vmand %vm8158_vm0, %vm762_vm7  ;;  %v2408_v0 = vadd.s32 %v2407_v22, %v2155_v19  ;;  %8161 = vst [vmem:[#allocation69_spill] sm:$0xff] %v6148_v23  ;;  %vm8162_vm0 = vcmp.lt.s32.totalorder %v8080_v3, %v8076_v18  ;;  %v2095_v19 = vsel %vm943_vm12, 1, %v7597_v60  ;;  %v6170_v22 = vpop.permute.xlu0 %717 }
 0x2b3   : > { %vm6156_vm3 = vmand %vm8163_vm9, %vm8162_vm0  ;;  %8166 = vst [vmem:[#allocation56_spill] sm:$0xff] %v6170_v22  ;;  %vm8167_vm9 = vcmp.lt.s32.totalorder %v8094_v4, %v8076_v18  ;;  %vm8168_vm0 = vcmp.eq.f32.partialorder %v5275_v8, %v2926_v52  ;;  %vm8172_vm7 = vcmp.gt.f32.partialorder %v5136_v35, %v2930_v54  ;;  %v8173_v22 = vmov 0 }
 0x2b4   : > { %v2481_v25 = vadd.s32 %v2480_v33, %v2217_v5  ;;  %vm6178_vm2 = vmand %vm8168_vm0, %vm8167_vm9  ;;  %v2221_v33 = vsel %vm1069_vm11, 1, %v7597_v60  ;;  %vm8171_vm9 = vcmp.gt.f32.partialorder %v5784_v55, %v2928_v53  ;;  %vm8175_vm11 = vcmp.lt.s32.totalorder %v8080_v3, %v8076_v18 }
 0x2b5   : > { %v2159_v46 = vsel %vm8171_vm9, 1, %v7597_v60  ;;  %vm6205_vm10 = vmor %vm8172_vm7, %vm6083_vm8  ;;  %v2409_v48 = vadd.s32 %v2408_v0, %v2157_v10  ;;  %vm8179_vm8 = vcmp.gt.f32.partialorder %v5790_v24, %v2924_v51  ;;  %vm8180_vm0 = vcmp.lt.s32.totalorder %v8094_v4, %v8076_v18 }
 0x2b6   : > { %v8174_v22 = vsel %vm6205_vm10, 4294967295, %v8173_v22  ;;  %vm6215_vm12 = vmand %vm8176_vm6, %vm8175_vm11  ;;  %v2482_v40 = vadd.s32 %v2481_v25, %v2219_v63  ;;  %v2097_v35 = vsel %vm8179_vm8, 1, %v7597_v60  ;;  %vm8181_vm6 = vcmp.eq.f32.partialorder %v5334_v11, %v2930_v54 }
 0x2b7   : > { %vm6233_vm11 = vmand %vm8181_vm6, %vm8180_vm0  ;;  %v8182_v63 = vmov 0  ;;  %v2336_v0 = vadd.s32 %v2335_v50, %v2095_v19  ;;  %vm8184_vm7 = vcmp.gt.f32.partialorder %v5800_v41, %v2932_v56  ;;  %vm8185_vm0 = vcmp.gt.f32.partialorder %v5802_v28, %v2928_v53  ;;  %v8255_v19 = vld [vmem:[#allocation68_spill] sm:$0xff] }
 0x2b8   : > { %v8183_v63 = vsel %vm6233_vm11, 4294967295, %v8182_v63  ;;  %v2223_v10 = vsel %vm8184_vm7, 1, %v7597_v60  ;;  %v2161_v25 = vsel %vm8185_vm0, 1, %v7597_v60  ;;  %vm8186_vm10 = vcmp.gt.f32.partialorder %v5185_v12, %v2926_v52 }
 0x2b9   : > { %vm6258_vm8 = vmor %vm8186_vm10, %vm6114_vm14  ;;  %v8187_v50 = vmov 0  ;;  %vm8190_vm7 = vcmp.lt.s32.totalorder %v8083_v27, %v8076_v18  ;;  %vm8191_vm9 = vcmp.eq.f32.partialorder %v5365_v7, %v2926_v52  ;;  %v2483_v9 = vadd.s32 %v2482_v40, %v2221_v33 }
 0x2ba   : > { %v8188_v50 = vsel %vm6258_vm8, 4294967295, %v8187_v50  ;;  %vm6268_vm11 = vmand %vm8191_vm9, %vm8190_vm7  ;;  %v2410_v3 = vadd.s32 %v2409_v48, %v2159_v46  ;;  %vm8194_vm14 = vcmp.gt.f32.partialorder %v5804_v31, %v2924_v51  ;;  %vm8195_vm7 = vcmp.lt.s32.totalorder %v8094_v4, %v8076_v18  ;;  %v6315_v48 = vpop.permute.xlu1 %587 }
 0x2bb   : > { %8189 = vst [vmem:[#allocation57_spill] sm:$0xff] %v8188_v50  ;;  %v2099_v12 = vsel %vm8194_vm14, 1, %v7597_v60  ;;  %v2080_v50 = vsel %vm5999_vm5, 1, %v7597_v60  ;;  %vm8196_vm0 = vcmp.eq.f32.partialorder %v5374_v59, %v2934_v61  ;;  %v8197_v46 = vmov 0  ;;  %8204 = vst [vmem:[#allocation70_spill] sm:$0xff] %v6315_v48 }
 0x2bc   : > { %vm6291_vm6 = vmand %vm8196_vm0, %vm8195_vm7  ;;  %vm8199_vm14 = vcmp.lt.s32.totalorder %v8083_v27, %v8076_v18  ;;  %vm8200_vm10 = vcmp.eq.f32.partialorder %v5399_v15, %v2930_v54  ;;  %v2337_v40 = vadd.s32 %v2336_v0, %v2097_v35  ;;  %vm8203_vm7 = vcmp.gt.f32.partialorder %v5806_v20, %v2932_v56 }
 0x2bd   : > { %v8198_v46 = vsel %vm6291_vm6, 4294967295, %v8197_v46  ;;  %vm6301_vm5 = vmand %vm8200_vm10, %vm8199_vm14  ;;  %v2225_v33 = vsel %vm8203_vm7, 1, %v7597_v60  ;;  %vm8205_vm10 = vcmp.gt.f32.partialorder %v5207_v36, %v2934_v61  ;;  %v8206_v4 = vmov 0 }
 0x2be   : > { %vm6322_vm14 = vmor %vm8205_vm10, %vm6130_vm4  ;;  %vm8209_vm0 = vcmp.lt.s32.totalorder %v8100_v43, %v8076_v18  ;;  %vm8210_vm8 = vcmp.eq.f32.partialorder %v5407_v39, %v2926_v52  ;;  %v2484_v32 = vadd.s32 %v2483_v9, %v2223_v10  ;;  %v2411_v0 = vadd.s32 %v2410_v3, %v2161_v25 }
 0x2bf   : > { %v8207_v4 = vsel %vm6322_vm14, 4294967295, %v8206_v4  ;;  %vm6332_vm9 = vmand %vm8210_vm8, %vm8209_vm0  ;;  %vm8213_vm4 = vcmp.gt.f32.partialorder %v5808_v14, %v2928_v53  ;;  %v2144_v59 = vsel %vm6052_vm15, 1, %v7597_v60  ;;  %vm8215_vm0 = vcmp.lt.s32.totalorder %v8083_v27, %v8076_v18 }
 0x2c0   : > { %8208 = vst [vmem:[#allocation58_spill] sm:$0xff] %v8207_v4  ;;  %v2163_v36 = vsel %vm8213_vm4, 1, %v7597_v60  ;;  %v6344_v4 = vpop.permute.xlu0 %457  ;;  %vm8216_vm7 = vcmp.eq.f32.partialorder %v5453_v47, %v2934_v61  ;;  %vm8219_vm4 = vcmp.lt.s32.totalorder %v8100_v43, %v8076_v18  ;;  %vm8220_vm10 = vcmp.eq.f32.partialorder %v5465_v34, %v2930_v54 }
 0x2c1   : > { %8214 = vst [vmem:[#allocation59_spill] sm:$0xff] %v6344_v4  ;;  %vm6357_vm14 = vmand %vm8216_vm7, %vm8215_vm0  ;;  %v2338_v10 = vadd.s32 %v2337_v40, %v2099_v12  ;;  %vm8223_vm0 = vcmp.gt.f32.partialorder %v5810_v45, %v2924_v51  ;;  %v2365_v9 = vadd.s32 %v5430_v58, %v2080_v50  ;;  %v2082_v27 = vsel %vm6073_vm13, 1, %v7597_v60 }
 0x2c2   : > { %vm6367_vm15 = vmand %vm8220_vm10, %vm8219_vm4  ;;  %v2101_v25 = vsel %vm8223_vm0, 1, %v7597_v60  ;;  %vm8224_vm4 = vcmp.gt.f32.partialorder %v5266_v30, %v2930_v54  ;;  %v8225_v12 = vmov 0  ;;  %vm8228_vm0 = vcmp.gt.f32.partialorder %v5275_v8, %v2926_v52  ;;  %v8237_v8 = vld [vmem:[#allocation61_spill] sm:$0xff] }
 0x2c3   : > { %vm6392_vm7 = vmor %vm8224_vm4, %vm6156_vm3  ;;  %v8229_v58 = vmov 0  ;;  %vm8233_vm13 = vcmp.lt.s32.totalorder %v8232_v21, %v8076_v18  ;;  %vm8234_vm8 = vcmp.eq.f32.partialorder %v5521_v38, %v2926_v52  ;;  %v2485_v49 = vadd.s32 %v2484_v32, %v2225_v33  ;;  %v8244_v33 = vld [vmem:[#allocation53_spill] sm:$0xff]  ;;  %v8245_v32 = vld [vmem:[#allocation62_spill] sm:$0xff] }
 0x2c4   : > { %v8226_v12 = vsel %vm6392_vm7, 4294967295, %v8225_v12  ;;  %vm6401_vm6 = vmor %vm8228_vm0, %vm6178_vm2  ;;  %v2208_v5 = vsel %vm6104_vm1, 1, %v7597_v60  ;;  %vm8239_vm0 = vcmp.eq.f32.partialorder %v5533_v57, %v2934_v61  ;;  %v8240_v50 = vmov 0  ;;  %v6552_v35 = vpop.permute.xlu0 %591 }
 0x2c5   : > { %8227 = vst [vmem:[#allocation50_spill] sm:$0xff] %v8226_v12  ;;  %v8230_v58 = vsel %vm6401_vm6, 4294967295, %v8229_v58  ;;  %vm6411_vm10 = vmand %vm8234_vm8, %vm8233_vm13  ;;  %vm8238_vm8 = vcmp.lt.s32.totalorder %v8100_v43, %v8076_v18  ;;  %v2412_v26 = vadd.s32 %v2411_v0, %v2163_v36  ;;  %vm8243_vm4 = vcmp.gt.f32.partialorder %v5812_v44, %v2932_v56 }
 0x2c6   : > { %8231 = vst [vmem:[#allocation63_spill] sm:$0xff] %v8230_v58  ;;  %vm6430_vm13 = vmand %vm8239_vm0, %vm8238_vm8  ;;  %v2227_v40 = vsel %vm8243_vm4, 1, %v7597_v60  ;;  %v2439_v43 = vadd.s32 %v8245_v32, %v2144_v59  ;;  %vm8246_vm0 = vcmp.gt.f32.partialorder %v5365_v7, %v2926_v52  ;;  %v8247_v57 = vmov 0  ;;  %v8256_v32 = vld [vmem:[#allocation36_spill] sm:$0xff] }
 0x2c7   : > { %v8241_v50 = vsel %vm6430_vm13, 4294967295, %v8240_v50  ;;  %vm6452_vm2 = vmor %vm8246_vm0, %vm6268_vm11  ;;  %vm8250_vm1 = vcmp.lt.s32.totalorder %v8232_v21, %v8076_v18  ;;  %vm8251_vm4 = vcmp.eq.f32.partialorder %v5600_v13, %v2930_v54  ;;  %v2339_v59 = vadd.s32 %v2338_v10, %v2101_v25  ;;  %v8262_v10 = vld [vmem:[#allocation45_spill] sm:$0xff]  ;;  %v8263_v25 = vld [vmem:[#allocation55_spill] sm:$0xff]  ;;  %8281 = vst [vmem:[#allocation53_spill] sm:$0xff] %v6552_v35 }
 0x2c8   : > { %8242 = vst [vmem:[#allocation51_spill] sm:$0xff] %v8241_v50  ;;  %v8248_v57 = vsel %vm6452_vm2, 4294967295, %v8247_v57  ;;  %vm6462_vm3 = vmand %vm8251_vm4, %vm8250_vm1  ;;  %vm8254_vm11 = vcmp.gt.f32.partialorder %v5814_v37, %v2928_v53  ;;  %v6474_v36 = vadd.s32 %v2365_v9, %v2082_v27  ;;  %vm8257_vm1 = vcmp.lt.s32.totalorder %v8256_v32, %v8076_v18  ;;  %v6502_v9 = vpop.permute.xlu1 %721  ;;  %v8264_v50 = vld [vmem:[#allocation65_spill] sm:$0xff]  ;;  %v8329_v6 = vld [vmem:[#allocation58_spill] sm:$0xff] }
 0x2c9   : > { %8249 = vst [vmem:[#allocation61_spill] sm:$0xff] %v8248_v57  ;;  %v2165_v7 = vsel %vm8254_vm11, 1, %v7597_v60  ;;  %vm8258_vm4 = vcmp.eq.f32.partialorder %v5622_v17, %v2926_v52  ;;  %vm8261_vm6 = vcmp.gt.f32.partialorder %v8237_v8, %v2924_v51  ;;  %v6505_v58 = vadd.s32 %v8264_v50, %v2208_v5 }
 0x2ca   : > { %vm6482_vm2 = vmand %vm8258_vm4, %vm8257_vm1  ;;  %v2103_v27 = vsel %vm8261_vm6, 1, %v7597_v60  ;;  %vm8265_vm13 = vcmp.gt.f32.partialorder %v5307_v62, %v2934_v61  ;;  %v8266_v31 = vmov 0  ;;  %vm8268_vm6 = vnez %v8183_v63  ;;  %v8280_v63 = vld [vmem:[#allocation69_spill] sm:$0xff] }
 0x2cb   : > { %vm6512_vm0 = vmor %vm8265_vm13, %vm6215_vm12  ;;  %vm8269_vm11 = vcmp.gt.f32.partialorder %v5334_v11, %v2930_v54  ;;  %v8270_v12 = vmov 0  ;;  %vm8272_vm4 = vcmp.gt.f32.partialorder %v5407_v39, %v2926_v52  ;;  %v8273_v62 = vmov 0  ;;  %v6890_v11 = vpop.permute.xlu0 %725 }
 0x2cc   : > { %v8267_v31 = vsel %vm6512_vm0, 4294967295, %v8266_v31  ;;  %vm6521_vm8 = vmor %vm8269_vm11, %vm8268_vm6  ;;  %vm8275_vm12 = vcmp.lt.s32.totalorder %v8232_v21, %v8076_v18  ;;  %vm8276_vm13 = vcmp.eq.f32.partialorder %v5681_v16, %v2934_v61  ;;  %v2486_v23 = vadd.s32 %v2485_v49, %v2227_v40  ;;  %v8303_v21 = vld [vmem:[#allocation57_spill] sm:$0xff]  ;;  %v8378_v49 = vld [vmem:[#allocation46_spill] sm:$0xff] }
 0x2cd   : > { %v8271_v12 = vsel %vm6521_vm8, 4294967295, %v8270_v12  ;;  %vm6530_vm1 = vmor %vm8272_vm4, %vm6332_vm9  ;;  %vm8279_vm9 = vcmp.gt.f32.partialorder %v8244_v33, %v2928_v53  ;;  %vm8282_vm6 = vnez %v8174_v22  ;;  %v2413_v22 = vadd.s32 %v2412_v26, %v2165_v7  ;;  %v8296_v7 = vld [vmem:[#allocation37_spill] sm:$0xff] }
 0x2ce   : > { %v8274_v62 = vsel %vm6530_vm1, 4294967295, %v8273_v62  ;;  %vm6540_vm0 = vmand %vm8276_vm13, %vm8275_vm12  ;;  %v2167_v39 = vsel %vm8279_vm9, 1, %v7597_v60  ;;  %v2146_v5 = vsel %vm8282_vm6, 1, %v7597_v60  ;;  %vm8283_vm12 = vcmp.lt.s32.totalorder %v8256_v32, %v8076_v18 }
 0x2cf   : > { %vm8284_vm13 = vcmp.eq.f32.partialorder %v5689_v1, %v2930_v54  ;;  %vm8288_vm4 = vcmp.gt.f32.partialorder %v5399_v15, %v2930_v54  ;;  %v8289_v40 = vmov 0  ;;  %vm8292_vm6 = vcmp.gt.f32.partialorder %v5521_v38, %v2926_v52  ;;  %v8353_v15 = vld [vmem:[#allocation63_spill] sm:$0xff] }
 0x2d0   : > { %vm6563_vm11 = vmand %vm8284_vm13, %vm8283_vm12  ;;  %vm8287_vm12 = vcmp.gt.f32.partialorder %v8255_v19, %v2924_v51  ;;  %v8293_v26 = vmov 0  ;;  %vm8298_vm13 = vcmp.eq.f32.partialorder %v5745_v29, %v2926_v52  ;;  %v2340_v42 = vadd.s32 %v2339_v59, %v2103_v27  ;;  %v8421_v59 = vld [vmem:[#allocation55_spill] sm:$0xff] }
 0x2d1   : > { %v2105_v50 = vsel %vm8287_vm12, 1, %v7597_v60  ;;  %vm6586_vm9 = vmor %vm8288_vm4, %vm6301_vm5  ;;  %vm8297_vm12 = vcmp.lt.s32.totalorder %v8296_v7, %v8076_v18  ;;  %vm8302_vm4 = vcmp.gt.f32.partialorder %v8263_v25, %v2928_v53  ;;  %vm8306_vm5 = vcmp.eq.f32.partialorder %v5759_v2, %v2934_v61 }
 0x2d2   : > { %v8290_v40 = vsel %vm6586_vm9, 4294967295, %v8289_v40  ;;  %vm6595_vm1 = vmor %vm8292_vm6, %vm6411_vm10  ;;  %vm8301_vm10 = vcmp.gt.f32.partialorder %v8262_v10, %v2932_v56  ;;  %v2169_v30 = vsel %vm8302_vm4, 1, %v7597_v60  ;;  %v8313_v25 = vmov 0 }
 0x2d3   : > { %8291 = vst [vmem:[#allocation62_spill] sm:$0xff] %v8290_v40  ;;  %v8294_v26 = vsel %vm6595_vm1, 4294967295, %v8293_v26  ;;  %vm6605_vm8 = vmand %vm8298_vm13, %vm8297_vm12  ;;  %v2229_v38 = vsel %vm8301_vm10, 1, %v7597_v60  ;;  %vm8304_vm13 = vnez %v8303_v21  ;;  %vm8305_vm12 = vcmp.lt.s32.totalorder %v8256_v32, %v8076_v18  ;;  %v8311_v40 = vld [vmem:[#allocation64_spill] sm:$0xff] }
 0x2d4   : > { %8295 = vst [vmem:[#allocation68_spill] sm:$0xff] %v8294_v26  ;;  %v2084_v26 = vsel %vm8304_vm13, 1, %v7597_v60  ;;  %vm6630_vm1 = vmand %vm8306_vm5, %vm8305_vm12  ;;  %v2414_v21 = vadd.s32 %v2413_v22, %v2167_v39  ;;  %vm8309_vm13 = vcmp.gt.f32.partialorder %v8280_v63, %v2924_v51  ;;  %v2440_v32 = vadd.s32 %v2439_v43, %v2146_v5  ;;  %v8331_v22 = vld [vmem:[#allocation38_spill] sm:$0xff] }
 0x2d5   : > { %v2107_v27 = vsel %vm8309_vm13, 1, %v7597_v60  ;;  %vm8310_vm12 = vnez %v8198_v46  ;;  %vm8312_vm10 = vcmp.gt.f32.partialorder %v8311_v40, %v2934_v61  ;;  %vm8315_vm6 = vcmp.gt.f32.partialorder %v5465_v34, %v2930_v54 }
 0x2d6   : > { %vm6651_vm9 = vmor %vm8312_vm10, %vm8310_vm12  ;;  %v8316_v39 = vmov 0  ;;  %vm8319_vm13 = vcmp.gt.f32.partialorder %v5622_v17, %v2926_v52  ;;  %v8320_v43 = vmov 0  ;;  %vm8323_vm10 = vcmp.lt.s32.totalorder %v8296_v7, %v8076_v18  ;;  %v8327_v17 = vld [vmem:[#allocation54_spill] sm:$0xff] }
 0x2d7   : > { %v8314_v25 = vsel %vm6651_vm9, 4294967295, %v8313_v25  ;;  %vm6660_vm4 = vmor %vm8315_vm6, %vm6367_vm15  ;;  %vm8324_vm12 = vcmp.eq.f32.partialorder %v5784_v55, %v2930_v54  ;;  %v2341_v57 = vadd.s32 %v2340_v42, %v2105_v50  ;;  %vm8328_vm6 = vcmp.gt.f32.partialorder %v6315_v48, %v2928_v53  ;;  %v6714_v48 = vpop.permute.xlu1 %323 }
 0x2d8   : > { %v8317_v39 = vsel %vm6660_vm4, 4294967295, %v8316_v39  ;;  %vm6669_vm5 = vmor %vm8319_vm13, %vm6482_vm2  ;;  %v2171_v46 = vsel %vm8328_vm6, 1, %v7597_v60  ;;  %vm8330_vm13 = vnez %v8329_v6  ;;  %v2487_v40 = vadd.s32 %v2486_v23, %v2229_v38 }
 0x2d9   : > { %8318 = vst [vmem:[#allocation45_spill] sm:$0xff] %v8317_v39  ;;  %v8321_v43 = vsel %vm6669_vm5, 4294967295, %v8320_v43  ;;  %vm6679_vm9 = vmand %vm8324_vm12, %vm8323_vm10  ;;  %v2210_v5 = vsel %vm8330_vm13, 1, %v7597_v60  ;;  %vm8332_vm10 = vcmp.lt.s32.totalorder %v8331_v22, %v8076_v18  ;;  %vm8333_vm12 = vcmp.eq.f32.partialorder %v5790_v24, %v2926_v52 }
 0x2da   : > { %8322 = vst [vmem:[#allocation65_spill] sm:$0xff] %v8321_v43  ;;  %vm6700_vm15 = vmand %vm8333_vm12, %vm8332_vm10  ;;  %v2415_v42 = vadd.s32 %v2414_v21, %v2169_v30  ;;  %vm8336_vm13 = vcmp.gt.f32.partialorder %v6344_v4, %v2924_v51  ;;  %v2367_v43 = vadd.s32 %v6474_v36, %v2084_v26  ;;  %vm8337_vm10 = vcmp.gt.f32.partialorder %v5453_v47, %v2934_v61  ;;  %v8355_v30 = vld [vmem:[#allocation39_spill] sm:$0xff]  ;;  %v8357_v21 = vld [vmem:[#allocation52_spill] sm:$0xff] }
 0x2db   : > { %v2109_v6 = vsel %vm8336_vm13, 1, %v7597_v60  ;;  %vm6722_vm12 = vmor %vm8337_vm10, %vm6357_vm14  ;;  %v8338_v39 = vmov 0  ;;  %vm8340_vm5 = vcmp.gt.f32.partialorder %v5600_v13, %v2930_v54  ;;  %vm8343_vm13 = vcmp.gt.f32.partialorder %v5745_v29, %v2926_v52  ;;  %v8350_v29 = vld [vmem:[#allocation56_spill] sm:$0xff]  ;;  %v8442_v13 = vld [vmem:[#allocation66_spill] sm:$0xff] }
 0x2dc   : > { %v8339_v39 = vsel %vm6722_vm12, 4294967295, %v8338_v39  ;;  %vm6731_vm6 = vmor %vm8340_vm5, %vm6462_vm3  ;;  %v8344_v47 = vmov 0  ;;  %vm8346_vm14 = vcmp.lt.s32.totalorder %v8296_v7, %v8076_v18  ;;  %vm8347_vm10 = vcmp.eq.f32.partialorder %v5800_v41, %v2934_v61  ;;  %v8362_v7 = vld [vmem:[#allocation51_spill] sm:$0xff] }
 0x2dd   : > { %vm6740_vm2 = vmor %vm8343_vm13, %vm6605_vm8  ;;  %v2342_v3 = vadd.s32 %v2341_v57, %v2107_v27  ;;  %vm8351_vm5 = vcmp.gt.f32.partialorder %v6552_v35, %v2928_v53  ;;  %v2148_v26 = vsel %vm6392_vm7, 1, %v7597_v60  ;;  %vm8354_vm13 = vnez %v8353_v15  ;;  %v8364_v53 = vld [vmem:[#allocation60_spill] sm:$0xff]  ;;  %v8423_v27 = vld [vmem:[#allocation62_spill] sm:$0xff] }
 0x2de   : > { %v8345_v47 = vsel %vm6740_vm2, 4294967295, %v8344_v47  ;;  %vm6750_vm12 = vmand %vm8347_vm10, %vm8346_vm14  ;;  %v2173_v0 = vsel %vm8351_vm5, 1, %v7597_v60  ;;  %v2086_v38 = vsel %vm8354_vm13, 1, %v7597_v60  ;;  %vm8356_vm14 = vcmp.lt.s32.totalorder %v8355_v30, %v8076_v18 }
 0x2df   : > { %vm8358_vm10 = vcmp.eq.f32.partialorder %v8357_v21, %v2926_v52  ;;  %vm8361_vm13 = vcmp.gt.f32.partialorder %v8327_v17, %v2932_v56  ;;  %v2416_v36 = vadd.s32 %v2415_v42, %v2171_v46  ;;  %v2514_v15 = vadd.s32 %v6505_v58, %v2210_v5  ;;  %v8381_v46 = vld [vmem:[#allocation40_spill] sm:$0xff] }
 0x2e0   : > { %vm6774_vm3 = vmand %vm8358_vm10, %vm8356_vm14  ;;  %v2231_v57 = vsel %vm8361_vm13, 1, %v7597_v60  ;;  %vm8363_vm8 = vnez %v8362_v7  ;;  %vm8365_vm14 = vcmp.gt.f32.partialorder %v8364_v53, %v2934_v61  ;;  %v8366_v51 = vmov 0 }
 0x2e1   : > { %vm6792_vm10 = vmor %vm8365_vm14, %vm8363_vm8  ;;  %vm8368_vm7 = vcmp.gt.f32.partialorder %v5689_v1, %v2930_v54  ;;  %vm8371_vm13 = vcmp.gt.f32.partialorder %v5790_v24, %v2926_v52  ;;  %v8372_v53 = vmov 0  ;;  %vm8374_vm8 = vcmp.lt.s32.totalorder %v8331_v22, %v8076_v18  ;;  %v8379_v24 = vld [vmem:[#allocation61_spill] sm:$0xff] }
 0x2e2   : > { %v8367_v51 = vsel %vm6792_vm10, 4294967295, %v8366_v51  ;;  %vm6801_vm5 = vmor %vm8368_vm7, %vm6563_vm11  ;;  %vm8375_vm14 = vcmp.eq.f32.partialorder %v5802_v28, %v2930_v54  ;;  %v2343_v58 = vadd.s32 %v2342_v3, %v2109_v6  ;;  %vm8380_vm7 = vnez %v8379_v24 }
 0x2e3   : > { %vm6810_vm2 = vmor %vm8371_vm13, %vm6700_vm15  ;;  %v2088_v7 = vsel %vm8380_vm7, 1, %v7597_v60  ;;  %vm8382_vm13 = vcmp.lt.s32.totalorder %v8381_v46, %v8076_v18  ;;  %vm8386_vm7 = vcmp.gt.f32.partialorder %v8350_v29, %v2932_v56  ;;  %v2417_v42 = vadd.s32 %v2416_v36, %v2173_v0  ;;  %v8425_v36 = vld [vmem:[#allocation68_spill] sm:$0xff] }
 0x2e4   : > { %v8373_v53 = vsel %vm6810_vm2, 4294967295, %v8372_v53  ;;  %vm6820_vm10 = vmand %vm8375_vm14, %vm8374_vm8  ;;  %vm8383_vm8 = vcmp.eq.f32.partialorder %v5810_v45, %v2926_v52  ;;  %v2233_v50 = vsel %vm8386_vm7, 1, %v7597_v60  ;;  %v2441_v6 = vadd.s32 %v2440_v32, %v2148_v26 }
 0x2e5   : > { %vm6837_vm14 = vmand %vm8383_vm8, %vm8382_vm13  ;;  %v2368_v3 = vadd.s32 %v2367_v43, %v2086_v38  ;;  %vm8387_vm13 = vcmp.gt.f32.partialorder %v5681_v16, %v2934_v61  ;;  %v8388_v24 = vmov 0  ;;  %vm8390_vm7 = vcmp.gt.f32.partialorder %v5784_v55, %v2930_v54 }
 0x2e6   : > { %vm6856_vm8 = vmor %vm8387_vm13, %vm6540_vm0  ;;  %vm8393_vm11 = vcmp.gt.f32.partialorder %v8357_v21, %v2926_v52  ;;  %v8394_v16 = vmov 0  ;;  %vm8396_vm0 = vcmp.lt.s32.totalorder %v8331_v22, %v8076_v18  ;;  %vm8397_vm13 = vcmp.eq.f32.partialorder %v5806_v20, %v2934_v61 }
 0x2e7   : > { %v8389_v24 = vsel %vm6856_vm8, 4294967295, %v8388_v24  ;;  %vm6865_vm15 = vmor %vm8390_vm7, %vm6679_vm9  ;;  %v2488_v32 = vadd.s32 %v2487_v40, %v2231_v57  ;;  %vm8402_vm7 = vnez %v8274_v62  ;;  %v8409_v62 = vmov 0 }
 0x2e8   : > { %vm6874_vm2 = vmor %vm8393_vm11, %vm6774_vm3  ;;  %vm8400_vm3 = vnez %v8267_v31  ;;  %vm8401_vm11 = vnez %v8271_v12  ;;  %v2090_v0 = vsel %vm8402_vm7, 1, %v7597_v60  ;;  %v2369_v12 = vadd.s32 %v2368_v3, %v2088_v7  ;;  %v8427_v7 = vld [vmem:[#allocation41_spill] sm:$0xff] }
 0x2e9   : > { %v8395_v16 = vsel %vm6874_vm2, 4294967295, %v8394_v16  ;;  %vm6884_vm8 = vmand %vm8397_vm13, %vm8396_vm0  ;;  %v2212_v43 = vsel %vm8400_vm3, 1, %v7597_v60  ;;  %v2150_v34 = vsel %vm8401_vm11, 1, %v7597_v60  ;;  %vm8403_vm0 = vcmp.lt.s32.totalorder %v8355_v30, %v8076_v18 }
 0x2ea   : > { %vm8404_vm13 = vcmp.eq.f32.partialorder %v5808_v14, %v2930_v54  ;;  %vm8407_vm11 = vcmp.gt.f32.partialorder %v6714_v48, %v8378_v49  ;;  %vm8408_vm7 = vcmp.gt.f32.partialorder %v5759_v2, %v2934_v61  ;;  %v8412_v26 = vmov 0 }
 0x2eb   : > { %vm6907_vm9 = vmand %vm8404_vm13, %vm8403_vm0  ;;  %v2045_v31 = vsel %vm8407_vm11, 1, %v7597_v60  ;;  %vm8411_vm0 = vcmp.gt.f32.partialorder %v5802_v28, %v2930_v54  ;;  %vm8414_vm11 = vcmp.gt.f32.partialorder %v5810_v45, %v2926_v52  ;;  %v8415_v2 = vmov 0 }
 0x2ec   : > { %vm6922_vm2 = vmor %vm8408_vm7, %vm6630_vm1  ;;  %vm8417_vm1 = vcmp.lt.s32.totalorder %v8381_v46, %v8076_v18  ;;  %vm8418_vm7 = vcmp.eq.f32.partialorder %v5814_v37, %v2930_v54  ;;  %v2489_v38 = vadd.s32 %v2488_v32, %v2233_v50  ;;  %v2344_v21 = vrot.slane %v2343_v58, 4 }
 0x2ed   : > { %v8410_v62 = vsel %vm6922_vm2, 4294967295, %v8409_v62  ;;  %vm6931_vm13 = vmor %vm8411_vm0, %vm6820_vm10  ;;  %vm8424_vm0 = vnez %v8423_v27  ;;  %v2418_v50 = vrot.slane %v2417_v42, 4  ;;  %v2515_v3 = vadd.s32 %v2514_v15, %v2212_v43 }
 0x2ee   : > { %v8413_v26 = vsel %vm6931_vm13, 4294967295, %v8412_v26  ;;  %vm6940_vm3 = vmor %vm8414_vm11, %vm6837_vm14  ;;  %vm8422_vm14 = vcmp.gt.f32.partialorder %v6502_v9, %v2932_v56  ;;  %v2152_v57 = vsel %vm8424_vm0, 1, %v7597_v60  ;;  %vm8426_vm11 = vnez %v8425_v36 }
 0x2ef   : > { %v8416_v2 = vsel %vm6940_vm3, 4294967295, %v8415_v2  ;;  %vm6950_vm2 = vmand %vm8418_vm7, %vm8417_vm1  ;;  %v2235_v45 = vsel %vm8422_vm14, 1, %v7597_v60  ;;  %v2092_v1 = vsel %vm8426_vm11, 1, %v7597_v60  ;;  %vm8428_vm1 = vcmp.lt.s32.totalorder %v8427_v7, %v8076_v18 }
 0x2f0   : > { %vm8429_vm7 = vcmp.eq.f32.partialorder %v8237_v8, %v2926_v52  ;;  %v2442_v32 = vadd.s32 %v2441_v6, %v2150_v34  ;;  %v2370_v27 = vadd.s32 %v2369_v12, %v2090_v0  ;;  %vm8432_vm11 = vcmp.gt.f32.partialorder %v5800_v41, %v2934_v61  ;;  %v8445_v34 = vld [vmem:[#allocation65_spill] sm:$0xff] }
 0x2f1   : > { %vm6972_vm10 = vmand %vm8429_vm7, %vm8428_vm1  ;;  %vm8435_vm1 = vcmp.gt.f32.partialorder %v5808_v14, %v2930_v54  ;;  %vm8438_vm14 = vcmp.lt.s32.totalorder %v8355_v30, %v8076_v18  ;;  %vm8439_vm0 = vcmp.eq.f32.partialorder %v5812_v44, %v2934_v61  ;;  %v2269_v15 = vadd.s32 %v8442_v13, %v2045_v31  ;;  %v8483_v13 = vld [vmem:[#allocation44_spill] sm:$0xff] }
 0x2f2   : > { %vm6985_vm3 = vmor %vm8432_vm11, %vm6750_vm12  ;;  %v2154_v43 = vsel %vm6660_vm4, 1, %v7597_v60  ;;  %vm8446_vm11 = vnez %v8445_v34  ;;  %v2443_v31 = vadd.s32 %v2442_v32, %v2152_v57  ;;  %v2371_v12 = vadd.s32 %v2370_v27, %v2092_v1 }
 0x2f3   : > { %vm6994_vm7 = vmor %vm8435_vm1, %vm6907_vm9  ;;  %vm8443_vm9 = vnez %v8314_v25  ;;  %v2094_v0 = vsel %vm8446_vm11, 1, %v7597_v60  ;;  %v2490_v25 = vadd.s32 %v2489_v38, %v2235_v45  ;;  %vm8450_vm4 = vcmp.gt.f32.partialorder %v5806_v20, %v2934_v61 }
 0x2f4   : > { %vm7004_vm13 = vmand %vm8439_vm0, %vm8438_vm14  ;;  %v2214_v14 = vsel %vm8443_vm9, 1, %v7597_v60  ;;  %vm8447_vm14 = vcmp.gt.f32.partialorder %v8237_v8, %v2926_v52  ;;  %vm8457_vm1 = vcmp.eq.f32.partialorder %v8262_v10, %v2934_v61  ;;  %v2345_v55 = vadd.s32 %v2344_v21, %v2343_v58 }
 0x2f5   : > { %vm7025_vm0 = vmor %vm8447_vm14, %vm6972_vm10  ;;  %vm8453_vm10 = vcmp.gt.f32.partialorder %v5814_v37, %v2930_v54  ;;  %vm8456_vm14 = vcmp.lt.s32.totalorder %v8381_v46, %v8076_v18  ;;  %v2156_v38 = vsel %vm6731_vm6, 1, %v7597_v60  ;;  %v2516_v58 = vadd.s32 %v2515_v3, %v2214_v14  ;;  %v8474_v3 = vld [vmem:[#allocation42_spill] sm:$0xff]  ;;  %v8484_v14 = vld [vmem:[#allocation59_spill] sm:$0xff] }
 0x2f6   : > { %vm7036_vm9 = vmor %vm8450_vm4, %vm6884_vm8  ;;  %vm8461_vm4 = vnez %v8339_v39  ;;  %v2419_v39 = vadd.s32 %v2418_v50, %v2417_v42  ;;  %v2444_v21 = vadd.s32 %v2443_v31, %v2154_v43  ;;  %v2372_v57 = vadd.s32 %v2371_v12, %v2094_v0  ;;  %v8471_v42 = vld [vmem:[#allocation70_spill] sm:$0xff] }
 0x2f7   : > { %vm7045_vm11 = vmor %vm8453_vm10, %vm6950_vm2  ;;  %vm8460_vm2 = vcmp.gt.f32.partialorder %v6890_v11, %v2932_v56  ;;  %v2216_v28 = vsel %vm8461_vm4, 1, %v7597_v60  ;;  %vm8463_vm10 = vcmp.lt.s32.totalorder %v8427_v7, %v8076_v18  ;;  %vm8465_vm6 = vcmp.gt.f32.partialorder %v5812_v44, %v2934_v61 }
 0x2f8   : > { %vm7055_vm12 = vmand %vm8457_vm1, %vm8456_vm14  ;;  %v2237_v37 = vsel %vm8460_vm2, 1, %v7597_v60  ;;  %vm8462_vm1 = vnez %v8345_v47  ;;  %vm8464_vm14 = vcmp.eq.f32.partialorder %v8244_v33, %v2930_v54  ;;  %v2270_v1 = vrot.slane %v2269_v15, 4 }
 0x2f9   : > { %v2096_v45 = vsel %vm8462_vm1, 1, %v7597_v60  ;;  %vm1656_vm8 = vmand %vm8464_vm14, %vm8463_vm10  ;;  %vm8468_vm1 = vcmp.gt.f32.partialorder %v8244_v33, %v2930_v54  ;;  %vm8472_vm2 = vnez %v8367_v51  ;;  %v2158_v44 = vsel %vm6801_vm5, 1, %v7597_v60 }
 0x2fa   : > { %vm7087_vm4 = vmor %vm8465_vm6, %vm7004_vm13  ;;  %v2218_v50 = vsel %vm8472_vm2, 1, %v7597_v60  ;;  %vm8473_vm13 = vnez %v8373_v53  ;;  %vm8476_vm6 = vcmp.eq.f32.partialorder %v8255_v19, %v2926_v52  ;;  %v2491_v51 = vadd.s32 %v2490_v25, %v2237_v37 }
 0x2fb   : > { %vm7094_vm10 = vmor %vm8468_vm1, %vm1656_vm8  ;;  %v2098_v33 = vsel %vm8473_vm13, 1, %v7597_v60  ;;  %vm8475_vm8 = vcmp.lt.s32.totalorder %v8474_v3, %v8076_v18  ;;  %v2517_v32 = vadd.s32 %v2516_v58, %v2216_v28  ;;  %v2445_v27 = vadd.s32 %v2444_v21, %v2156_v38  ;;  %v8500_v28 = vld [vmem:[#allocation53_spill] sm:$0xff]  ;;  %v8501_v58 = vld [vmem:[#allocation43_spill] sm:$0xff] }
 0x2fc   : > { %vm1594_vm1 = vmand %vm8476_vm6, %vm8475_vm8  ;;  %v2373_v41 = vadd.s32 %v2372_v57, %v2096_v45  ;;  %vm8477_vm5 = vcmp.gt.f32.partialorder %v8262_v10, %v2934_v61  ;;  %vm8480_vm13 = vcmp.gt.f32.partialorder %v8255_v19, %v2926_v52  ;;  %v2346_v6 = vrot.slane %v2345_v55, 2 }
 0x2fd   : > { %vm7122_vm2 = vmor %vm8477_vm5, %vm7055_vm12  ;;  %vm8485_vm12 = vnez %v8389_v24  ;;  %v2160_v43 = vsel %vm6865_vm15, 1, %v7597_v60  ;;  %vm8487_vm5 = vcmp.lt.s32.totalorder %v8427_v7, %v8076_v18  ;;  %v2420_v24 = vrot.slane %v2419_v39, 2 }
 0x2fe   : > { %vm7129_vm8 = vmor %vm8480_vm13, %vm1594_vm1  ;;  %v2220_v10 = vsel %vm8485_vm12, 1, %v7597_v60  ;;  %vm8486_vm1 = vnez %v8395_v16  ;;  %vm8488_vm13 = vcmp.eq.f32.partialorder %v8327_v17, %v2934_v61  ;;  %v2518_v34 = vadd.s32 %v2517_v32, %v2218_v50 }
 0x2ff   : > { %v2100_v19 = vsel %vm8486_vm1, 1, %v7597_v60  ;;  %vm1720_vm14 = vmand %vm8488_vm13, %vm8487_vm5  ;;  %v2446_v0 = vadd.s32 %v2445_v27, %v2158_v44  ;;  %v2374_v25 = vadd.s32 %v2373_v41, %v2098_v33  ;;  %vm8489_vm15 = vcmp.gt.f32.partialorder %v8327_v17, %v2934_v61  ;;  %v8510_v33 = vld [vmem:[#allocation47_spill] sm:$0xff] }
 0x300   : > { %vm7157_vm12 = vmor %vm8489_vm15, %vm1720_vm14  ;;  %v8490_v4 = vmov 0  ;;  %v2271_v16 = vadd.s32 %v2270_v1, %v2269_v15  ;;  %vm8492_vm5 = vnez %v8410_v62  ;;  %vm8493_vm13 = vnez %v8413_v26 }
 0x301   : > { %v8491_v4 = vsel %vm7157_vm12, 4294967295, %v8490_v4  ;;  %v2222_v31 = vsel %vm8492_vm5, 1, %v7597_v60  ;;  %v2162_v12 = vsel %vm8493_vm13, 1, %v7597_v60  ;;  %vm8494_vm6 = vnez %v8416_v2 }
 0x302   : > { %v2102_v17 = vsel %vm8494_vm6, 1, %v7597_v60  ;;  %vm8495_vm14 = vcmp.lt.s32.totalorder %v8474_v3, %v8076_v18  ;;  %vm8496_vm15 = vcmp.eq.f32.partialorder %v8421_v59, %v2930_v54  ;;  %vm1084_vm12 = vcmp.gt.f32.partialorder %v6502_v9, %v2934_v61 }
 0x303   : > { %vm1658_vm1 = vmand %vm8496_vm15, %vm8495_vm14  ;;  %v2492_v62 = vrot.slane %v2491_v51, 4  ;;  %v2519_v15 = vadd.s32 %v2518_v34, %v2220_v10  ;;  %v2447_v20 = vadd.s32 %v2446_v0, %v2160_v43  ;;  %v2375_v37 = vadd.s32 %v2374_v25, %v2100_v19 }
 0x304   : > { %vm8497_vm5 = vcmp.gt.f32.partialorder %v8421_v59, %v2930_v54  ;;  %v2347_v2 = vadd.s32 %v2346_v6, %v2345_v55  ;;  %vm1278_vm6 = vcmp.eq.f32.partialorder %v8500_v28, %v2930_v54  ;;  %v2224_v38 = vsel %vm6985_vm3, 1, %v7597_v60 }
 0x305   : > { %vm7183_vm13 = vmor %vm8497_vm5, %vm1658_vm1  ;;  %v2164_v45 = vsel %vm6994_vm7, 1, %v7597_v60  ;;  %v2104_v59 = vsel %vm7025_vm0, 1, %v7597_v60  ;;  %vm8502_vm1 = vcmp.lt.s32.totalorder %v8501_v58, %v8076_v18  ;;  %vm8503_vm14 = vcmp.eq.f32.partialorder %v8280_v63, %v2926_v52 }
 0x306   : > { %vm1596_vm15 = vmand %vm8503_vm14, %vm8502_vm1  ;;  %vm1022_vm5 = vcmp.gt.f32.partialorder %v8500_v28, %v2930_v54  ;;  %v2421_v36 = vadd.s32 %v2420_v24, %v2419_v39  ;;  %v2520_v55 = vadd.s32 %v2519_v15, %v2222_v31  ;;  %v2448_v21 = vadd.s32 %v2447_v20, %v2162_v12 }
 0x307   : > { %v2376_v57 = vadd.s32 %v2375_v37, %v2102_v17  ;;  %vm8504_vm3 = vcmp.gt.f32.partialorder %v8280_v63, %v2926_v52  ;;  %v2272_v22 = vrot.slane %v2271_v16, 2  ;;  %v2226_v40 = vsel %vm7036_vm9, 1, %v7597_v60 }
 0x308   : > { %vm1852_vm7 = vmor %vm8504_vm3, %vm1596_vm15  ;;  %v2166_v1 = vsel %vm7045_vm11, 1, %v7597_v60  ;;  %v2106_v39 = vsel %vm7129_vm8, 1, %v7597_v60  ;;  %vm8505_vm0 = vcmp.lt.s32.totalorder %v8474_v3, %v8076_v18  ;;  %vm8506_vm1 = vcmp.eq.f32.partialorder %v8350_v29, %v2934_v61 }
 0x309   : > { %vm1722_vm14 = vmand %vm8506_vm1, %vm8505_vm0  ;;  %v2493_v63 = vadd.s32 %v2492_v62, %v2491_v51  ;;  %v2521_v50 = vadd.s32 %v2520_v55, %v2224_v38  ;;  %v2449_v44 = vadd.s32 %v2448_v21, %v2164_v45  ;;  %v2377_v5 = vadd.s32 %v2376_v57, %v2104_v59 }
 0x30a   : > { %vm8507_vm9 = vcmp.gt.f32.partialorder %v8350_v29, %v2934_v61  ;;  %vm894_vm11 = vcmp.gt.f32.partialorder %v6714_v48, %v8510_v33  ;;  %v2228_v32 = vsel %vm7087_vm4, 1, %v7597_v60  ;;  %v2168_v51 = vsel %vm7094_vm10, 1, %v7597_v60 }
 0x30b   : > { %vm7227_vm15 = vmor %vm8507_vm9, %vm1722_vm14  ;;  %v2108_v27 = vsel %vm1852_vm7, 1, %v7597_v60  ;;  %vm8511_vm8 = vcmp.lt.s32.totalorder %v8501_v58, %v8076_v18  ;;  %vm8512_vm3 = vcmp.eq.f32.partialorder %v8471_v42, %v2930_v54  ;;  %v2348_v29 = vrot.slane %v2347_v2, 1 }
 0x30c   : > { %vm1660_vm0 = vmand %vm8512_vm3, %vm8511_vm8  ;;  %v2522_v41 = vadd.s32 %v2521_v50, %v2226_v40  ;;  %v2450_v53 = vadd.s32 %v2449_v44, %v2166_v1  ;;  %v2378_v6 = vadd.s32 %v2377_v5, %v2106_v39  ;;  %vm8513_vm4 = vcmp.gt.f32.partialorder %v8471_v42, %v2930_v54  ;;  %v8523_v40 = vld [vmem:[#allocation67_spill] sm:$0xff]  ;;  %v8524_v39 = vld [vmem:[#allocation48_spill] sm:$0xff] }
 0x30d   : > { %vm1916_vm1 = vmor %vm8513_vm4, %vm1660_vm0  ;;  %v2273_v23 = vadd.s32 %v2272_v22, %v2271_v16  ;;  %v2230_v47 = vsel %vm7122_vm2, 1, %v7597_v60  ;;  %v2170_v10 = vsel %vm7183_vm13, 1, %v7597_v60  ;;  %vm8514_vm10 = vcmp.lt.s32.totalorder %v8483_v13, %v8076_v18 }
 0x30e   : > { %vm8515_vm7 = vcmp.eq.f32.partialorder %v8484_v14, %v2926_v52  ;;  %v2494_v43 = vrot.slane %v2493_v63, 2  ;;  %v2422_v19 = vrot.slane %v2421_v36, 1  ;;  %v2523_v42 = vadd.s32 %v2522_v41, %v2228_v32 }
 0x30f   : > { %vm1598_vm14 = vmand %vm8515_vm7, %vm8514_vm10  ;;  %v2451_v24 = vadd.s32 %v2450_v53, %v2168_v51  ;;  %v2379_v34 = vadd.s32 %v2378_v6, %v2108_v27  ;;  %vm8516_vm9 = vcmp.gt.f32.partialorder %v8484_v14, %v2926_v52  ;;  %vm1150_vm8 = vcmp.eq.f32.partialorder %v6714_v48, %v8510_v33  ;;  %v8525_v51 = vld [vmem:[#allocation49_spill] sm:$0xff] }
 0x310   : > { %vm1854_vm2 = vmor %vm8516_vm9, %vm1598_vm14  ;;  %vm8517_vm13 = vnez %v8491_v4  ;;  %v2172_v0 = vsel %vm1916_vm1, 1, %v7597_v60  ;;  %vm8518_vm3 = vcmp.lt.s32.totalorder %v8501_v58, %v8076_v18  ;;  %vm8519_vm0 = vcmp.eq.f32.partialorder %v6502_v9, %v2934_v61 }
 0x311   : > { %v2232_v35 = vsel %vm8517_vm13, 1, %v7597_v60  ;;  %v2110_v25 = vsel %vm1854_vm2, 1, %v7597_v60  ;;  %vm1724_vm4 = vmand %vm8519_vm0, %vm8518_vm3  ;;  %v2349_v14 = vadd.s32 %v2348_v29, %v2347_v2  ;;  %v2524_v16 = vadd.s32 %v2523_v42, %v2230_v47 }
 0x312   : > { %v2452_v31 = vadd.s32 %v2451_v24, %v2170_v10  ;;  %v2380_v12 = vadd.s32 %v2379_v34, %v2110_v25  ;;  %vm1980_vm10 = vmor %vm1084_vm12, %vm1724_vm4  ;;  %vm1086_vm1 = vcmp.gt.f32.partialorder %v6890_v11, %v2934_v61  ;;  %v2234_v4 = vsel %vm7227_vm15, 1, %v7597_v60 }
 0x313   : > { %vm8520_vm7 = vcmp.lt.s32.totalorder %v8483_v13, %v8076_v18  ;;  %v2495_v17 = vadd.s32 %v2494_v43, %v2493_v63  ;;  %v2423_v62 = vadd.s32 %v2422_v19, %v2421_v36  ;;  %v2274_v15 = vrot.slane %v2273_v23, 1 }
 0x314   : > { %vm1662_vm14 = vmand %vm1278_vm6, %vm8520_vm7  ;;  %v2525_v20 = vadd.s32 %v2524_v16, %v2232_v35  ;;  %v2453_v9 = vadd.s32 %v2452_v31, %v2172_v0  ;;  %v2381_v37 = vrot.slane %v2380_v12, 4  ;;  %vm1342_vm15 = vcmp.eq.f32.partialorder %v6890_v11, %v2934_v61 }
 0x315   : > { %vm1918_vm12 = vmor %vm1022_vm5, %vm1662_vm14  ;;  %v2236_v26 = vsel %vm1980_vm10, 1, %v7597_v60  ;;  %vm2551_vm2 = vcmask 1040384   ;;  %vm2578_vm13 = vcmp.ge.s32.totalorder %v2349_v14, 128  ;;  %vm2537_vm3 = vcmp.lt.s32.totalorder %v2349_v14, 128 }
 0x316   : > { %v2174_v2 = vsel %vm1918_vm12, 1, %v7597_v60  ;;  %vm8521_vm6 = vmmov %vm8520_vm7  ;;  %v2526_v38 = vadd.s32 %v2525_v20, %v2234_v4  ;;  %v2382_v45 = vadd.s32 %v2381_v37, %v2380_v12  ;;  %vm2539_vm10 = vcmp.lt.s32.totalorder %v2423_v62, 128 }
 0x317   : > { %vm1534_vm9 = vmand %vm1150_vm8, %vm8521_vm6  ;;  %v2454_v28 = vadd.s32 %v2453_v9, %v2174_v2  ;;  %v2275_v36 = vadd.s32 %v2274_v15, %v2273_v23  ;;  %v2496_v55 = vrot.slane %v2495_v17, 1  ;;  %v2586_v63 = vsel %vm2578_vm13, %v8524_v39, 0.0 }
 0x318   : > { %vm1790_vm5 = vmor %vm894_vm11, %vm1534_vm9  ;;  %v2383_v21 = vrot.slane %v2382_v45, 2  ;;  %v2527_v57 = vadd.s32 %v2526_v38, %v2236_v26  ;;  %v2545_v50 = vsel %vm2537_vm3, %v8524_v39, 0.0  ;;  %vm2580_vm11 = vcmp.ge.s32.totalorder %v2423_v62, 128 }
 0x319   : > { %v2046_v59 = vsel %vm1790_vm5, 1, %v7597_v60  ;;  %vm8522_vm0 = vmmov %vm8521_vm6  ;;  %v2455_v22 = vrot.slane %v2454_v28, 4  ;;  %v2547_v27 = vsel %vm2539_vm10, %v8525_v51, 0.0  ;;  %vm2535_vm7 = vcmp.lt.s32.totalorder %v2275_v36, 128 }
 0x31a   : > { %vm1726_vm4 = vmand %vm1342_vm15, %vm8522_vm0  ;;  %v2306_v1 = vadd.s32 %v8523_v40, %v2046_v59  ;;  %v2384_v44 = vadd.s32 %v2383_v21, %v2382_v45  ;;  %v2497_v29 = vadd.s32 %v2496_v55, %v2495_v17  ;;  %vm2576_vm14 = vcmp.ge.s32.totalorder %v2275_v36, 128 }
 0x31b   : > { %vm1982_vm8 = vmor %vm1086_vm1, %vm1726_vm4  ;;  %v2456_v5 = vadd.s32 %v2455_v22, %v2454_v28  ;;  %v2597_v6 = vsel %vm2551_vm2, %v2586_v63, 0.0  ;;  %v2557_v23 = vsel %vm2551_vm2, %v2545_v50, 0.0  ;;  %v2588_v47 = vsel %vm2580_vm11, %v8525_v51, 0.0 }
 0x31c   : > { %v2238_v48 = vsel %vm1982_vm8, 1, %v7597_v60  ;;  %v2307_v8 = vrot.slane %v2306_v1, 4  ;;  %v2385_v60 = vrot.slane %v2384_v44, 1  ;;  %v2562_v24 = vsel %vm2551_vm2, %v2547_v27, 0.0 }
 0x31d   : > { %v2528_v32 = vadd.s32 %v2527_v57, %v2238_v48  ;;  %v2457_v11 = vrot.slane %v2456_v5, 2  ;;  %v2543_v34 = vsel %vm2535_vm7, %v8378_v49, 0.0  ;;  %vm2541_vm1 = vcmp.lt.s32.totalorder %v2497_v29, 128 }
 0x31e   : > { %v2308_v41 = vadd.s32 %v2307_v8, %v2306_v1  ;;  %v2386_v42 = vadd.s32 %v2385_v60, %v2384_v44  ;;  %v2584_v35 = vsel %vm2576_vm14, %v8378_v49, 0.0  ;;  %vm2582_vm6 = vcmp.ge.s32.totalorder %v2497_v29, 128 }
 0x31f   : > { %v2529_v53 = vrot.slane %v2528_v32, 4  ;;  %v2458_v10 = vadd.s32 %v2457_v11, %v2456_v5  ;;  %v2602_v49 = vsel %vm2551_vm2, %v2588_v47, 0.0  ;;  %v2552_v26 = vsel %vm2551_vm2, %v2543_v34, 0.0 }
 0x320   : > { %v2309_v43 = vrot.slane %v2308_v41, 2  ;;  %vm2579_vm12 = vcmp.ge.s32.totalorder %v2386_v42, 128  ;;  %vm2538_vm15 = vcmp.lt.s32.totalorder %v2386_v42, 128  ;;  %v2592_v38 = vsel %vm2551_vm2, %v2584_v35, 0.0 }
 0x321   : > { %v2530_v19 = vadd.s32 %v2529_v53, %v2528_v32  ;;  %v2587_v14 = vsel %vm2579_vm12, %v2926_v52, 0.0  ;;  %v2546_v16 = vsel %vm2538_vm15, %v2926_v52, 0.0  ;;  %v2459_v31 = vrot.slane %v2458_v10, 1 }
 0x322   : > { %v2310_v0 = vadd.s32 %v2309_v43, %v2308_v41  ;;  %v2598_v4 = vsel %vm2551_vm2, %v2587_v14, 0.0  ;;  %v2558_v17 = vsel %vm2551_vm2, %v2546_v16, 0.0  ;;  %v2549_v52 = vsel %vm2541_vm1, %v2932_v56, 0.0 }
 0x323   : > { %v2531_v25 = vrot.slane %v2530_v19, 2  ;;  %v2599_v15 = vadd.f32 %v2598_v4, %v2597_v6  ;;  %v2559_v20 = vadd.f32 %v2558_v17, %v2557_v23  ;;  %v2460_v9 = vadd.s32 %v2459_v31, %v2458_v10  ;;  %v8527_v4 = vld [vmem:[#allocation9_spill] sm:$0xff] }
 0x324   : > { %v2311_v62 = vrot.slane %v2310_v0, 1  ;;  %v2590_v45 = vsel %vm2582_vm6, %v2932_v56, 0.0  ;;  %vm2628_vm10 = vcmask 1042434   ;;  %vm2631_vm8 = vcmask 1043459  }
 0x325   : > { %v2532_v12 = vadd.s32 %v2531_v25, %v2530_v19  ;;  %2600 = vadd.xlane.f32.xlu0 %v2599_v15  ;;  %2560 = vadd.xlane.f32.xlu1 %v2559_v20  ;;  %vm2540_vm9 = vcmp.lt.s32.totalorder %v2460_v9, 128  ;;  %vm2581_vm13 = vcmp.ge.s32.totalorder %v2460_v9, 128  ;;  %v2607_v32 = vsel %vm2551_vm2, %v2590_v45, 0.0 }
 0x326   : > { %v2312_v37 = vadd.s32 %v2311_v62, %v2310_v0  ;;  %v2548_v28 = vsel %vm2540_vm9, %v2930_v54, 0.0  ;;  %v2589_v59 = vsel %vm2581_vm13, %v2930_v54, 0.0  ;;  %v2567_v54 = vsel %vm2551_vm2, %v2549_v52, 0.0 }
 0x327   : > { %v2533_v2 = vrot.slane %v2532_v12, 1  ;;  %v2563_v55 = vsel %vm2551_vm2, %v2548_v28, 0.0  ;;  %v2603_v21 = vsel %vm2551_vm2, %v2589_v59, 0.0  ;;  %vm2638_vm11 = vcmask 31744  }
 0x328   : > { %vm2536_vm5 = vcmp.lt.s32.totalorder %v2312_v37, 128  ;;  %vm2577_vm3 = vcmp.ge.s32.totalorder %v2312_v37, 128  ;;  %v2564_v22 = vadd.f32 %v2563_v55, %v2562_v24  ;;  %v2604_v40 = vadd.f32 %v2603_v21, %v2602_v49 }
 0x329   : > { %v2534_v36 = vadd.s32 %v2533_v2, %v2532_v12  ;;  %v2544_v57 = vsel %vm2536_vm5, %v8510_v33, 0.0  ;;  %v2585_v39 = vsel %vm2577_vm3, %v8510_v33, 0.0  ;;  %v8526_v12 = vld [vmem:[#allocation10_spill] sm:$0xff] }
 0x32a   : > { %v2553_v1 = vsel %vm2551_vm2, %v2544_v57, 0.0  ;;  %2565 = vadd.xlane.f32.xlu0 %v2564_v22  ;;  %2605 = vadd.xlane.f32.xlu1 %v2604_v40  ;;  %v2593_v50 = vsel %vm2551_vm2, %v2585_v39, 0.0  ;;  %v2635_v17 = vsub.s32 %v8527_v4, %v8526_v12 }
 0x32b   : > { %vm2542_vm0 = vcmp.lt.s32.totalorder %v2534_v36, 128  ;;  %v2554_v48 = vadd.f32 %v2553_v1, %v2552_v26  ;;  %vm2583_vm4 = vcmp.ge.s32.totalorder %v2534_v36, 128  ;;  %v2594_v8 = vadd.f32 %v2593_v50, %v2592_v38 }
 0x32c   : > { %v2550_v56 = vsel %vm2542_vm0, %v2934_v61, 0.0  ;;  %v2591_v44 = vsel %vm2583_vm4, %v2934_v61, 0.0 }
 0x32d   : > { %v2568_v63 = vsel %vm2551_vm2, %v2550_v56, 0.0  ;;  %v2608_v51 = vsel %vm2551_vm2, %v2591_v44, 0.0  ;;  %vm2625_vm2 = vcmask 1041409  }
 0x32e   : > { %v2569_v5 = vadd.f32 %v2568_v63, %v2567_v54  ;;  %v2609_v27 = vadd.f32 %v2608_v51, %v2607_v32  ;;  %2555 = vadd.xlane.f32.xlu0 %v2554_v48 }
 0x330   : > { %2570 = vadd.xlane.f32.xlu1 %v2569_v5 }
 0x332   : > { %2595 = vadd.xlane.f32.xlu0 %v2594_v8 }
 0x334   : > { %2610 = vadd.xlane.f32.xlu1 %v2609_v27 }
 0x3b2   : > { %v2601_v33 = vpop.xlane.xlu0 %2600  ;;  %v2561_v29 = vpop.xlane.xlu1 %2560 }
 0x3b3   : > { %v2613_v53 = vmul.f32 0.0046875, %v2601_v33  ;;  %v2573_v60 = vmul.f32 0.0078125, %v2561_v29 }
 0x3b5   : > { %v2617_v10 = vadd.f32 %v2613_v53, %v2573_v60 }
 0x3b7   : > { %v2566_v11 = vpop.xlane.xlu0 %2565  ;;  %v2606_v41 = vpop.xlane.xlu1 %2605  ;;  %v2624_v25 = vrot.slane %v2617_v10, 7 }
 0x3b8   : > { %v2574_v6 = vmul.f32 0.0078125, %v2566_v11  ;;  %v2614_v23 = vmul.f32 0.0046875, %v2606_v41 }
 0x3ba   : > { %v2618_v43 = vadd.f32 %v2614_v23, %v2574_v6 }
 0x3bb   : > { %v2556_v61 = vpop.xlane.xlu0 %2555 }
 0x3bc   : > { %v2572_v24 = vmul.f32 0.0078125, %v2556_v61  ;;  %v2627_v31 = vrot.slane %v2618_v43, 6 }
 0x3bd   : > { %v2571_v47 = vpop.xlane.xlu1 %2570 }
 0x3be   : > { %v2575_v34 = vmul.f32 0.0078125, %v2571_v47 }
 0x3bf   : > { %v2596_v19 = vpop.xlane.xlu0 %2595 }
 0x3c0   : > { %v2612_v35 = vmul.f32 0.0046875, %v2596_v19 }
 0x3c1   : > { %v2611_v42 = vpop.xlane.xlu1 %2610 }
 0x3c2   : > { %v2615_v0 = vmul.f32 0.0046875, %v2611_v42  ;;  %v2616_v14 = vadd.f32 %v2612_v35, %v2572_v24 }
 0x3c4   : > { %v2619_v16 = vadd.f32 %v2615_v0, %v2575_v34  ;;  %v2626_v62 = vsel %vm2625_vm2, %v2624_v25, %v2616_v14 }
 0x3c5   : > { %v2629_v20 = vsel %vm2628_vm10, %v2627_v31, %v2626_v62 }
 0x3c6   : > { %v2630_v15 = vrot.slane %v2619_v16, 5  ;;  %71 = sbr.rel (!%p69_p8) target bundleno = 41 (0x29), region = 45 }
 0x3c8   : > { %v2632_v9 = vsel %vm2631_vm8, %v2630_v15, %v2629_v20 }
 0x3c9   : > { %v2636_v49 = vrot.slane %v2632_v9, %v2635_v17 }
 0x3cb   : > { %v2639_v37 = vsel %vm2638_vm11, %v2636_v49, 0.0 }
 0x3cc   : > { %2641 = vst [vmem:[%s2640_s30] sm:$0x1] %v2639_v37 }
 0x3cd   :  { %2726 = shalt.err (!%p2723_p13)
}
 0x3ce   :  { %s2727_s9 = scalar_lea.hbm %s7373_s3, 32 }
 0x3cf   :  { %p2728_p0 = scmp.ne.s32.totalorder %s7373_s3, %s2727_s9  ;;  %p2731_p1 = scmp.lt.u32.totalorder %s2727_s9, %s7373_s3 }
 0x3d1   :  { %p2733_p2 = pnand %p2731_p1, %p2728_p0 }
 0x3d3   :  { %2736 = shalt.err (!%p2733_p2)
}
 0x3d4   :  { %2651 = dma.vmem_to_hbm [thread:$0]  %s2649_s5, 32, %s7373_s3, [#allocation5]  }
 0x3d5   :  { %2743 = dma.done.wait [#allocation5], 32  }
 0x3d6   :  { %2744 = vsyncadd [#allocation5], 4294967264 }
 0x3d7   :  { %2655 = vsyncpa [#allocation4], 1 }
 0x3d8   :  { %2656 = vsyncpa [#allocation5], 1 }

</bundles_post_ra>
